<compile_context>
chip_gen: v7x
topology: tpu7x:2x2x1
jax: 0.10.0
libtpu: 0.0.40
codegen_flags: <defaults>
</compile_context>

<pallas_src>
import functools

import jax
import jax.numpy as jnp
from jax.experimental import pallas as pl
from jax.experimental.pallas import tpu as pltpu

LANE = 128      # lane width (last dim) for dense vector stores
SUBLANE = 8     # f32 sublane height (second-to-last dim)


def _round_up(x, m):
    return (x + m - 1) // m * m


def conv_bn_relu_kernel(x_ref, w_ref, bias_ref, o_ref, *,
                        stride, kh, kw, oh, ow, m_pad):
    """Fused im2col conv + folded-BN bias + ReLU, one MXU matmul.

    x_ref:    (N, H, W, Cin)          full NHWC input (all batch elements)
    w_ref:    (KH*KW*Cin, Cout_pad)   BN-scale-folded weights, Cout zero-padded
    bias_ref: (1, Cout_pad)           folded bias = (conv_b - mean)*scale + beta
    o_ref:    (M_pad, Cout_pad)       lane-dense flattened output (M = N*OH*OW)
    """
    n, _, _, cin = x_ref.shape
    x = x_ref[...]

    # im2col: one (strided) slice per tap, concatenated along the lane axis.
    # KH*KW is small & static -> fully unrolled at trace time.
    taps = []
    for i in range(kh):
        for j in range(kw):
            taps.append(
                jax.lax.slice(
                    x,
                    (0, i, j, 0),
                    (n, i + (oh - 1) * stride + 1, j + (ow - 1) * stride + 1, cin),
                    (1, stride, stride, 1),
                ))                            # (N, OH, OW, Cin)
    patches = jnp.concatenate(taps, axis=-1)  # (N, OH, OW, KH*KW*Cin)
    m = n * oh * ow
    patches = patches.reshape(m, kh * kw * cin)
    if m_pad != m:                            # sublane-align M (static check)
        patches = jnp.pad(patches, ((0, m_pad - m), (0, 0)))

    # Single MXU matmul: (M_pad, K) x (K, Cout_pad), f32 accumulation.
    y = jnp.dot(patches, w_ref[...], preferred_element_type=jnp.float32)

    # Epilogue: folded-BN bias + ReLU (BN scale already folded into weights).
    y = jnp.maximum(y + bias_ref[...], 0.0)
    o_ref[...] = y.astype(o_ref.dtype)
    # TODO(synk): Dropout is identity (eval mode); no in-kernel RNG mask.
    # TODO(synk): train-mode BatchNorm (batch statistics) is not implemented.


def conv_block_forward(x_nchw, w_oihw, conv_b, gamma, beta, run_mean, run_var,
                       *, stride, eps=1e-5):
    """Pallas ConvBlock forward (eval mode). NCHW in / NCHW out like PyTorch."""
    x = jnp.transpose(x_nchw, (0, 2, 3, 1)).astype(jnp.float32)   # NCHW -> NHWC
    N, H, W, Cin = x.shape
    Cout, _, KH, KW = w_oihw.shape
    OH = (H - KH) // stride + 1        # VALID conv (nn.Conv2d default padding=0)
    OW = (W - KW) // stride + 1

    # Fold BN (eval, running stats) into the conv weights + a per-channel bias.
    inv_std = 1.0 / jnp.sqrt(run_var + eps)
    scale = gamma * inv_std                                    # (Cout,)
    bias = (conv_b - run_mean) * scale + beta                  # (Cout,)

    w_hwio = jnp.transpose(w_oihw, (2, 3, 1, 0))               # (KH, KW, Cin, Cout)
    w_folded = (w_hwio * scale.reshape(1, 1, 1, Cout)).astype(jnp.float32)
    K = KH * KW * Cin
    w2 = w_folded.reshape(K, Cout)            # row index ((i*KW+j)*Cin + c) matches
                                              # the tap-concat order in the kernel.

    Cout_pad = _round_up(Cout, LANE)                           # lane-dense output
    w2 = jnp.pad(w2, ((0, 0), (0, Cout_pad - Cout)))
    bias_p = jnp.pad(bias.astype(jnp.float32),
                     (0, Cout_pad - Cout)).reshape(1, Cout_pad)

    M = N * OH * OW
    M_pad = _round_up(M, SUBLANE)                              # sublane-dense output
    kernel = functools.partial(conv_bn_relu_kernel, stride=stride,
                               kh=KH, kw=KW, oh=OH, ow=OW, m_pad=M_pad)

    out2d = pl.pallas_call(
        kernel,
        out_shape=jax.ShapeDtypeStruct((M_pad, Cout_pad), x.dtype),
        grid_spec=pltpu.PrefetchScalarGridSpec(
            num_scalar_prefetch=0,
            grid=(1,),                          # whole (tiny) problem in one step
            in_specs=[
                pl.BlockSpec((N, H, W, Cin), lambda i: (0, 0, 0, 0)),
                pl.BlockSpec((K, Cout_pad), lambda i: (0, 0)),
                pl.BlockSpec((1, Cout_pad), lambda i: (0, 0)),
            ],
            out_specs=pl.BlockSpec((M_pad, Cout_pad), lambda i: (0, 0)),
        ),
        compiler_params=pltpu.CompilerParams(
            dimension_semantics=("arbitrary",)),
    )(x, w2, bias_p)
    # TODO(synk): for large H/W/Cin, tile OH rows (with a (KH-1)-row halo) over a
    #             parallel grid axis and set vmem_limit_bytes so it fits v7x VMEM.

    out = out2d[:M, :Cout].reshape(N, OH, OW, Cout)            # strip padding
    return jnp.transpose(out, (0, 3, 1, 2))                    # NHWC -> NCHW


def _reference_forward(x_nchw, w_oihw, conv_b, gamma, beta, run_mean, run_var,
                       *, stride, eps=1e-5):
    """Pure-JAX reference (eval-mode PyTorch semantics)."""
    y = jax.lax.conv_general_dilated(
        x_nchw, w_oihw, (stride, stride), "VALID",
        dimension_numbers=("NCHW", "OIHW", "NCHW"))
    y = y + conv_b.reshape(1, -1, 1, 1)
    c = lambda v: v.reshape(1, -1, 1, 1)
    y = (y - c(run_mean)) / jnp.sqrt(c(run_var) + eps) * c(gamma) + c(beta)
    return jnp.maximum(y, 0.0)


if __name__ == "__main__":
    # ConvBlock(in_channels=4, out_channels=8, kernel_size=3, stride=1, dropout=0.1)
    in_channels, out_channels, kernel_size, stride = 4, 8, 3, 1

    key = jax.random.PRNGKey(0)
    kx, kw, kb, kg, kbe, km, kv = jax.random.split(key, 7)

    x = jax.random.normal(kx, (2, in_channels, 16, 16), dtype=jnp.float32)

    # Deterministic synthetic parameters (shapes follow nn.Conv2d / nn.BatchNorm2d).
    w_oihw = 0.1 * jax.random.normal(
        kw, (out_channels, in_channels, kernel_size, kernel_size), dtype=jnp.float32)
    conv_b = 0.1 * jax.random.normal(kb, (out_channels,), dtype=jnp.float32)
    gamma = 1.0 + 0.1 * jax.random.normal(kg, (out_channels,), dtype=jnp.float32)
    beta = 0.1 * jax.random.normal(kbe, (out_channels,), dtype=jnp.float32)
    run_mean = 0.1 * jax.random.normal(km, (out_channels,), dtype=jnp.float32)
    run_var = jnp.abs(jax.random.normal(kv, (out_channels,), dtype=jnp.float32)) + 0.5

    out = conv_block_forward(x, w_oihw, conv_b, gamma, beta, run_mean, run_var,
                             stride=stride)
    out = jax.block_until_ready(out)

    ref = _reference_forward(x, w_oihw, conv_b, gamma, beta, run_mean, run_var,
                             stride=stride)
    assert out.shape == ref.shape, (out.shape, ref.shape)
    assert jnp.allclose(out, ref, atol=1e-4, rtol=1e-4), float(jnp.max(jnp.abs(out - ref)))

    print("KERNEL_OK")
</pallas_src>

<mosaic_0001>
module attributes {stable_mosaic.version = 11 : i64} {
  func.func @conv_bn_relu_kernel(%arg0: i32, %arg1: memref<2x16x16x4xf32, #tpu.memory_space<vmem>>, %arg2: memref<36x128xf32, #tpu.memory_space<vmem>>, %arg3: memref<1x128xf32, #tpu.memory_space<vmem>>, %arg4: memref<392x128xf32, #tpu.memory_space<vmem>>) attributes {dimension_semantics = [#tpu.dimension_semantics<arbitrary>], iteration_bounds = array<i64: 1>, scalar_prefetch = 0 : i64, scratch_operands = 0 : i64, tpu.core_type = #tpu.core_type<tc>, window_params = [{pipeline_mode = #tpu.pipeline_mode<synchronous>, transform_indices = @transform_0, window_bounds = array<i64: 2, 16, 16, 4>}, {pipeline_mode = #tpu.pipeline_mode<synchronous>, transform_indices = @transform_1, window_bounds = array<i64: 36, 128>}, {pipeline_mode = #tpu.pipeline_mode<synchronous>, transform_indices = @transform_2, window_bounds = array<i64: 1, 128>}, {pipeline_mode = #tpu.pipeline_mode<synchronous>, transform_indices = @transform_3, window_bounds = array<i64: 392, 128>}]} {
    %c0 = arith.constant 0 : index
    %c0_0 = arith.constant 0 : index
    %c0_1 = arith.constant 0 : index
    %c0_2 = arith.constant 0 : index
    %0 = vector.load %arg1[%c0, %c0_0, %c0_1, %c0_2] : memref<2x16x16x4xf32, #tpu.memory_space<vmem>>, vector<2x16x16x4xf32>
    %1 = vector.extract_strided_slice %0 {offsets = [0, 0, 0, 0], sizes = [2, 14, 14, 4], strides = [1, 1, 1, 1]} : vector<2x16x16x4xf32> to vector<2x14x14x4xf32>
    %2 = vector.extract_strided_slice %0 {offsets = [0, 0, 1, 0], sizes = [2, 14, 14, 4], strides = [1, 1, 1, 1]} : vector<2x16x16x4xf32> to vector<2x14x14x4xf32>
    %3 = vector.extract_strided_slice %0 {offsets = [0, 0, 2, 0], sizes = [2, 14, 14, 4], strides = [1, 1, 1, 1]} : vector<2x16x16x4xf32> to vector<2x14x14x4xf32>
    %4 = vector.extract_strided_slice %0 {offsets = [0, 1, 0, 0], sizes = [2, 14, 14, 4], strides = [1, 1, 1, 1]} : vector<2x16x16x4xf32> to vector<2x14x14x4xf32>
    %5 = vector.extract_strided_slice %0 {offsets = [0, 1, 1, 0], sizes = [2, 14, 14, 4], strides = [1, 1, 1, 1]} : vector<2x16x16x4xf32> to vector<2x14x14x4xf32>
    %6 = vector.extract_strided_slice %0 {offsets = [0, 1, 2, 0], sizes = [2, 14, 14, 4], strides = [1, 1, 1, 1]} : vector<2x16x16x4xf32> to vector<2x14x14x4xf32>
    %7 = vector.extract_strided_slice %0 {offsets = [0, 2, 0, 0], sizes = [2, 14, 14, 4], strides = [1, 1, 1, 1]} : vector<2x16x16x4xf32> to vector<2x14x14x4xf32>
    %8 = vector.extract_strided_slice %0 {offsets = [0, 2, 1, 0], sizes = [2, 14, 14, 4], strides = [1, 1, 1, 1]} : vector<2x16x16x4xf32> to vector<2x14x14x4xf32>
    %9 = vector.extract_strided_slice %0 {offsets = [0, 2, 2, 0], sizes = [2, 14, 14, 4], strides = [1, 1, 1, 1]} : vector<2x16x16x4xf32> to vector<2x14x14x4xf32>
    %10 = tpu.concatenate %1, %2, %3, %4, %5, %6, %7, %8, %9 in 3 : vector<2x14x14x4xf32>, vector<2x14x14x4xf32>, vector<2x14x14x4xf32>, vector<2x14x14x4xf32>, vector<2x14x14x4xf32>, vector<2x14x14x4xf32>, vector<2x14x14x4xf32>, vector<2x14x14x4xf32>, vector<2x14x14x4xf32> -> vector<2x14x14x36xf32>
    %11 = vector.shape_cast %10 : vector<2x14x14x36xf32> to vector<392x36xf32>
    %c0_3 = arith.constant 0 : index
    %c0_4 = arith.constant 0 : index
    %12 = vector.load %arg2[%c0_3, %c0_4] : memref<36x128xf32, #tpu.memory_space<vmem>>, vector<36x128xf32>
    %cst = arith.constant dense<0.000000e+00> : vector<392x128xf32>
    %13 = tpu.matmul %11, %12, %cst {dimension_numbers = #tpu.dot_dimension_numbers<[1], [0], [0], [1], [0, 0, 1, 1], [], []>} : vector<392x36xf32>, vector<36x128xf32>, vector<392x128xf32> -> vector<392x128xf32>
    %c0_5 = arith.constant 0 : index
    %c0_6 = arith.constant 0 : index
    %14 = vector.load %arg3[%c0_5, %c0_6] : memref<1x128xf32, #tpu.memory_space<vmem>>, vector<1x128xf32>
    %15 = vector.broadcast %14 : vector<1x128xf32> to vector<392x128xf32>
    %16 = arith.addf %13, %15 : vector<392x128xf32>
    %cst_7 = arith.constant 0.000000e+00 : f32
    %17 = vector.broadcast %cst_7 : f32 to vector<392x128xf32>
    %18 = arith.maximumf %16, %17 : vector<392x128xf32>
    %c0_8 = arith.constant 0 : index
    %c0_9 = arith.constant 0 : index
    %19 = vector.load %arg4[%c0_8, %c0_9] : memref<392x128xf32, #tpu.memory_space<vmem>>, vector<392x128xf32>
    tpu.vector_store %arg4[%c0_8, %c0_9], %18 {strides = array<i32>} : memref<392x128xf32, #tpu.memory_space<vmem>>, vector<392x128xf32>,
    return
  }
  func.func @transform_0(%arg0: i32) -> (i32, i32, i32, i32) {
    %c0_i32 = arith.constant 0 : i32
    %c0_i32_0 = arith.constant 0 : i32
    %c0_i32_1 = arith.constant 0 : i32
    %c0_i32_2 = arith.constant 0 : i32
    %c0_i32_3 = arith.constant 0 : i32
    return %c0_i32, %c0_i32_0, %c0_i32_1, %c0_i32_2 : i32, i32, i32, i32
  }
  func.func @transform_1(%arg0: i32) -> (i32, i32) {
    %c0_i32 = arith.constant 0 : i32
    %c0_i32_0 = arith.constant 0 : i32
    %c0_i32_1 = arith.constant 0 : i32
    return %c0_i32, %c0_i32_0 : i32, i32
  }
  func.func @transform_2(%arg0: i32) -> (i32, i32) {
    %c0_i32 = arith.constant 0 : i32
    %c0_i32_0 = arith.constant 0 : i32
    %c0_i32_1 = arith.constant 0 : i32
    return %c0_i32, %c0_i32_0 : i32, i32
  }
  func.func @transform_3(%arg0: i32) -> (i32, i32) {
    %c0_i32 = arith.constant 0 : i32
    %c0_i32_0 = arith.constant 0 : i32
    %c0_i32_1 = arith.constant 0 : i32
    return %c0_i32, %c0_i32_0 : i32, i32
  }
}

</mosaic_0001>

<bundles_post_ra>
// kernel: tpu_custom_call.1
= control target key start
LH: loop header
LB: loop body
LE: loop exit
PB: predicated region body
PF: predicated region fallthrough
CT: control target
= control target key end

     0   :  { %vm135_vm0 = vcmask 1046528   ;;  %s4899_s24 = smov 4   ;;  %s8661_s0 = inlined_call_operand.vmem [shape: f32[2,16,16,4], index: 0, kind: input, shape index: {}]   ;;  %s8662_s1 = inlined_call_operand.vmem [shape: f32[36,128], index: 1, kind: input, shape index: {}]   ;;  %s8663_s2 = inlined_call_operand.vmem [shape: f32[1,128], index: 2, kind: input, shape index: {}]   ;;  %s8664_s3 = inlined_call_operand.hbm [shape: f32[392,128], index: 3, kind: output, shape index: {}]  }
   0x1   :  { %v4936_v0 = vld [vmem:[%s8661_s0 + $0x18] sm:$0xff]  ;;  %v4941_v1 = vld [vmem:[%s8661_s0 + $0x8] sm:$0xff]  ;;  %v4946_v2 = vld [vmem:[%s8661_s0 + $0x10] sm:$0xff] }
   0x2   :  { %v4949_v3 = vrot.slane %v4936_v0, 1  ;;  %v137_v4 = vrot.slane %v4941_v1, 1  ;;  %v139_v5 = vrot.slane %v4946_v2, 1  ;;  %v4956_v6 = vld [vmem:[%s8661_s0] sm:$0xff]  ;;  %v4961_v7 = vld [vmem:[%s8661_s0 + $0x28] sm:$0xff]  ;;  %v4984_v14 = vld [vmem:[%s8661_s0 + $0x38] sm:$0xff] }
   0x3   :  { %v4966_v8 = vld [vmem:[%s8661_s0 + $0x20] sm:$0xff]  ;;  %v136_v9 = vrot.slane %v4956_v6, 1  ;;  %v4978_v12 = vrot.slane %v4961_v7, 1  ;;  %v4989_v15 = vld [vmem:[%s8661_s0 + $0x30] sm:$0xff]  ;;  %v4999_v17 = vrot.slane %v4984_v14, 1  ;;  %v5005_v19 = vld [vmem:[%s8661_s0 + $0x48] sm:$0xff] }
   0x4   :  { %8874 = vst [vmem:[#allocation5_spill] sm:$0xff] %v4949_v3  ;;  %226 = vrot.lane.b32.xlu1 %v4949_v3, %s4899_s24  ;;  %222 = vrot.lane.b32.xlu0 %v137_v4, %s4899_s24  ;;  %v4974_v10 = vsel %vm135_vm0, %v139_v5, %v4949_v3  ;;  %v142_v13 = vrot.slane %v4966_v8, 1  ;;  %v145_v18 = vrot.slane %v4989_v15, 1  ;;  %v5010_v20 = vld [vmem:[%s8661_s0 + $0x40] sm:$0xff]  ;;  %v5021_v22 = vrot.slane %v5005_v19, 1  ;;  %v5027_v24 = vld [vmem:[%s8661_s0 + $0x58] sm:$0xff] }
   0x5   :  { %8875 = vst [vmem:[#allocation6_spill] sm:$0xff] %v4974_v10  ;;  %v138_v11 = vsel %vm135_vm0, %v136_v9, %v137_v4  ;;  %8876 = vst [vmem:[#allocation7_spill] sm:$0xff] %v4978_v12  ;;  %v148_v23 = vrot.slane %v5010_v20, 1  ;;  %v5032_v25 = vld [vmem:[%s8661_s0 + $0x50] sm:$0xff]  ;;  %v5043_v27 = vrot.slane %v5027_v24, 1  ;;  %v5049_v29 = vld [vmem:[%s8661_s0 + $0x68] sm:$0xff] }
   0x6   :  { %v4996_v16 = vsel %vm135_vm0, %v142_v13, %v4978_v12  ;;  %8878 = vst [vmem:[#allocation9_spill] sm:$0xff] %v4999_v17  ;;  %v5018_v21 = vsel %vm135_vm0, %v145_v18, %v4999_v17  ;;  %8880 = vst [vmem:[#allocation11_spill] sm:$0xff] %v5021_v22  ;;  %v151_v28 = vrot.slane %v5032_v25, 1  ;;  %v5054_v30 = vld [vmem:[%s8661_s0 + $0x60] sm:$0xff]  ;;  %v5065_v32 = vrot.slane %v5049_v29, 1 }
   0x7   :  { %8877 = vst [vmem:[#allocation8_spill] sm:$0xff] %v4996_v16  ;;  %8879 = vst [vmem:[#allocation10_spill] sm:$0xff] %v5018_v21  ;;  %v5040_v26 = vsel %vm135_vm0, %v148_v23, %v5021_v22  ;;  %v154_v33 = vrot.slane %v5054_v30, 1 }
   0x8   :  { %224 = vrot.lane.b32.xlu1 %v4974_v10, %s4899_s24  ;;  %220 = vrot.lane.b32.xlu0 %v138_v11, %s4899_s24  ;;  %8881 = vst [vmem:[#allocation12_spill] sm:$0xff] %v5040_v26  ;;  %8882 = vst [vmem:[#allocation13_spill] sm:$0xff] %v5043_v27  ;;  %v5062_v31 = vsel %vm135_vm0, %v151_v28, %v5043_v27 }
   0x9   :  { %8883 = vst [vmem:[#allocation14_spill] sm:$0xff] %v5062_v31  ;;  %8884 = vst [vmem:[#allocation15_spill] sm:$0xff] %v5065_v32 }
   0xc   :  { %230 = vrot.lane.b32.xlu1 %v4978_v12, %s4899_s24  ;;  %228 = vrot.lane.b32.xlu0 %v4996_v16, %s4899_s24 }
  0x10   :  { %234 = vrot.lane.b32.xlu1 %v4999_v17, %s4899_s24  ;;  %232 = vrot.lane.b32.xlu0 %v5018_v21, %s4899_s24 }
  0x14   :  { %238 = vrot.lane.b32.xlu1 %v5021_v22, %s4899_s24  ;;  %236 = vrot.lane.b32.xlu0 %v5040_v26, %s4899_s24 }
  0x15   :  { %8 = vsyncpa [#allocation3], 0  ;;  %v5071_v34 = vld [vmem:[%s8661_s0 + $0x78] sm:$0xff]  ;;  %v5076_v35 = vld [vmem:[%s8661_s0 + $0x70] sm:$0xff]  ;;  %v5084_v36 = vsel %vm135_vm0, %v154_v33, %v5065_v32  ;;  %vm388_vm1 = vcmask 1045504   ;;  %v5539_v3 = vrot.slane %v4936_v0, 2 }
  0x16   :  { %8885 = vst [vmem:[#allocation16_spill] sm:$0xff] %v5084_v36  ;;  %v5087_v37 = vrot.slane %v5071_v34, 1  ;;  %v157_v38 = vrot.slane %v5076_v35, 1  ;;  %v5093_v39 = vld [vmem:[%s8661_s0 + $0x88] sm:$0xff]  ;;  %v5098_v40 = vld [vmem:[%s8661_s0 + $0x80] sm:$0xff]  ;;  %v5115_v44 = vld [vmem:[%s8661_s0 + $0x98] sm:$0xff] }
  0x17   :  { %v5109_v42 = vrot.slane %v5093_v39, 1  ;;  %v160_v43 = vrot.slane %v5098_v40, 1  ;;  %v5120_v45 = vld [vmem:[%s8661_s0 + $0x90] sm:$0xff]  ;;  %v5131_v47 = vrot.slane %v5115_v44, 1  ;;  %v5137_v49 = vld [vmem:[%s8661_s0 + $0xa8] sm:$0xff]  ;;  %v5142_v50 = vld [vmem:[%s8661_s0 + $0xa0] sm:$0xff] }
  0x18   :  { %242 = vrot.lane.b32.xlu1 %v5043_v27, %s4899_s24  ;;  %240 = vrot.lane.b32.xlu0 %v5062_v31, %s4899_s24  ;;  %8886 = vst [vmem:[#allocation17_spill] sm:$0xff] %v5087_v37  ;;  %v5106_v41 = vsel %vm135_vm0, %v157_v38, %v5087_v37  ;;  %v163_v48 = vrot.slane %v5120_v45, 1  ;;  %v5153_v52 = vrot.slane %v5137_v49, 1  ;;  %v166_v53 = vrot.slane %v5142_v50, 1  ;;  %v5159_v54 = vld [vmem:[%s8661_s0 + $0xb8] sm:$0xff]  ;;  %v5164_v55 = vld [vmem:[%s8661_s0 + $0xb0] sm:$0xff] }
  0x19   :  { %8887 = vst [vmem:[#allocation18_spill] sm:$0xff] %v5106_v41  ;;  %8888 = vst [vmem:[#allocation19_spill] sm:$0xff] %v5109_v42  ;;  %v5128_v46 = vsel %vm135_vm0, %v160_v43, %v5109_v42  ;;  %v5175_v57 = vrot.slane %v5159_v54, 1  ;;  %v169_v58 = vrot.slane %v5164_v55, 1  ;;  %v5181_v59 = vld [vmem:[%s8661_s0 + $0xc8] sm:$0xff]  ;;  %v5186_v60 = vld [vmem:[%s8661_s0 + $0xc0] sm:$0xff] }
  0x1a   :  { %8889 = vst [vmem:[#allocation20_spill] sm:$0xff] %v5128_v46  ;;  %8890 = vst [vmem:[#allocation21_spill] sm:$0xff] %v5131_v47  ;;  %v5150_v51 = vsel %vm135_vm0, %v163_v48, %v5131_v47  ;;  %v5172_v56 = vsel %vm135_vm0, %v166_v53, %v5153_v52  ;;  %v5197_v62 = vrot.slane %v5181_v59, 1  ;;  %v172_v63 = vrot.slane %v5186_v60, 1  ;;  %v5203_v4 = vld [vmem:[%s8661_s0 + $0xd8] sm:$0xff]  ;;  %v5208_v5 = vld [vmem:[%s8661_s0 + $0xd0] sm:$0xff] }
  0x1b   :  { %8891 = vst [vmem:[#allocation22_spill] sm:$0xff] %v5150_v51  ;;  %8892 = vst [vmem:[#allocation23_spill] sm:$0xff] %v5153_v52  ;;  %v5194_v61 = vsel %vm135_vm0, %v169_v58, %v5175_v57  ;;  %v5219_v11 = vrot.slane %v5203_v4, 1  ;;  %v175_v13 = vrot.slane %v5208_v5, 1  ;;  %v5225_v18 = vld [vmem:[%s8661_s0 + $0x108] sm:$0xff]  ;;  %v5230_v23 = vld [vmem:[%s8661_s0 + $0x100] sm:$0xff] }
  0x1c   :  { %246 = vrot.lane.b32.xlu1 %v5065_v32, %s4899_s24  ;;  %244 = vrot.lane.b32.xlu0 %v5084_v36, %s4899_s24  ;;  %8893 = vst [vmem:[#allocation24_spill] sm:$0xff] %v5172_v56  ;;  %8894 = vst [vmem:[#allocation25_spill] sm:$0xff] %v5175_v57  ;;  %v5216_v9 = vsel %vm135_vm0, %v172_v63, %v5197_v62  ;;  %v179_v33 = vrot.slane %v5225_v18, 1  ;;  %v178_v38 = vrot.slane %v5230_v23, 1  ;;  %v5245_v43 = vld [vmem:[%s8661_s0 + $0x118] sm:$0xff]  ;;  %v5250_v48 = vld [vmem:[%s8661_s0 + $0x110] sm:$0xff] }
  0x1d   :  { %8895 = vst [vmem:[#allocation26_spill] sm:$0xff] %v5194_v61  ;;  %8896 = vst [vmem:[#allocation27_spill] sm:$0xff] %v5197_v62  ;;  %v5238_v28 = vsel %vm135_vm0, %v175_v13, %v5219_v11  ;;  %v5258_v58 = vrot.slane %v5245_v43, 1  ;;  %v181_v63 = vrot.slane %v5250_v48, 1  ;;  %v5264_v13 = vld [vmem:[%s8661_s0 + $0x128] sm:$0xff]  ;;  %v5416_v32 = vld [vmem:[%s8661_s0 + $0x198] sm:$0xff] }
  0x1e   :  { %8897 = vst [vmem:[#allocation28_spill] sm:$0xff] %v5208_v5  ;;  %8898 = vst [vmem:[#allocation29_spill] sm:$0xff] %v5216_v9  ;;  %v180_v53 = vsel %vm135_vm0, %v178_v38, %v179_v33  ;;  %v5438_v27 = vld [vmem:[%s8661_s0 + $0x1a8] sm:$0xff]  ;;  %v5460_v22 = vld [vmem:[%s8661_s0 + $0x1b8] sm:$0xff]  ;;  %s4900_s20 = smov 8   ;;  %s4902_s30 = smov 16  }
  0x1f   :  { %8899 = vst [vmem:[#allocation30_spill] sm:$0xff] %v5219_v11  ;;  %8900 = vst [vmem:[#allocation31_spill] sm:$0xff] %v5238_v28  ;;  %v5275_v38 = vsel %vm135_vm0, %v181_v63, %v5258_v58  ;;  %v5482_v17 = vld [vmem:[%s8661_s0 + $0x1c8] sm:$0xff]  ;;  %v5504_v12 = vld [vmem:[%s8661_s0 + $0x1d8] sm:$0xff]  ;;  %s4903_s4 = smov 20   ;;  %s4905_s15 = smov 24  }
  0x20   :  { %250 = vrot.lane.b32.xlu1 %v5087_v37, %s4899_s24  ;;  %248 = vrot.lane.b32.xlu0 %v5106_v41, %s4899_s24  ;;  %8901 = vst [vmem:[#allocation32_spill] sm:$0xff] %v5258_v58  ;;  %8902 = vst [vmem:[#allocation33_spill] sm:$0xff] %v5275_v38  ;;  %v5394_v37 = vld [vmem:[%s8661_s0 + $0x188] sm:$0xff]  ;;  %vm4061_vm2 = vcmask 1043456   ;;  %s4907_s18 = smov 32   ;;  %s4908_s19 = smov 28  }
  0x21   :  { %8927 = vst [vmem:[#allocation58_spill] sm:$0xff] %v5539_v3  ;;  %vm4909_vm3 = vmmov 0   ;;  %vm1738_vm4 = vcmask 64512   ;;  %vm1681_vm5 = vcmask 31744   ;;  %vm1795_vm6 = vcmask 97280  }
  0x22   :  { %vm1852_vm7 = vcmask 130048   ;;  %vm1909_vm8 = vcmask 162816   ;;  %vm1966_vm9 = vcmask 195584   ;;  %vm2023_vm10 = vcmask 228352  }
  0x23   :  { %vm2080_vm11 = vcmask 261120   ;;  %vm3962_vm12 = vcmask 293888  }
  0x24   :  { %254 = vrot.lane.b32.xlu1 %v5109_v42, %s4899_s24  ;;  %252 = vrot.lane.b32.xlu0 %v5128_v46, %s4899_s24  ;;  %v5372_v42 = vld [vmem:[%s8661_s0 + $0x178] sm:$0xff] }
  0x28   :  { %258 = vrot.lane.b32.xlu1 %v5131_v47, %s4899_s24  ;;  %256 = vrot.lane.b32.xlu0 %v5150_v51, %s4899_s24  ;;  %v5350_v47 = vld [vmem:[%s8661_s0 + $0x168] sm:$0xff] }
  0x2c   :  { %262 = vrot.lane.b32.xlu1 %v5153_v52, %s4899_s24  ;;  %260 = vrot.lane.b32.xlu0 %v5172_v56, %s4899_s24  ;;  %v5328_v52 = vld [vmem:[%s8661_s0 + $0x158] sm:$0xff] }
  0x30   :  { %266 = vrot.lane.b32.xlu1 %v5175_v57, %s4899_s24  ;;  %264 = vrot.lane.b32.xlu0 %v5194_v61, %s4899_s24  ;;  %v5306_v57 = vld [vmem:[%s8661_s0 + $0x148] sm:$0xff] }
  0x34   :  { %270 = vrot.lane.b32.xlu1 %v5197_v62, %s4899_s24  ;;  %268 = vrot.lane.b32.xlu0 %v5216_v9, %s4899_s24  ;;  %v5269_v9 = vld [vmem:[%s8661_s0 + $0x120] sm:$0xff]  ;;  %v5284_v62 = vld [vmem:[%s8661_s0 + $0x138] sm:$0xff] }
  0x35   :  { %v5300_v63 = vrot.slane %v5284_v62, 1 }
  0x37   :  { %8905 = vst [vmem:[#allocation36_spill] sm:$0xff] %v5300_v63 }
  0x38   :  { %274 = vrot.lane.b32.xlu1 %v5219_v11, %s4899_s24  ;;  %272 = vrot.lane.b32.xlu0 %v5238_v28, %s4899_s24  ;;  %v5278_v28 = vrot.slane %v5264_v13, 1  ;;  %v184_v11 = vrot.slane %v5269_v9, 1 }
  0x3a   :  { %8903 = vst [vmem:[#allocation34_spill] sm:$0xff] %v5278_v28 }
  0x3c   :  { %278 = vrot.lane.b32.xlu1 %v179_v33, %s4899_s24  ;;  %276 = vrot.lane.b32.xlu0 %v180_v53, %s4899_s24  ;;  %v5289_v33 = vld [vmem:[%s8661_s0 + $0x130] sm:$0xff]  ;;  %v5297_v53 = vsel %vm135_vm0, %v184_v11, %v5278_v28 }
  0x3d   :  { %8904 = vst [vmem:[#allocation35_spill] sm:$0xff] %v5297_v53  ;;  %v187_v61 = vrot.slane %v5289_v33, 1 }
  0x3f   :  { %v5319_v11 = vsel %vm135_vm0, %v187_v61, %v5300_v63 }
  0x40   :  { %282 = vrot.lane.b32.xlu1 %v5258_v58, %s4899_s24  ;;  %280 = vrot.lane.b32.xlu0 %v5275_v38, %s4899_s24  ;;  %v5311_v58 = vld [vmem:[%s8661_s0 + $0x140] sm:$0xff]  ;;  %8906 = vst [vmem:[#allocation37_spill] sm:$0xff] %v5319_v11  ;;  %v5322_v38 = vrot.slane %v5306_v57, 1 }
  0x41   :  { %v190_v56 = vrot.slane %v5311_v58, 1 }
  0x42   :  { %8907 = vst [vmem:[#allocation38_spill] sm:$0xff] %v5322_v38 }
  0x43   :  { %v5341_v61 = vsel %vm135_vm0, %v190_v56, %v5322_v38 }
  0x44   :  { %286 = vrot.lane.b32.xlu1 %v5278_v28, %s4899_s24  ;;  %284 = vrot.lane.b32.xlu0 %v5297_v53, %s4899_s24  ;;  %v5333_v28 = vld [vmem:[%s8661_s0 + $0x150] sm:$0xff]  ;;  %8908 = vst [vmem:[#allocation39_spill] sm:$0xff] %v5341_v61  ;;  %v5344_v53 = vrot.slane %v5328_v52, 1 }
  0x45   :  { %v193_v51 = vrot.slane %v5333_v28, 1 }
  0x46   :  { %8909 = vst [vmem:[#allocation40_spill] sm:$0xff] %v5344_v53 }
  0x47   :  { %v5363_v56 = vsel %vm135_vm0, %v193_v51, %v5344_v53 }
  0x48   :  { %290 = vrot.lane.b32.xlu1 %v5300_v63, %s4899_s24  ;;  %288 = vrot.lane.b32.xlu0 %v5319_v11, %s4899_s24  ;;  %v5355_v63 = vld [vmem:[%s8661_s0 + $0x160] sm:$0xff]  ;;  %8910 = vst [vmem:[#allocation41_spill] sm:$0xff] %v5363_v56  ;;  %v5366_v11 = vrot.slane %v5350_v47, 1 }
  0x49   :  { %v196_v46 = vrot.slane %v5355_v63, 1 }
  0x4a   :  { %8911 = vst [vmem:[#allocation42_spill] sm:$0xff] %v5366_v11 }
  0x4b   :  { %v5385_v51 = vsel %vm135_vm0, %v196_v46, %v5366_v11 }
  0x4c   :  { %294 = vrot.lane.b32.xlu1 %v5322_v38, %s4899_s24  ;;  %292 = vrot.lane.b32.xlu0 %v5341_v61, %s4899_s24  ;;  %v5377_v38 = vld [vmem:[%s8661_s0 + $0x170] sm:$0xff]  ;;  %8912 = vst [vmem:[#allocation43_spill] sm:$0xff] %v5385_v51  ;;  %v5388_v61 = vrot.slane %v5372_v42, 1 }
  0x4d   :  { %v199_v41 = vrot.slane %v5377_v38, 1 }
  0x4e   :  { %8913 = vst [vmem:[#allocation44_spill] sm:$0xff] %v5388_v61 }
  0x4f   :  { %v5407_v46 = vsel %vm135_vm0, %v199_v41, %v5388_v61 }
  0x50   :  { %298 = vrot.lane.b32.xlu1 %v5344_v53, %s4899_s24  ;;  %296 = vrot.lane.b32.xlu0 %v5363_v56, %s4899_s24  ;;  %v5399_v53 = vld [vmem:[%s8661_s0 + $0x180] sm:$0xff]  ;;  %8914 = vst [vmem:[#allocation45_spill] sm:$0xff] %v5407_v46  ;;  %v5410_v56 = vrot.slane %v5394_v37, 1 }
  0x51   :  { %v202_v36 = vrot.slane %v5399_v53, 1 }
  0x52   :  { %8915 = vst [vmem:[#allocation46_spill] sm:$0xff] %v5410_v56 }
  0x53   :  { %v5429_v41 = vsel %vm135_vm0, %v202_v36, %v5410_v56 }
  0x54   :  { %302 = vrot.lane.b32.xlu1 %v5366_v11, %s4899_s24  ;;  %300 = vrot.lane.b32.xlu0 %v5385_v51, %s4899_s24  ;;  %v5421_v11 = vld [vmem:[%s8661_s0 + $0x190] sm:$0xff]  ;;  %8916 = vst [vmem:[#allocation47_spill] sm:$0xff] %v5429_v41  ;;  %v5432_v51 = vrot.slane %v5416_v32, 1 }
  0x55   :  { %v205_v31 = vrot.slane %v5421_v11, 1 }
  0x56   :  { %8917 = vst [vmem:[#allocation48_spill] sm:$0xff] %v5432_v51 }
  0x57   :  { %v5451_v36 = vsel %vm135_vm0, %v205_v31, %v5432_v51 }
  0x58   :  { %306 = vrot.lane.b32.xlu1 %v5388_v61, %s4899_s24  ;;  %304 = vrot.lane.b32.xlu0 %v5407_v46, %s4899_s24  ;;  %v5443_v61 = vld [vmem:[%s8661_s0 + $0x1a0] sm:$0xff]  ;;  %8918 = vst [vmem:[#allocation49_spill] sm:$0xff] %v5451_v36  ;;  %v5454_v46 = vrot.slane %v5438_v27, 1 }
  0x59   :  { %v208_v26 = vrot.slane %v5443_v61, 1 }
  0x5a   :  { %8919 = vst [vmem:[#allocation50_spill] sm:$0xff] %v5454_v46 }
  0x5b   :  { %v5473_v31 = vsel %vm135_vm0, %v208_v26, %v5454_v46 }
  0x5c   :  { %310 = vrot.lane.b32.xlu1 %v5410_v56, %s4899_s24  ;;  %308 = vrot.lane.b32.xlu0 %v5429_v41, %s4899_s24  ;;  %v5465_v56 = vld [vmem:[%s8661_s0 + $0x1b0] sm:$0xff]  ;;  %8920 = vst [vmem:[#allocation51_spill] sm:$0xff] %v5473_v31  ;;  %v5476_v41 = vrot.slane %v5460_v22, 1 }
  0x5d   :  { %v211_v21 = vrot.slane %v5465_v56, 1 }
  0x5e   :  { %8921 = vst [vmem:[#allocation52_spill] sm:$0xff] %v5476_v41 }
  0x5f   :  { %v5495_v26 = vsel %vm135_vm0, %v211_v21, %v5476_v41 }
  0x60   :  { %314 = vrot.lane.b32.xlu1 %v5432_v51, %s4899_s24  ;;  %312 = vrot.lane.b32.xlu0 %v5451_v36, %s4899_s24  ;;  %v5487_v51 = vld [vmem:[%s8661_s0 + $0x1c0] sm:$0xff]  ;;  %8922 = vst [vmem:[#allocation53_spill] sm:$0xff] %v5495_v26  ;;  %v5498_v36 = vrot.slane %v5482_v17, 1 }
  0x61   :  { %v214_v16 = vrot.slane %v5487_v51, 1 }
  0x62   :  { %8923 = vst [vmem:[#allocation54_spill] sm:$0xff] %v5498_v36 }
  0x63   :  { %v5517_v21 = vsel %vm135_vm0, %v214_v16, %v5498_v36  ;;  %v389_v16 = vrot.slane %v4956_v6, 2  ;;  %v5549_v6 = vrot.slane %v4961_v7, 2 }
  0x64   :  { %318 = vrot.lane.b32.xlu1 %v5454_v46, %s4899_s24  ;;  %316 = vrot.lane.b32.xlu0 %v5473_v31, %s4899_s24  ;;  %v5509_v46 = vld [vmem:[%s8661_s0 + $0x1d0] sm:$0xff]  ;;  %8924 = vst [vmem:[#allocation55_spill] sm:$0xff] %v5517_v21  ;;  %v5520_v31 = vrot.slane %v5504_v12, 1 }
  0x65   :  { %v217_v10 = vrot.slane %v5509_v46, 1  ;;  %8929 = vst [vmem:[#allocation60_spill] sm:$0xff] %v5549_v6 }
  0x66   :  { %8925 = vst [vmem:[#allocation56_spill] sm:$0xff] %v5520_v31 }
  0x68   :  { %322 = vrot.lane.b32.xlu1 %v5476_v41, %s4899_s24  ;;  %320 = vrot.lane.b32.xlu0 %v5495_v26, %s4899_s24  ;;  %v5529_v41 = vsel %vm135_vm0, %v217_v10, %v5520_v31  ;;  %v390_v26 = vrot.slane %v4941_v1, 2  ;;  %v395_v10 = vrot.slane %v4966_v8, 2 }
  0x69   :  { %8926 = vst [vmem:[#allocation57_spill] sm:$0xff] %v5529_v41 }
  0x6c   :  { %326 = vrot.lane.b32.xlu1 %v5498_v36, %s4899_s24  ;;  %324 = vrot.lane.b32.xlu0 %v5517_v21, %s4899_s24  ;;  %v391_v36 = vsel %vm388_vm1, %v389_v16, %v390_v26  ;;  %v392_v21 = vrot.slane %v4946_v2, 2 }
  0x6e   :  { %v5546_v1 = vsel %vm388_vm1, %v392_v21, %v5539_v3  ;;  %v398_v21 = vrot.slane %v4989_v15, 2 }
  0x6f   :  { %8928 = vst [vmem:[#allocation59_spill] sm:$0xff] %v5546_v1 }
  0x70   :  { %330 = vrot.lane.b32.xlu1 %v5520_v31, %s4899_s24  ;;  %328 = vrot.lane.b32.xlu0 %v5529_v41, %s4899_s24  ;;  %s4901_s24 = smov 12  }
  0x74   :  { %475 = vrot.lane.b32.xlu1 %v390_v26, %s4900_s20  ;;  %473 = vrot.lane.b32.xlu0 %v391_v36, %s4900_s20  ;;  %v5562_v36 = vsel %vm388_vm1, %v395_v10, %v5549_v6  ;;  %v5565_v26 = vrot.slane %v4984_v14, 2  ;;  %v5581_v10 = vrot.slane %v5005_v19, 2 }
  0x75   :  { %8932 = vst [vmem:[#allocation63_spill] sm:$0xff] %v5562_v36 }
  0x76   :  { %v5552_v16 = vpop.permute.xlu1 %226  ;;  %v5554_v41 = vpop.permute.xlu0 %222  ;;  %8933 = vst [vmem:[#allocation64_spill] sm:$0xff] %v5565_v26  ;;  %8937 = vst [vmem:[#allocation68_spill] sm:$0xff] %v5581_v10 }
  0x77   :  { %8930 = vst [vmem:[#allocation61_spill] sm:$0xff] %v5552_v16  ;;  %8931 = vst [vmem:[#allocation62_spill] sm:$0xff] %v5554_v41  ;;  %v5578_v41 = vsel %vm388_vm1, %v398_v21, %v5565_v26  ;;  %v5597_v21 = vrot.slane %v5027_v24, 2 }
  0x78   :  { %479 = vrot.lane.b32.xlu1 %v5539_v3, %s4900_s20  ;;  %477 = vrot.lane.b32.xlu0 %v5546_v1, %s4900_s20  ;;  %8936 = vst [vmem:[#allocation67_spill] sm:$0xff] %v5578_v41  ;;  %v401_v1 = vrot.slane %v5010_v20, 2 }
  0x79   :  { %8941 = vst [vmem:[#allocation72_spill] sm:$0xff] %v5597_v21 }
  0x7a   :  { %v5568_v31 = vpop.permute.xlu1 %224  ;;  %v5570_v16 = vpop.permute.xlu0 %220 }
  0x7b   :  { %8934 = vst [vmem:[#allocation65_spill] sm:$0xff] %v5568_v31  ;;  %8935 = vst [vmem:[#allocation66_spill] sm:$0xff] %v5570_v16  ;;  %v5594_v16 = vsel %vm388_vm1, %v401_v1, %v5581_v10  ;;  %v5613_v1 = vrot.slane %v5049_v29, 2 }
  0x7c   :  { %483 = vrot.lane.b32.xlu1 %v5549_v6, %s4900_s20  ;;  %481 = vrot.lane.b32.xlu0 %v5562_v36, %s4900_s20  ;;  %8940 = vst [vmem:[#allocation71_spill] sm:$0xff] %v5594_v16  ;;  %v404_v36 = vrot.slane %v5032_v25, 2 }
  0x7d   :  { %8945 = vst [vmem:[#allocation76_spill] sm:$0xff] %v5613_v1 }
  0x7e   :  { %v5584_v3 = vpop.permute.xlu1 %230  ;;  %v5586_v31 = vpop.permute.xlu0 %228 }
  0x7f   :  { %8938 = vst [vmem:[#allocation69_spill] sm:$0xff] %v5584_v3  ;;  %8939 = vst [vmem:[#allocation70_spill] sm:$0xff] %v5586_v31  ;;  %v5610_v31 = vsel %vm388_vm1, %v404_v36, %v5597_v21  ;;  %v5629_v36 = vrot.slane %v5071_v34, 2 }
  0x80   :  { %487 = vrot.lane.b32.xlu1 %v5565_v26, %s4900_s20  ;;  %485 = vrot.lane.b32.xlu0 %v5578_v41, %s4900_s20  ;;  %8944 = vst [vmem:[#allocation75_spill] sm:$0xff] %v5610_v31  ;;  %v407_v41 = vrot.slane %v5054_v30, 2 }
  0x81   :  { %8949 = vst [vmem:[#allocation80_spill] sm:$0xff] %v5629_v36 }
  0x82   :  { %v5600_v6 = vpop.permute.xlu1 %234  ;;  %v5602_v3 = vpop.permute.xlu0 %232 }
  0x83   :  { %8942 = vst [vmem:[#allocation73_spill] sm:$0xff] %v5600_v6  ;;  %8943 = vst [vmem:[#allocation74_spill] sm:$0xff] %v5602_v3  ;;  %v5626_v3 = vsel %vm388_vm1, %v407_v41, %v5613_v1  ;;  %v5645_v41 = vrot.slane %v5093_v39, 2 }
  0x84   :  { %491 = vrot.lane.b32.xlu1 %v5581_v10, %s4900_s20  ;;  %489 = vrot.lane.b32.xlu0 %v5594_v16, %s4900_s20  ;;  %8948 = vst [vmem:[#allocation79_spill] sm:$0xff] %v5626_v3  ;;  %v410_v16 = vrot.slane %v5076_v35, 2 }
  0x85   :  { %8953 = vst [vmem:[#allocation84_spill] sm:$0xff] %v5645_v41 }
  0x86   :  { %v5616_v26 = vpop.permute.xlu1 %238  ;;  %v5618_v6 = vpop.permute.xlu0 %236 }
  0x87   :  { %8946 = vst [vmem:[#allocation77_spill] sm:$0xff] %v5616_v26  ;;  %8947 = vst [vmem:[#allocation78_spill] sm:$0xff] %v5618_v6  ;;  %v5642_v6 = vsel %vm388_vm1, %v410_v16, %v5629_v36  ;;  %v5661_v16 = vrot.slane %v5115_v44, 2 }
  0x88   :  { %495 = vrot.lane.b32.xlu1 %v5597_v21, %s4900_s20  ;;  %493 = vrot.lane.b32.xlu0 %v5610_v31, %s4900_s20  ;;  %8952 = vst [vmem:[#allocation83_spill] sm:$0xff] %v5642_v6  ;;  %v413_v31 = vrot.slane %v5098_v40, 2 }
  0x89   :  { %8957 = vst [vmem:[#allocation88_spill] sm:$0xff] %v5661_v16 }
  0x8a   :  { %v5632_v10 = vpop.permute.xlu1 %242  ;;  %v5634_v26 = vpop.permute.xlu0 %240 }
  0x8b   :  { %8950 = vst [vmem:[#allocation81_spill] sm:$0xff] %v5632_v10  ;;  %8951 = vst [vmem:[#allocation82_spill] sm:$0xff] %v5634_v26  ;;  %v5658_v26 = vsel %vm388_vm1, %v413_v31, %v5645_v41  ;;  %v5677_v31 = vrot.slane %v5137_v49, 2 }
  0x8c   :  { %499 = vrot.lane.b32.xlu1 %v5613_v1, %s4900_s20  ;;  %497 = vrot.lane.b32.xlu0 %v5626_v3, %s4900_s20  ;;  %8956 = vst [vmem:[#allocation87_spill] sm:$0xff] %v5658_v26  ;;  %v416_v3 = vrot.slane %v5120_v45, 2 }
  0x8d   :  { %8961 = vst [vmem:[#allocation92_spill] sm:$0xff] %v5677_v31 }
  0x8e   :  { %v5648_v21 = vpop.permute.xlu1 %246  ;;  %v5650_v10 = vpop.permute.xlu0 %244 }
  0x8f   :  { %8954 = vst [vmem:[#allocation85_spill] sm:$0xff] %v5648_v21  ;;  %8955 = vst [vmem:[#allocation86_spill] sm:$0xff] %v5650_v10  ;;  %v5674_v10 = vsel %vm388_vm1, %v416_v3, %v5661_v16  ;;  %v5693_v3 = vrot.slane %v5159_v54, 2 }
  0x90   :  { %503 = vrot.lane.b32.xlu1 %v5629_v36, %s4900_s20  ;;  %501 = vrot.lane.b32.xlu0 %v5642_v6, %s4900_s20  ;;  %8960 = vst [vmem:[#allocation91_spill] sm:$0xff] %v5674_v10  ;;  %v419_v6 = vrot.slane %v5142_v50, 2 }
  0x91   :  { %8965 = vst [vmem:[#allocation96_spill] sm:$0xff] %v5693_v3 }
  0x92   :  { %v5664_v1 = vpop.permute.xlu1 %250  ;;  %v5666_v21 = vpop.permute.xlu0 %248 }
  0x93   :  { %8958 = vst [vmem:[#allocation89_spill] sm:$0xff] %v5664_v1  ;;  %8959 = vst [vmem:[#allocation90_spill] sm:$0xff] %v5666_v21  ;;  %v5690_v21 = vsel %vm388_vm1, %v419_v6, %v5677_v31  ;;  %v5709_v6 = vrot.slane %v5181_v59, 2 }
  0x94   :  { %507 = vrot.lane.b32.xlu1 %v5645_v41, %s4900_s20  ;;  %505 = vrot.lane.b32.xlu0 %v5658_v26, %s4900_s20  ;;  %8964 = vst [vmem:[#allocation95_spill] sm:$0xff] %v5690_v21  ;;  %v422_v26 = vrot.slane %v5164_v55, 2 }
  0x95   :  { %8969 = vst [vmem:[#allocation100_spill] sm:$0xff] %v5709_v6 }
  0x96   :  { %v5680_v36 = vpop.permute.xlu1 %254  ;;  %v5682_v1 = vpop.permute.xlu0 %252 }
  0x97   :  { %8962 = vst [vmem:[#allocation93_spill] sm:$0xff] %v5680_v36  ;;  %8963 = vst [vmem:[#allocation94_spill] sm:$0xff] %v5682_v1  ;;  %v5706_v1 = vsel %vm388_vm1, %v422_v26, %v5693_v3  ;;  %v5725_v26 = vrot.slane %v5203_v4, 2 }
  0x98   :  { %511 = vrot.lane.b32.xlu1 %v5661_v16, %s4900_s20  ;;  %509 = vrot.lane.b32.xlu0 %v5674_v10, %s4900_s20  ;;  %8968 = vst [vmem:[#allocation99_spill] sm:$0xff] %v5706_v1  ;;  %v425_v10 = vrot.slane %v5186_v60, 2 }
  0x99   :  { %8973 = vst [vmem:[#allocation104_spill] sm:$0xff] %v5725_v26 }
  0x9a   :  { %v5696_v41 = vpop.permute.xlu1 %258  ;;  %v5698_v36 = vpop.permute.xlu0 %256 }
  0x9b   :  { %8966 = vst [vmem:[#allocation97_spill] sm:$0xff] %v5696_v41  ;;  %8967 = vst [vmem:[#allocation98_spill] sm:$0xff] %v5698_v36  ;;  %v5722_v36 = vsel %vm388_vm1, %v425_v10, %v5709_v6  ;;  %v432_v10 = vrot.slane %v5225_v18, 2 }
  0x9c   :  { %515 = vrot.lane.b32.xlu1 %v5677_v31, %s4900_s20  ;;  %513 = vrot.lane.b32.xlu0 %v5690_v21, %s4900_s20  ;;  %8972 = vst [vmem:[#allocation103_spill] sm:$0xff] %v5722_v36  ;;  %v428_v21 = vrot.slane %v5208_v5, 2 }
  0x9e   :  { %v5712_v16 = vpop.permute.xlu1 %262  ;;  %v5714_v41 = vpop.permute.xlu0 %260 }
  0x9f   :  { %8970 = vst [vmem:[#allocation101_spill] sm:$0xff] %v5712_v16  ;;  %8971 = vst [vmem:[#allocation102_spill] sm:$0xff] %v5714_v41  ;;  %v5738_v41 = vsel %vm388_vm1, %v428_v21, %v5725_v26  ;;  %v434_v21 = vrot.slane %v5250_v48, 2 }
  0xa0   :  { %519 = vrot.lane.b32.xlu1 %v5693_v3, %s4900_s20  ;;  %517 = vrot.lane.b32.xlu0 %v5706_v1, %s4900_s20  ;;  %8976 = vst [vmem:[#allocation107_spill] sm:$0xff] %v5738_v41  ;;  %v431_v1 = vrot.slane %v5230_v23, 2 }
  0xa2   :  { %v5728_v31 = vpop.permute.xlu1 %266  ;;  %v5730_v16 = vpop.permute.xlu0 %264 }
  0xa3   :  { %8974 = vst [vmem:[#allocation105_spill] sm:$0xff] %v5728_v31  ;;  %8975 = vst [vmem:[#allocation106_spill] sm:$0xff] %v5730_v16  ;;  %v433_v31 = vsel %vm388_vm1, %v431_v1, %v432_v10  ;;  %v5752_v16 = vrot.slane %v5245_v43, 2  ;;  %v437_v1 = vrot.slane %v5269_v9, 2 }
  0xa4   :  { %523 = vrot.lane.b32.xlu1 %v5709_v6, %s4900_s20  ;;  %521 = vrot.lane.b32.xlu0 %v5722_v36, %s4900_s20 }
  0xa6   :  { %v5742_v3 = vpop.permute.xlu1 %270  ;;  %v5744_v5 = vpop.permute.xlu0 %268 }
  0xa7   :  { %8977 = vst [vmem:[#allocation108_spill] sm:$0xff] %v5742_v3  ;;  %8978 = vst [vmem:[#allocation109_spill] sm:$0xff] %v5744_v5  ;;  %v5763_v3 = vsel %vm388_vm1, %v434_v21, %v5752_v16  ;;  %v5766_v5 = vrot.slane %v5264_v13, 2  ;;  %v440_v21 = vrot.slane %v5289_v33, 2 }
  0xa8   :  { %527 = vrot.lane.b32.xlu1 %v5725_v26, %s4900_s20  ;;  %525 = vrot.lane.b32.xlu0 %v5738_v41, %s4900_s20  ;;  %8981 = vst [vmem:[#allocation112_spill] sm:$0xff] %v5763_v3 }
  0xa9   :  { %8982 = vst [vmem:[#allocation113_spill] sm:$0xff] %v5766_v5 }
  0xaa   :  { %v5755_v18 = vpop.permute.xlu1 %274  ;;  %v5757_v23 = vpop.permute.xlu0 %272 }
  0xab   :  { %8979 = vst [vmem:[#allocation110_spill] sm:$0xff] %v5755_v18  ;;  %8980 = vst [vmem:[#allocation111_spill] sm:$0xff] %v5757_v23 }
  0xac   :  { %531 = vrot.lane.b32.xlu1 %v432_v10, %s4900_s20  ;;  %529 = vrot.lane.b32.xlu0 %v433_v31, %s4900_s20  ;;  %v5779_v31 = vsel %vm388_vm1, %v437_v1, %v5766_v5  ;;  %v5782_v10 = vrot.slane %v5284_v62, 2  ;;  %v5798_v1 = vrot.slane %v5306_v57, 2 }
  0xad   :  { %8985 = vst [vmem:[#allocation116_spill] sm:$0xff] %v5779_v31 }
  0xae   :  { %v5769_v41 = vpop.permute.xlu1 %278  ;;  %v5771_v26 = vpop.permute.xlu0 %276  ;;  %8986 = vst [vmem:[#allocation117_spill] sm:$0xff] %v5782_v10  ;;  %8990 = vst [vmem:[#allocation121_spill] sm:$0xff] %v5798_v1 }
  0xaf   :  { %8983 = vst [vmem:[#allocation114_spill] sm:$0xff] %v5769_v41  ;;  %8984 = vst [vmem:[#allocation115_spill] sm:$0xff] %v5771_v26  ;;  %v5795_v41 = vsel %vm388_vm1, %v440_v21, %v5782_v10  ;;  %v443_v26 = vrot.slane %v5311_v58, 2  ;;  %v5814_v21 = vrot.slane %v5328_v52, 2 }
  0xb0   :  { %535 = vrot.lane.b32.xlu1 %v5752_v16, %s4900_s20  ;;  %533 = vrot.lane.b32.xlu0 %v5763_v3, %s4900_s20  ;;  %8989 = vst [vmem:[#allocation120_spill] sm:$0xff] %v5795_v41 }
  0xb1   :  { %8994 = vst [vmem:[#allocation125_spill] sm:$0xff] %v5814_v21 }
  0xb2   :  { %v5785_v18 = vpop.permute.xlu1 %282  ;;  %v5787_v23 = vpop.permute.xlu0 %280 }
  0xb3   :  { %8987 = vst [vmem:[#allocation118_spill] sm:$0xff] %v5785_v18  ;;  %8988 = vst [vmem:[#allocation119_spill] sm:$0xff] %v5787_v23  ;;  %v5811_v23 = vsel %vm388_vm1, %v443_v26, %v5798_v1  ;;  %v5830_v26 = vrot.slane %v5350_v47, 2 }
  0xb4   :  { %539 = vrot.lane.b32.xlu1 %v5766_v5, %s4900_s20  ;;  %537 = vrot.lane.b32.xlu0 %v5779_v31, %s4900_s20  ;;  %8993 = vst [vmem:[#allocation124_spill] sm:$0xff] %v5811_v23  ;;  %v446_v5 = vrot.slane %v5333_v28, 2 }
  0xb5   :  { %8998 = vst [vmem:[#allocation129_spill] sm:$0xff] %v5830_v26 }
  0xb6   :  { %v5801_v3 = vpop.permute.xlu1 %286  ;;  %v5803_v18 = vpop.permute.xlu0 %284 }
  0xb7   :  { %8991 = vst [vmem:[#allocation122_spill] sm:$0xff] %v5801_v3  ;;  %8992 = vst [vmem:[#allocation123_spill] sm:$0xff] %v5803_v18  ;;  %v5827_v18 = vsel %vm388_vm1, %v446_v5, %v5814_v21  ;;  %v5846_v5 = vrot.slane %v5372_v42, 2 }
  0xb8   :  { %543 = vrot.lane.b32.xlu1 %v5782_v10, %s4900_s20  ;;  %541 = vrot.lane.b32.xlu0 %v5795_v41, %s4900_s20  ;;  %8997 = vst [vmem:[#allocation128_spill] sm:$0xff] %v5827_v18  ;;  %v449_v10 = vrot.slane %v5355_v63, 2 }
  0xb9   :  { %9002 = vst [vmem:[#allocation133_spill] sm:$0xff] %v5846_v5 }
  0xba   :  { %v5817_v31 = vpop.permute.xlu1 %290  ;;  %v5819_v3 = vpop.permute.xlu0 %288 }
  0xbb   :  { %8995 = vst [vmem:[#allocation126_spill] sm:$0xff] %v5817_v31  ;;  %8996 = vst [vmem:[#allocation127_spill] sm:$0xff] %v5819_v3  ;;  %v5843_v3 = vsel %vm388_vm1, %v449_v10, %v5830_v26  ;;  %v5862_v10 = vrot.slane %v5394_v37, 2 }
  0xbc   :  { %547 = vrot.lane.b32.xlu1 %v5798_v1, %s4900_s20  ;;  %545 = vrot.lane.b32.xlu0 %v5811_v23, %s4900_s20  ;;  %9001 = vst [vmem:[#allocation132_spill] sm:$0xff] %v5843_v3  ;;  %v452_v1 = vrot.slane %v5377_v38, 2 }
  0xbd   :  { %9006 = vst [vmem:[#allocation137_spill] sm:$0xff] %v5862_v10 }
  0xbe   :  { %v5833_v41 = vpop.permute.xlu1 %294  ;;  %v5835_v31 = vpop.permute.xlu0 %292 }
  0xbf   :  { %8999 = vst [vmem:[#allocation130_spill] sm:$0xff] %v5833_v41  ;;  %9000 = vst [vmem:[#allocation131_spill] sm:$0xff] %v5835_v31  ;;  %v5859_v31 = vsel %vm388_vm1, %v452_v1, %v5846_v5  ;;  %v5878_v1 = vrot.slane %v5416_v32, 2 }
  0xc0   :  { %551 = vrot.lane.b32.xlu1 %v5814_v21, %s4900_s20  ;;  %549 = vrot.lane.b32.xlu0 %v5827_v18, %s4900_s20  ;;  %9005 = vst [vmem:[#allocation136_spill] sm:$0xff] %v5859_v31  ;;  %v455_v21 = vrot.slane %v5399_v53, 2 }
  0xc1   :  { %9010 = vst [vmem:[#allocation141_spill] sm:$0xff] %v5878_v1 }
  0xc2   :  { %v5849_v23 = vpop.permute.xlu1 %298  ;;  %v5851_v41 = vpop.permute.xlu0 %296 }
  0xc3   :  { %9003 = vst [vmem:[#allocation134_spill] sm:$0xff] %v5849_v23  ;;  %9004 = vst [vmem:[#allocation135_spill] sm:$0xff] %v5851_v41  ;;  %v5875_v41 = vsel %vm388_vm1, %v455_v21, %v5862_v10  ;;  %v5894_v21 = vrot.slane %v5438_v27, 2 }
  0xc4   :  { %555 = vrot.lane.b32.xlu1 %v5830_v26, %s4900_s20  ;;  %553 = vrot.lane.b32.xlu0 %v5843_v3, %s4900_s20  ;;  %9009 = vst [vmem:[#allocation140_spill] sm:$0xff] %v5875_v41  ;;  %v458_v26 = vrot.slane %v5421_v11, 2 }
  0xc5   :  { %9014 = vst [vmem:[#allocation145_spill] sm:$0xff] %v5894_v21 }
  0xc6   :  { %v5865_v18 = vpop.permute.xlu1 %302  ;;  %v5867_v23 = vpop.permute.xlu0 %300 }
  0xc7   :  { %9007 = vst [vmem:[#allocation138_spill] sm:$0xff] %v5865_v18  ;;  %9008 = vst [vmem:[#allocation139_spill] sm:$0xff] %v5867_v23  ;;  %v5891_v23 = vsel %vm388_vm1, %v458_v26, %v5878_v1  ;;  %v5910_v26 = vrot.slane %v5460_v22, 2 }
  0xc8   :  { %559 = vrot.lane.b32.xlu1 %v5846_v5, %s4900_s20  ;;  %557 = vrot.lane.b32.xlu0 %v5859_v31, %s4900_s20  ;;  %9013 = vst [vmem:[#allocation144_spill] sm:$0xff] %v5891_v23  ;;  %v461_v5 = vrot.slane %v5443_v61, 2 }
  0xc9   :  { %9018 = vst [vmem:[#allocation149_spill] sm:$0xff] %v5910_v26 }
  0xca   :  { %v5881_v3 = vpop.permute.xlu1 %306  ;;  %v5883_v18 = vpop.permute.xlu0 %304 }
  0xcb   :  { %9011 = vst [vmem:[#allocation142_spill] sm:$0xff] %v5881_v3  ;;  %9012 = vst [vmem:[#allocation143_spill] sm:$0xff] %v5883_v18  ;;  %v5907_v18 = vsel %vm388_vm1, %v461_v5, %v5894_v21  ;;  %v5926_v5 = vrot.slane %v5482_v17, 2 }
  0xcc   :  { %563 = vrot.lane.b32.xlu1 %v5862_v10, %s4900_s20  ;;  %561 = vrot.lane.b32.xlu0 %v5875_v41, %s4900_s20  ;;  %9017 = vst [vmem:[#allocation148_spill] sm:$0xff] %v5907_v18  ;;  %v464_v10 = vrot.slane %v5465_v56, 2 }
  0xcd   :  { %9022 = vst [vmem:[#allocation153_spill] sm:$0xff] %v5926_v5 }
  0xce   :  { %v5897_v31 = vpop.permute.xlu1 %310  ;;  %v5899_v3 = vpop.permute.xlu0 %308 }
  0xcf   :  { %9015 = vst [vmem:[#allocation146_spill] sm:$0xff] %v5897_v31  ;;  %9016 = vst [vmem:[#allocation147_spill] sm:$0xff] %v5899_v3  ;;  %v5923_v3 = vsel %vm388_vm1, %v464_v10, %v5910_v26  ;;  %v5942_v10 = vrot.slane %v5504_v12, 2 }
  0xd0   :  { %567 = vrot.lane.b32.xlu1 %v5878_v1, %s4900_s20  ;;  %565 = vrot.lane.b32.xlu0 %v5891_v23, %s4900_s20  ;;  %9021 = vst [vmem:[#allocation152_spill] sm:$0xff] %v5923_v3  ;;  %v467_v1 = vrot.slane %v5487_v51, 2 }
  0xd1   :  { %9026 = vst [vmem:[#allocation157_spill] sm:$0xff] %v5942_v10 }
  0xd2   :  { %v5913_v41 = vpop.permute.xlu1 %314  ;;  %v5915_v31 = vpop.permute.xlu0 %312 }
  0xd3   :  { %9019 = vst [vmem:[#allocation150_spill] sm:$0xff] %v5913_v41  ;;  %9020 = vst [vmem:[#allocation151_spill] sm:$0xff] %v5915_v31  ;;  %v5939_v31 = vsel %vm388_vm1, %v467_v1, %v5926_v5 }
  0xd4   :  { %571 = vrot.lane.b32.xlu1 %v5894_v21, %s4900_s20  ;;  %569 = vrot.lane.b32.xlu0 %v5907_v18, %s4900_s20  ;;  %9025 = vst [vmem:[#allocation156_spill] sm:$0xff] %v5939_v31  ;;  %v470_v21 = vrot.slane %v5509_v46, 2 }
  0xd6   :  { %v5929_v23 = vpop.permute.xlu1 %318  ;;  %v5931_v41 = vpop.permute.xlu0 %316 }
  0xd7   :  { %9023 = vst [vmem:[#allocation154_spill] sm:$0xff] %v5929_v23  ;;  %9024 = vst [vmem:[#allocation155_spill] sm:$0xff] %v5931_v41  ;;  %v5955_v41 = vsel %vm388_vm1, %v470_v21, %v5942_v10 }
  0xd8   :  { %575 = vrot.lane.b32.xlu1 %v5910_v26, %s4900_s20  ;;  %573 = vrot.lane.b32.xlu0 %v5923_v3, %s4900_s20  ;;  %9029 = vst [vmem:[#allocation160_spill] sm:$0xff] %v5955_v41  ;;  %v9122_v3 = vld [vmem:[#allocation26_spill] sm:$0xff] }
  0xda   :  { %v5945_v18 = vpop.permute.xlu1 %322  ;;  %v5947_v23 = vpop.permute.xlu0 %320 }
  0xdb   :  { %9027 = vst [vmem:[#allocation158_spill] sm:$0xff] %v5945_v18  ;;  %9028 = vst [vmem:[#allocation159_spill] sm:$0xff] %v5947_v23 }
  0xdc   :  { %579 = vrot.lane.b32.xlu1 %v5926_v5, %s4900_s20  ;;  %577 = vrot.lane.b32.xlu0 %v5939_v31, %s4900_s20 }
  0xde   :  { %v5957_v1 = vpop.permute.xlu1 %326  ;;  %v5959_v26 = vpop.permute.xlu0 %324 }
  0xdf   :  { %9030 = vst [vmem:[#allocation161_spill] sm:$0xff] %v5957_v1  ;;  %9031 = vst [vmem:[#allocation162_spill] sm:$0xff] %v5959_v26 }
  0xe0   :  { %583 = vrot.lane.b32.xlu1 %v5942_v10, %s4900_s20  ;;  %581 = vrot.lane.b32.xlu0 %v5955_v41, %s4900_s20  ;;  %v9101_v10 = vld [vmem:[#allocation15_spill] sm:$0xff]  ;;  %v9106_v41 = vld [vmem:[#allocation18_spill] sm:$0xff] }
  0xe2   :  { %v5965_v18 = vpop.permute.xlu1 %330  ;;  %v5967_v23 = vpop.permute.xlu0 %328 }
  0xe3   :  { %9032 = vst [vmem:[#allocation163_spill] sm:$0xff] %v5965_v18  ;;  %9033 = vst [vmem:[#allocation164_spill] sm:$0xff] %v5967_v23 }
  0xe4   :  { %647 = vrot.lane.b32.xlu1 %v4936_v0, %s4901_s24  ;;  %645 = vrot.lane.b32.xlu0 %v4946_v2, %s4901_s24 }
  0xe6   :  { %v5973_v21 = vpop.permute.xlu1 %475  ;;  %v5975_v1 = vpop.permute.xlu0 %473 }
  0xe8   :  { %651 = vrot.lane.b32.xlu1 %v4961_v7, %s4901_s24  ;;  %649 = vrot.lane.b32.xlu0 %v4966_v8, %s4901_s24 }
  0xea   :  { %v5981_v18 = vpop.permute.xlu1 %479  ;;  %v5983_v23 = vpop.permute.xlu0 %477 }
  0xec   :  { %655 = vrot.lane.b32.xlu1 %v4984_v14, %s4901_s24  ;;  %653 = vrot.lane.b32.xlu0 %v4989_v15, %s4901_s24 }
  0xee   :  { %v5989_v0 = vpop.permute.xlu1 %483  ;;  %v5991_v2 = vpop.permute.xlu0 %481 }
  0xef   :  { %9034 = vst [vmem:[#allocation165_spill] sm:$0xff] %v5989_v0  ;;  %9035 = vst [vmem:[#allocation166_spill] sm:$0xff] %v5991_v2  ;;  %v9203_v0 = vld [vmem:[#allocation72_spill] sm:$0xff] }
  0xf0   :  { %659 = vrot.lane.b32.xlu1 %v5005_v19, %s4901_s24  ;;  %657 = vrot.lane.b32.xlu0 %v5010_v20, %s4901_s24 }
  0xf2   :  { %v5997_v7 = vpop.permute.xlu1 %487  ;;  %v5999_v8 = vpop.permute.xlu0 %485 }
  0xf3   :  { %9036 = vst [vmem:[#allocation167_spill] sm:$0xff] %v5997_v7  ;;  %9037 = vst [vmem:[#allocation168_spill] sm:$0xff] %v5999_v8  ;;  %v9155_v7 = vld [vmem:[#allocation43_spill] sm:$0xff] }
  0xf4   :  { %663 = vrot.lane.b32.xlu1 %v5027_v24, %s4901_s24  ;;  %661 = vrot.lane.b32.xlu0 %v5032_v25, %s4901_s24 }
  0xf6   :  { %v6005_v14 = vpop.permute.xlu1 %491  ;;  %v6007_v15 = vpop.permute.xlu0 %489 }
  0xf7   :  { %9038 = vst [vmem:[#allocation169_spill] sm:$0xff] %v6005_v14  ;;  %9039 = vst [vmem:[#allocation170_spill] sm:$0xff] %v6007_v15  ;;  %v9147_v14 = vld [vmem:[#allocation39_spill] sm:$0xff] }
  0xf8   :  { %667 = vrot.lane.b32.xlu1 %v5049_v29, %s4901_s24  ;;  %665 = vrot.lane.b32.xlu0 %v5054_v30, %s4901_s24 }
  0xfa   :  { %v6013_v19 = vpop.permute.xlu1 %495  ;;  %v6015_v20 = vpop.permute.xlu0 %493 }
  0xfb   :  { %9040 = vst [vmem:[#allocation171_spill] sm:$0xff] %v6013_v19  ;;  %9041 = vst [vmem:[#allocation172_spill] sm:$0xff] %v6015_v20 }
  0xfc   :  { %671 = vrot.lane.b32.xlu1 %v5071_v34, %s4901_s24  ;;  %669 = vrot.lane.b32.xlu0 %v5076_v35, %s4901_s24 }
  0xfe   :  { %v6021_v24 = vpop.permute.xlu1 %499  ;;  %v6023_v25 = vpop.permute.xlu0 %497 }
  0xff   :  { %9042 = vst [vmem:[#allocation173_spill] sm:$0xff] %v6021_v24  ;;  %9043 = vst [vmem:[#allocation174_spill] sm:$0xff] %v6023_v25 }
 0x100   :  { %675 = vrot.lane.b32.xlu1 %v5093_v39, %s4901_s24  ;;  %673 = vrot.lane.b32.xlu0 %v5098_v40, %s4901_s24 }
 0x102   :  { %v6029_v29 = vpop.permute.xlu1 %503  ;;  %v6031_v30 = vpop.permute.xlu0 %501 }
 0x103   :  { %9044 = vst [vmem:[#allocation175_spill] sm:$0xff] %v6029_v29  ;;  %9045 = vst [vmem:[#allocation176_spill] sm:$0xff] %v6031_v30  ;;  %v9105_v29 = vld [vmem:[#allocation17_spill] sm:$0xff]  ;;  %v9110_v30 = vld [vmem:[#allocation20_spill] sm:$0xff] }
 0x104   :  { %679 = vrot.lane.b32.xlu1 %v5115_v44, %s4901_s24  ;;  %677 = vrot.lane.b32.xlu0 %v5120_v45, %s4901_s24 }
 0x106   :  { %v6037_v34 = vpop.permute.xlu1 %507  ;;  %v6039_v35 = vpop.permute.xlu0 %505 }
 0x107   :  { %9046 = vst [vmem:[#allocation177_spill] sm:$0xff] %v6037_v34  ;;  %9047 = vst [vmem:[#allocation178_spill] sm:$0xff] %v6039_v35 }
 0x108   :  { %683 = vrot.lane.b32.xlu1 %v5137_v49, %s4901_s24  ;;  %681 = vrot.lane.b32.xlu0 %v5142_v50, %s4901_s24 }
 0x10a   :  { %v6045_v39 = vpop.permute.xlu1 %511  ;;  %v6047_v40 = vpop.permute.xlu0 %509 }
 0x10b   :  { %9048 = vst [vmem:[#allocation179_spill] sm:$0xff] %v6045_v39  ;;  %9049 = vst [vmem:[#allocation180_spill] sm:$0xff] %v6047_v40  ;;  %v9098_v40 = vld [vmem:[#allocation14_spill] sm:$0xff] }
 0x10c   :  { %687 = vrot.lane.b32.xlu1 %v5159_v54, %s4901_s24  ;;  %685 = vrot.lane.b32.xlu0 %v5164_v55, %s4901_s24  ;;  %v9054_v54 = vld [vmem:[#allocation28_spill] sm:$0xff]  ;;  %v6072_v55 = vld [vmem:[%s8661_s0 + $0xe8] sm:$0xff] }
 0x10e   :  { %v6053_v44 = vpop.permute.xlu1 %515  ;;  %v6055_v45 = vpop.permute.xlu0 %513 }
 0x10f   :  { %9050 = vst [vmem:[#allocation181_spill] sm:$0xff] %v6053_v44  ;;  %9051 = vst [vmem:[#allocation182_spill] sm:$0xff] %v6055_v45 }
 0x110   :  { %691 = vrot.lane.b32.xlu1 %v5181_v59, %s4901_s24  ;;  %689 = vrot.lane.b32.xlu0 %v5186_v60, %s4901_s24  ;;  %v6077_v59 = vld [vmem:[%s8661_s0 + $0xe0] sm:$0xff] }
 0x112   :  { %v6061_v49 = vpop.permute.xlu1 %519  ;;  %v6063_v50 = vpop.permute.xlu0 %517 }
 0x113   :  { %9052 = vst [vmem:[#allocation183_spill] sm:$0xff] %v6061_v49  ;;  %9053 = vst [vmem:[#allocation184_spill] sm:$0xff] %v6063_v50  ;;  %v9089_v50 = vld [vmem:[#allocation9_spill] sm:$0xff] }
 0x114   :  { %695 = vrot.lane.b32.xlu1 %v5203_v4, %s4901_s24  ;;  %693 = vrot.lane.b32.xlu0 %v9054_v54, %s4901_s24 }
 0x116   :  { %v6079_v60 = vpop.permute.xlu1 %523  ;;  %v6081_v26 = vpop.permute.xlu0 %521 }
 0x117   :  { %9055 = vst [vmem:[#allocation28_spill] sm:$0xff] %v6079_v60  ;;  %9056 = vst [vmem:[#allocation185_spill] sm:$0xff] %v6081_v26 }
 0x118   :  { %699 = vrot.lane.b32.xlu1 %v6072_v55, %s4901_s24  ;;  %697 = vrot.lane.b32.xlu0 %v6077_v59, %s4901_s24 }
 0x11a   :  { %v6087_v4 = vpop.permute.xlu1 %527  ;;  %v6089_v54 = vpop.permute.xlu0 %525 }
 0x11b   :  { %9057 = vst [vmem:[#allocation186_spill] sm:$0xff] %v6087_v4  ;;  %9058 = vst [vmem:[#allocation187_spill] sm:$0xff] %v6089_v54  ;;  %v9084_v54 = vld [vmem:[#allocation5_spill] sm:$0xff] }
 0x11c   :  { %703 = vrot.lane.b32.xlu1 %v5245_v43, %s4901_s24  ;;  %701 = vrot.lane.b32.xlu0 %v5250_v48, %s4901_s24 }
 0x11e   :  { %v6095_v49 = vpop.permute.xlu1 %531  ;;  %v6097_v60 = vpop.permute.xlu0 %529 }
 0x120   :  { %707 = vrot.lane.b32.xlu1 %v5264_v13, %s4901_s24  ;;  %705 = vrot.lane.b32.xlu0 %v5269_v9, %s4901_s24 }
 0x122   :  { %v6103_v26 = vpop.permute.xlu1 %535  ;;  %v6105_v4 = vpop.permute.xlu0 %533 }
 0x123   :  { %9059 = vst [vmem:[#allocation188_spill] sm:$0xff] %v6103_v26  ;;  %v9207_v26 = vld [vmem:[#allocation76_spill] sm:$0xff] }
 0x124   :  { %711 = vrot.lane.b32.xlu1 %v5284_v62, %s4901_s24  ;;  %709 = vrot.lane.b32.xlu0 %v5289_v33, %s4901_s24 }
 0x126   :  { %v6111_v43 = vpop.permute.xlu1 %539  ;;  %v6113_v48 = vpop.permute.xlu0 %537 }
 0x127   :  { %9060 = vst [vmem:[#allocation189_spill] sm:$0xff] %v6111_v43  ;;  %9061 = vst [vmem:[#allocation190_spill] sm:$0xff] %v6113_v48  ;;  %v9163_v43 = vld [vmem:[#allocation47_spill] sm:$0xff] }
 0x128   :  { %715 = vrot.lane.b32.xlu1 %v5306_v57, %s4901_s24  ;;  %713 = vrot.lane.b32.xlu0 %v5311_v58, %s4901_s24 }
 0x12a   :  { %v6119_v9 = vpop.permute.xlu1 %543  ;;  %v6121_v13 = vpop.permute.xlu0 %541 }
 0x12b   :  { %9062 = vst [vmem:[#allocation191_spill] sm:$0xff] %v6119_v9  ;;  %9063 = vst [vmem:[#allocation192_spill] sm:$0xff] %v6121_v13  ;;  %v9150_v9 = vld [vmem:[#allocation40_spill] sm:$0xff]  ;;  %v9159_v13 = vld [vmem:[#allocation45_spill] sm:$0xff] }
 0x12c   :  { %719 = vrot.lane.b32.xlu1 %v5328_v52, %s4901_s24  ;;  %717 = vrot.lane.b32.xlu0 %v5333_v28, %s4901_s24 }
 0x12e   :  { %v6127_v62 = vpop.permute.xlu1 %547  ;;  %v6129_v33 = vpop.permute.xlu0 %545 }
 0x12f   :  { %9064 = vst [vmem:[#allocation193_spill] sm:$0xff] %v6127_v62  ;;  %9065 = vst [vmem:[#allocation194_spill] sm:$0xff] %v6129_v33  ;;  %v9146_v62 = vld [vmem:[#allocation38_spill] sm:$0xff] }
 0x130   :  { %723 = vrot.lane.b32.xlu1 %v5350_v47, %s4901_s24  ;;  %721 = vrot.lane.b32.xlu0 %v5355_v63, %s4901_s24 }
 0x132   :  { %v6135_v57 = vpop.permute.xlu1 %551  ;;  %v6137_v58 = vpop.permute.xlu0 %549 }
 0x133   :  { %9066 = vst [vmem:[#allocation195_spill] sm:$0xff] %v6135_v57  ;;  %9067 = vst [vmem:[#allocation196_spill] sm:$0xff] %v6137_v58  ;;  %v9114_v57 = vld [vmem:[#allocation22_spill] sm:$0xff] }
 0x134   :  { %727 = vrot.lane.b32.xlu1 %v5372_v42, %s4901_s24  ;;  %725 = vrot.lane.b32.xlu0 %v5377_v38, %s4901_s24 }
 0x136   :  { %v6143_v52 = vpop.permute.xlu1 %555  ;;  %v6145_v28 = vpop.permute.xlu0 %553 }
 0x137   :  { %9068 = vst [vmem:[#allocation197_spill] sm:$0xff] %v6143_v52  ;;  %9069 = vst [vmem:[#allocation198_spill] sm:$0xff] %v6145_v28  ;;  %v9109_v52 = vld [vmem:[#allocation19_spill] sm:$0xff]  ;;  %v9113_v28 = vld [vmem:[#allocation21_spill] sm:$0xff] }
 0x138   :  { %731 = vrot.lane.b32.xlu1 %v5394_v37, %s4901_s24  ;;  %729 = vrot.lane.b32.xlu0 %v5399_v53, %s4901_s24 }
 0x13a   :  { %v6151_v47 = vpop.permute.xlu1 %559  ;;  %v6153_v63 = vpop.permute.xlu0 %557 }
 0x13b   :  { %9070 = vst [vmem:[#allocation199_spill] sm:$0xff] %v6151_v47  ;;  %9071 = vst [vmem:[#allocation200_spill] sm:$0xff] %v6153_v63 }
 0x13c   :  { %735 = vrot.lane.b32.xlu1 %v5416_v32, %s4901_s24  ;;  %733 = vrot.lane.b32.xlu0 %v5421_v11, %s4901_s24 }
 0x13e   :  { %v6159_v42 = vpop.permute.xlu1 %563  ;;  %v6161_v38 = vpop.permute.xlu0 %561 }
 0x13f   :  { %9072 = vst [vmem:[#allocation201_spill] sm:$0xff] %v6159_v42  ;;  %9073 = vst [vmem:[#allocation202_spill] sm:$0xff] %v6161_v38  ;;  %v9102_v38 = vld [vmem:[#allocation16_spill] sm:$0xff] }
 0x140   :  { %739 = vrot.lane.b32.xlu1 %v5438_v27, %s4901_s24  ;;  %737 = vrot.lane.b32.xlu0 %v5443_v61, %s4901_s24 }
 0x142   :  { %v6167_v37 = vpop.permute.xlu1 %567  ;;  %v6169_v53 = vpop.permute.xlu0 %565 }
 0x143   :  { %9074 = vst [vmem:[#allocation203_spill] sm:$0xff] %v6167_v37  ;;  %9075 = vst [vmem:[#allocation204_spill] sm:$0xff] %v6169_v53  ;;  %v9094_v37 = vld [vmem:[#allocation12_spill] sm:$0xff]  ;;  %v9097_v53 = vld [vmem:[#allocation13_spill] sm:$0xff] }
 0x144   :  { %743 = vrot.lane.b32.xlu1 %v5460_v22, %s4901_s24  ;;  %741 = vrot.lane.b32.xlu0 %v5465_v56, %s4901_s24  ;;  %v6194_v22 = vld [vmem:[%s8661_s0 + $0x1e8] sm:$0xff] }
 0x146   :  { %v6175_v32 = vpop.permute.xlu1 %571  ;;  %v6177_v11 = vpop.permute.xlu0 %569 }
 0x147   :  { %9076 = vst [vmem:[#allocation205_spill] sm:$0xff] %v6175_v32  ;;  %9077 = vst [vmem:[#allocation206_spill] sm:$0xff] %v6177_v11  ;;  %v9087_v32 = vld [vmem:[#allocation8_spill] sm:$0xff]  ;;  %v9093_v11 = vld [vmem:[#allocation11_spill] sm:$0xff] }
 0x148   :  { %747 = vrot.lane.b32.xlu1 %v5482_v17, %s4901_s24  ;;  %745 = vrot.lane.b32.xlu0 %v5487_v51, %s4901_s24  ;;  %v6199_v17 = vld [vmem:[%s8661_s0 + $0x1e0] sm:$0xff] }
 0x14a   :  { %v6183_v27 = vpop.permute.xlu1 %575  ;;  %v6185_v61 = vpop.permute.xlu0 %573 }
 0x14b   :  { %9078 = vst [vmem:[#allocation207_spill] sm:$0xff] %v6183_v27  ;;  %9079 = vst [vmem:[#allocation208_spill] sm:$0xff] %v6185_v61  ;;  %v9085_v27 = vld [vmem:[#allocation6_spill] sm:$0xff]  ;;  %v9086_v61 = vld [vmem:[#allocation7_spill] sm:$0xff] }
 0x14c   :  { %751 = vrot.lane.b32.xlu1 %v5504_v12, %s4901_s24  ;;  %749 = vrot.lane.b32.xlu0 %v5509_v46, %s4901_s24 }
 0x14e   :  { %v6201_v56 = vpop.permute.xlu1 %579  ;;  %v6203_v51 = vpop.permute.xlu0 %577 }
 0x14f   :  { %9080 = vst [vmem:[#allocation209_spill] sm:$0xff] %v6201_v56  ;;  %9081 = vst [vmem:[#allocation210_spill] sm:$0xff] %v6203_v51 }
 0x150   :  { %755 = vrot.lane.b32.xlu1 %v6194_v22, %s4901_s24  ;;  %753 = vrot.lane.b32.xlu0 %v6199_v17, %s4901_s24 }
 0x152   :  { %v6209_v12 = vpop.permute.xlu1 %583  ;;  %v6211_v46 = vpop.permute.xlu0 %581 }
 0x153   :  { %9082 = vst [vmem:[#allocation211_spill] sm:$0xff] %v6209_v12  ;;  %9083 = vst [vmem:[#allocation212_spill] sm:$0xff] %v6211_v46 }
 0x154   :  { %821 = vrot.lane.b32.xlu1 %v9084_v54, %s4902_s30  ;;  %819 = vrot.lane.b32.xlu0 %v9085_v27, %s4902_s30  ;;  %v9090_v54 = vld [vmem:[#allocation10_spill] sm:$0xff] }
 0x156   :  { %v6217_v56 = vpop.permute.xlu1 %647  ;;  %v6219_v51 = vpop.permute.xlu0 %645 }
 0x158   :  { %825 = vrot.lane.b32.xlu1 %v9086_v61, %s4902_s30  ;;  %823 = vrot.lane.b32.xlu0 %v9087_v32, %s4902_s30 }
 0x15a   :  { %v6225_v12 = vpop.permute.xlu1 %651  ;;  %v6227_v46 = vpop.permute.xlu0 %649 }
 0x15b   :  { %9088 = vst [vmem:[#allocation5_spill] sm:$0xff] %v6225_v12 }
 0x15c   :  { %829 = vrot.lane.b32.xlu1 %v9089_v50, %s4902_s30  ;;  %827 = vrot.lane.b32.xlu0 %v9090_v54, %s4902_s30 }
 0x15e   :  { %v6233_v27 = vpop.permute.xlu1 %655  ;;  %v6235_v44 = vpop.permute.xlu0 %653 }
 0x15f   :  { %9091 = vst [vmem:[#allocation6_spill] sm:$0xff] %v6233_v27  ;;  %9092 = vst [vmem:[#allocation7_spill] sm:$0xff] %v6235_v44 }
 0x160   :  { %833 = vrot.lane.b32.xlu1 %v9093_v11, %s4902_s30  ;;  %831 = vrot.lane.b32.xlu0 %v9094_v37, %s4902_s30 }
 0x162   :  { %v6241_v45 = vpop.permute.xlu1 %659  ;;  %v6243_v39 = vpop.permute.xlu0 %657 }
 0x163   :  { %9095 = vst [vmem:[#allocation8_spill] sm:$0xff] %v6241_v45  ;;  %9096 = vst [vmem:[#allocation9_spill] sm:$0xff] %v6243_v39  ;;  %v9154_v45 = vld [vmem:[#allocation42_spill] sm:$0xff] }
 0x164   :  { %837 = vrot.lane.b32.xlu1 %v9097_v53, %s4902_s30  ;;  %835 = vrot.lane.b32.xlu0 %v9098_v40, %s4902_s30 }
 0x166   :  { %v6249_v42 = vpop.permute.xlu1 %663  ;;  %v6251_v34 = vpop.permute.xlu0 %661 }
 0x167   :  { %9099 = vst [vmem:[#allocation10_spill] sm:$0xff] %v6249_v42  ;;  %9100 = vst [vmem:[#allocation11_spill] sm:$0xff] %v6251_v34  ;;  %v9151_v34 = vld [vmem:[#allocation41_spill] sm:$0xff] }
 0x168   :  { %841 = vrot.lane.b32.xlu1 %v9101_v10, %s4902_s30  ;;  %839 = vrot.lane.b32.xlu0 %v9102_v38, %s4902_s30 }
 0x16a   :  { %v6257_v47 = vpop.permute.xlu1 %667  ;;  %v6259_v35 = vpop.permute.xlu0 %665 }
 0x16b   :  { %9103 = vst [vmem:[#allocation12_spill] sm:$0xff] %v6257_v47  ;;  %9104 = vst [vmem:[#allocation13_spill] sm:$0xff] %v6259_v35  ;;  %v9118_v47 = vld [vmem:[#allocation24_spill] sm:$0xff]  ;;  %v9126_v35 = vld [vmem:[#allocation29_spill] sm:$0xff] }
 0x16c   :  { %845 = vrot.lane.b32.xlu1 %v9105_v29, %s4902_s30  ;;  %843 = vrot.lane.b32.xlu0 %v9106_v41, %s4902_s30 }
 0x16e   :  { %v6265_v5 = vpop.permute.xlu1 %671  ;;  %v6267_v63 = vpop.permute.xlu0 %669 }
 0x16f   :  { %9107 = vst [vmem:[#allocation14_spill] sm:$0xff] %v6265_v5  ;;  %9108 = vst [vmem:[#allocation15_spill] sm:$0xff] %v6267_v63  ;;  %v9117_v63 = vld [vmem:[#allocation23_spill] sm:$0xff] }
 0x170   :  { %849 = vrot.lane.b32.xlu1 %v9109_v52, %s4902_s30  ;;  %847 = vrot.lane.b32.xlu0 %v9110_v30, %s4902_s30  ;;  %v9212_v30 = vld [vmem:[#allocation83_spill] sm:$0xff] }
 0x172   :  { %v6273_v31 = vpop.permute.xlu1 %675  ;;  %v6275_v24 = vpop.permute.xlu0 %673 }
 0x173   :  { %9111 = vst [vmem:[#allocation16_spill] sm:$0xff] %v6273_v31  ;;  %9112 = vst [vmem:[#allocation17_spill] sm:$0xff] %v6275_v24  ;;  %v9121_v24 = vld [vmem:[#allocation25_spill] sm:$0xff] }
 0x174   :  { %853 = vrot.lane.b32.xlu1 %v9113_v28, %s4902_s30  ;;  %851 = vrot.lane.b32.xlu0 %v9114_v57, %s4902_s30  ;;  %v9167_v57 = vld [vmem:[#allocation49_spill] sm:$0xff] }
 0x176   :  { %v6281_v25 = vpop.permute.xlu1 %679  ;;  %v6283_v5 = vpop.permute.xlu0 %677 }
 0x177   :  { %9115 = vst [vmem:[#allocation18_spill] sm:$0xff] %v6281_v25  ;;  %9116 = vst [vmem:[#allocation213_spill] sm:$0xff] %v6283_v5  ;;  %v9125_v5 = vld [vmem:[#allocation27_spill] sm:$0xff] }
 0x178   :  { %857 = vrot.lane.b32.xlu1 %v9117_v63, %s4902_s30  ;;  %855 = vrot.lane.b32.xlu0 %v9118_v47, %s4902_s30 }
 0x17a   :  { %v6289_v19 = vpop.permute.xlu1 %683  ;;  %v6291_v31 = vpop.permute.xlu0 %681 }
 0x17b   :  { %9119 = vst [vmem:[#allocation214_spill] sm:$0xff] %v6289_v19  ;;  %9120 = vst [vmem:[#allocation215_spill] sm:$0xff] %v6291_v31  ;;  %v813_v19 = vrot.slane %v6077_v59, 1  ;;  %v6307_v31 = vrot.slane %v6072_v55, 1 }
 0x17c   :  { %861 = vrot.lane.b32.xlu1 %v9121_v24, %s4902_s30  ;;  %859 = vrot.lane.b32.xlu0 %v9122_v3, %s4902_s30  ;;  %v9130_v3 = vld [vmem:[#allocation30_spill] sm:$0xff] }
 0x17d   :  { %9127 = vst [vmem:[#allocation218_spill] sm:$0xff] %v6307_v31 }
 0x17e   :  { %v6297_v58 = vpop.permute.xlu1 %687  ;;  %v6299_v25 = vpop.permute.xlu0 %685 }
 0x17f   :  { %9123 = vst [vmem:[#allocation216_spill] sm:$0xff] %v6297_v58  ;;  %9124 = vst [vmem:[#allocation217_spill] sm:$0xff] %v6299_v25  ;;  %v9131_v58 = vld [vmem:[#allocation31_spill] sm:$0xff]  ;;  %v6319_v25 = vsel %vm135_vm0, %v813_v19, %v6307_v31  ;;  %v9138_v19 = vld [vmem:[#allocation33_spill] sm:$0xff] }
 0x180   :  { %865 = vrot.lane.b32.xlu1 %v9125_v5, %s4902_s30  ;;  %863 = vrot.lane.b32.xlu0 %v9126_v35, %s4902_s30  ;;  %9132 = vst [vmem:[#allocation221_spill] sm:$0xff] %v6319_v25 }
 0x182   :  { %v6309_v20 = vpop.permute.xlu1 %691  ;;  %v6311_v24 = vpop.permute.xlu0 %689 }
 0x183   :  { %9128 = vst [vmem:[#allocation219_spill] sm:$0xff] %v6309_v20  ;;  %9129 = vst [vmem:[#allocation220_spill] sm:$0xff] %v6311_v24 }
 0x184   :  { %869 = vrot.lane.b32.xlu1 %v9130_v3, %s4902_s30  ;;  %867 = vrot.lane.b32.xlu0 %v9131_v58, %s4902_s30  ;;  %v9137_v3 = vld [vmem:[#allocation32_spill] sm:$0xff] }
 0x186   :  { %v6321_v5 = vpop.permute.xlu1 %695  ;;  %v6323_v35 = vpop.permute.xlu0 %693 }
 0x187   :  { %9133 = vst [vmem:[#allocation222_spill] sm:$0xff] %v6321_v5  ;;  %9134 = vst [vmem:[#allocation223_spill] sm:$0xff] %v6323_v35  ;;  %v9139_v35 = vld [vmem:[#allocation34_spill] sm:$0xff] }
 0x188   :  { %873 = vrot.lane.b32.xlu1 %v6307_v31, %s4902_s30  ;;  %871 = vrot.lane.b32.xlu0 %v6319_v25, %s4902_s30  ;;  %v9140_v31 = vld [vmem:[#allocation35_spill] sm:$0xff] }
 0x18a   :  { %v6329_v20 = vpop.permute.xlu1 %699  ;;  %v6331_v24 = vpop.permute.xlu0 %697 }
 0x18b   :  { %9135 = vst [vmem:[#allocation224_spill] sm:$0xff] %v6329_v20  ;;  %9136 = vst [vmem:[#allocation225_spill] sm:$0xff] %v6331_v24  ;;  %v9142_v24 = vld [vmem:[#allocation36_spill] sm:$0xff] }
 0x18c   :  { %877 = vrot.lane.b32.xlu1 %v9137_v3, %s4902_s30  ;;  %875 = vrot.lane.b32.xlu0 %v9138_v19, %s4902_s30  ;;  %v9143_v3 = vld [vmem:[#allocation37_spill] sm:$0xff] }
 0x18e   :  { %v6337_v58 = vpop.permute.xlu1 %703  ;;  %v6339_v5 = vpop.permute.xlu0 %701 }
 0x190   :  { %881 = vrot.lane.b32.xlu1 %v9139_v35, %s4902_s30  ;;  %879 = vrot.lane.b32.xlu0 %v9140_v31, %s4902_s30 }
 0x192   :  { %v6345_v25 = vpop.permute.xlu1 %707  ;;  %v6347_v20 = vpop.permute.xlu0 %705 }
 0x193   :  { %9141 = vst [vmem:[#allocation32_spill] sm:$0xff] %v6345_v25 }
 0x194   :  { %885 = vrot.lane.b32.xlu1 %v9142_v24, %s4902_s30  ;;  %883 = vrot.lane.b32.xlu0 %v9143_v3, %s4902_s30 }
 0x196   :  { %v6353_v19 = vpop.permute.xlu1 %711  ;;  %v6355_v42 = vpop.permute.xlu0 %709 }
 0x197   :  { %9144 = vst [vmem:[#allocation33_spill] sm:$0xff] %v6353_v19  ;;  %9145 = vst [vmem:[#allocation34_spill] sm:$0xff] %v6355_v42  ;;  %v9200_v42 = vld [vmem:[#allocation71_spill] sm:$0xff] }
 0x198   :  { %889 = vrot.lane.b32.xlu1 %v9146_v62, %s4902_s30  ;;  %887 = vrot.lane.b32.xlu0 %v9147_v14, %s4902_s30 }
 0x19a   :  { %v6361_v63 = vpop.permute.xlu1 %715  ;;  %v6363_v33 = vpop.permute.xlu0 %713 }
 0x19b   :  { %9148 = vst [vmem:[#allocation35_spill] sm:$0xff] %v6361_v63  ;;  %9149 = vst [vmem:[#allocation36_spill] sm:$0xff] %v6363_v33  ;;  %v9158_v33 = vld [vmem:[#allocation44_spill] sm:$0xff] }
 0x19c   :  { %893 = vrot.lane.b32.xlu1 %v9150_v9, %s4902_s30  ;;  %891 = vrot.lane.b32.xlu0 %v9151_v34, %s4902_s30 }
 0x19e   :  { %v6369_v47 = vpop.permute.xlu1 %719  ;;  %v6371_v15 = vpop.permute.xlu0 %717 }
 0x19f   :  { %9152 = vst [vmem:[#allocation37_spill] sm:$0xff] %v6369_v47  ;;  %9153 = vst [vmem:[#allocation38_spill] sm:$0xff] %v6371_v15  ;;  %v9162_v15 = vld [vmem:[#allocation46_spill] sm:$0xff] }
 0x1a0   :  { %897 = vrot.lane.b32.xlu1 %v9154_v45, %s4902_s30  ;;  %895 = vrot.lane.b32.xlu0 %v9155_v7, %s4902_s30 }
 0x1a2   :  { %v6377_v28 = vpop.permute.xlu1 %723  ;;  %v6379_v63 = vpop.permute.xlu0 %721 }
 0x1a3   :  { %9156 = vst [vmem:[#allocation39_spill] sm:$0xff] %v6377_v28  ;;  %9157 = vst [vmem:[#allocation40_spill] sm:$0xff] %v6379_v63  ;;  %v9166_v63 = vld [vmem:[#allocation48_spill] sm:$0xff] }
 0x1a4   :  { %901 = vrot.lane.b32.xlu1 %v9158_v33, %s4902_s30  ;;  %899 = vrot.lane.b32.xlu0 %v9159_v13, %s4902_s30  ;;  %v9216_v33 = vld [vmem:[#allocation87_spill] sm:$0xff] }
 0x1a6   :  { %v6385_v19 = vpop.permute.xlu1 %727  ;;  %v6387_v47 = vpop.permute.xlu0 %725 }
 0x1a7   :  { %9160 = vst [vmem:[#allocation41_spill] sm:$0xff] %v6385_v19  ;;  %9161 = vst [vmem:[#allocation42_spill] sm:$0xff] %v6387_v47  ;;  %v9170_v47 = vld [vmem:[#allocation50_spill] sm:$0xff] }
 0x1a8   :  { %905 = vrot.lane.b32.xlu1 %v9162_v15, %s4902_s30  ;;  %903 = vrot.lane.b32.xlu0 %v9163_v43, %s4902_s30  ;;  %v9171_v15 = vld [vmem:[#allocation51_spill] sm:$0xff] }
 0x1a9   :  { %v9204_v43 = vld [vmem:[#allocation75_spill] sm:$0xff] }
 0x1aa   :  { %v6393_v39 = vpop.permute.xlu1 %731  ;;  %v6395_v28 = vpop.permute.xlu0 %729 }
 0x1ab   :  { %9164 = vst [vmem:[#allocation43_spill] sm:$0xff] %v6393_v39  ;;  %9165 = vst [vmem:[#allocation45_spill] sm:$0xff] %v6395_v28  ;;  %v9174_v28 = vld [vmem:[#allocation52_spill] sm:$0xff] }
 0x1ac   :  { %909 = vrot.lane.b32.xlu1 %v9166_v63, %s4902_s30  ;;  %907 = vrot.lane.b32.xlu0 %v9167_v57, %s4902_s30  ;;  %v9175_v63 = vld [vmem:[#allocation53_spill] sm:$0xff] }
 0x1ae   :  { %v6401_v8 = vpop.permute.xlu1 %735  ;;  %v6403_v19 = vpop.permute.xlu0 %733 }
 0x1af   :  { %9168 = vst [vmem:[#allocation226_spill] sm:$0xff] %v6401_v8  ;;  %9169 = vst [vmem:[#allocation227_spill] sm:$0xff] %v6403_v19  ;;  %v9178_v19 = vld [vmem:[#allocation54_spill] sm:$0xff] }
 0x1b0   :  { %913 = vrot.lane.b32.xlu1 %v9170_v47, %s4902_s30  ;;  %911 = vrot.lane.b32.xlu0 %v9171_v15, %s4902_s30  ;;  %v9179_v47 = vld [vmem:[#allocation55_spill] sm:$0xff] }
 0x1b2   :  { %v6409_v52 = vpop.permute.xlu1 %739  ;;  %v6411_v39 = vpop.permute.xlu0 %737 }
 0x1b3   :  { %9172 = vst [vmem:[#allocation228_spill] sm:$0xff] %v6409_v52  ;;  %9173 = vst [vmem:[#allocation229_spill] sm:$0xff] %v6411_v39  ;;  %v816_v52 = vrot.slane %v6199_v17, 1  ;;  %v6427_v39 = vrot.slane %v6194_v22, 1 }
 0x1b4   :  { %917 = vrot.lane.b32.xlu1 %v9174_v28, %s4902_s30  ;;  %915 = vrot.lane.b32.xlu0 %v9175_v63, %s4902_s30  ;;  %v9183_v63 = vld [vmem:[#allocation56_spill] sm:$0xff] }
 0x1b5   :  { %9180 = vst [vmem:[#allocation232_spill] sm:$0xff] %v6427_v39 }
 0x1b6   :  { %v6417_v57 = vpop.permute.xlu1 %743  ;;  %v6419_v8 = vpop.permute.xlu0 %741 }
 0x1b7   :  { %9176 = vst [vmem:[#allocation230_spill] sm:$0xff] %v6417_v57  ;;  %9177 = vst [vmem:[#allocation231_spill] sm:$0xff] %v6419_v8  ;;  %v9184_v57 = vld [vmem:[#allocation57_spill] sm:$0xff]  ;;  %v6439_v8 = vsel %vm135_vm0, %v816_v52, %v6427_v39  ;;  %v9191_v52 = vld [vmem:[#allocation59_spill] sm:$0xff] }
 0x1b8   :  { %921 = vrot.lane.b32.xlu1 %v9178_v19, %s4902_s30  ;;  %919 = vrot.lane.b32.xlu0 %v9179_v47, %s4902_s30  ;;  %9185 = vst [vmem:[#allocation235_spill] sm:$0xff] %v6439_v8  ;;  %v9199_v47 = vld [vmem:[#allocation68_spill] sm:$0xff] }
 0x1ba   :  { %v6429_v15 = vpop.permute.xlu1 %747  ;;  %v6431_v28 = vpop.permute.xlu0 %745 }
 0x1bb   :  { %9181 = vst [vmem:[#allocation233_spill] sm:$0xff] %v6429_v15  ;;  %9182 = vst [vmem:[#allocation234_spill] sm:$0xff] %v6431_v28  ;;  %v9190_v28 = vld [vmem:[#allocation58_spill] sm:$0xff] }
 0x1bc   :  { %925 = vrot.lane.b32.xlu1 %v9183_v63, %s4902_s30  ;;  %923 = vrot.lane.b32.xlu0 %v9184_v57, %s4902_s30  ;;  %v9195_v63 = vld [vmem:[#allocation64_spill] sm:$0xff] }
 0x1be   :  { %v6441_v19 = vpop.permute.xlu1 %751  ;;  %v6443_v17 = vpop.permute.xlu0 %749 }
 0x1bf   :  { %9186 = vst [vmem:[#allocation236_spill] sm:$0xff] %v6441_v19  ;;  %9187 = vst [vmem:[#allocation237_spill] sm:$0xff] %v6443_v17 }
 0x1c0   :  { %929 = vrot.lane.b32.xlu1 %v6427_v39, %s4902_s30  ;;  %927 = vrot.lane.b32.xlu0 %v6439_v8, %s4902_s30  ;;  %v9192_v39 = vld [vmem:[#allocation60_spill] sm:$0xff]  ;;  %v9193_v8 = vld [vmem:[#allocation63_spill] sm:$0xff] }
 0x1c2   :  { %v6449_v22 = vpop.permute.xlu1 %755  ;;  %v6451_v15 = vpop.permute.xlu0 %753 }
 0x1c3   :  { %9188 = vst [vmem:[#allocation238_spill] sm:$0xff] %v6449_v22  ;;  %9189 = vst [vmem:[#allocation239_spill] sm:$0xff] %v6451_v15 }
 0x1c4   :  { %995 = vrot.lane.b32.xlu1 %v9190_v28, %s4903_s4  ;;  %993 = vrot.lane.b32.xlu0 %v9191_v52, %s4903_s4  ;;  %v9196_v28 = vld [vmem:[#allocation67_spill] sm:$0xff] }
 0x1c6   :  { %v6457_v19 = vpop.permute.xlu1 %821  ;;  %v6459_v17 = vpop.permute.xlu0 %819 }
 0x1c8   :  { %999 = vrot.lane.b32.xlu1 %v9192_v39, %s4903_s4  ;;  %997 = vrot.lane.b32.xlu0 %v9193_v8, %s4903_s4 }
 0x1ca   :  { %v6465_v22 = vpop.permute.xlu1 %825  ;;  %v6467_v15 = vpop.permute.xlu0 %823 }
 0x1cb   :  { %9194 = vst [vmem:[#allocation58_spill] sm:$0xff] %v6465_v22 }
 0x1cc   :  { %1003 = vrot.lane.b32.xlu1 %v9195_v63, %s4903_s4  ;;  %1001 = vrot.lane.b32.xlu0 %v9196_v28, %s4903_s4 }
 0x1ce   :  { %v6473_v52 = vpop.permute.xlu1 %829  ;;  %v6475_v57 = vpop.permute.xlu0 %827 }
 0x1cf   :  { %9197 = vst [vmem:[#allocation59_spill] sm:$0xff] %v6473_v52  ;;  %9198 = vst [vmem:[#allocation60_spill] sm:$0xff] %v6475_v57  ;;  %v9208_v57 = vld [vmem:[#allocation79_spill] sm:$0xff] }
 0x1d0   :  { %1007 = vrot.lane.b32.xlu1 %v9199_v47, %s4903_s4  ;;  %1005 = vrot.lane.b32.xlu0 %v9200_v42, %s4903_s4 }
 0x1d2   :  { %v6481_v27 = vpop.permute.xlu1 %833  ;;  %v6483_v48 = vpop.permute.xlu0 %831 }
 0x1d3   :  { %9201 = vst [vmem:[#allocation63_spill] sm:$0xff] %v6481_v27  ;;  %9202 = vst [vmem:[#allocation64_spill] sm:$0xff] %v6483_v48  ;;  %v9211_v48 = vld [vmem:[#allocation80_spill] sm:$0xff] }
 0x1d4   :  { %1011 = vrot.lane.b32.xlu1 %v9203_v0, %s4903_s4  ;;  %1009 = vrot.lane.b32.xlu0 %v9204_v43, %s4903_s4 }
 0x1d6   :  { %v6489_v25 = vpop.permute.xlu1 %837  ;;  %v6491_v52 = vpop.permute.xlu0 %835 }
 0x1d7   :  { %9205 = vst [vmem:[#allocation67_spill] sm:$0xff] %v6489_v25  ;;  %9206 = vst [vmem:[#allocation68_spill] sm:$0xff] %v6491_v52  ;;  %v9215_v52 = vld [vmem:[#allocation84_spill] sm:$0xff] }
 0x1d8   :  { %1015 = vrot.lane.b32.xlu1 %v9207_v26, %s4903_s4  ;;  %1013 = vrot.lane.b32.xlu0 %v9208_v57, %s4903_s4 }
 0x1da   :  { %v6497_v44 = vpop.permute.xlu1 %841  ;;  %v6499_v27 = vpop.permute.xlu0 %839 }
 0x1db   :  { %9209 = vst [vmem:[#allocation71_spill] sm:$0xff] %v6497_v44  ;;  %9210 = vst [vmem:[#allocation72_spill] sm:$0xff] %v6499_v27  ;;  %v9219_v27 = vld [vmem:[#allocation88_spill] sm:$0xff] }
 0x1dc   :  { %1019 = vrot.lane.b32.xlu1 %v9211_v48, %s4903_s4  ;;  %1017 = vrot.lane.b32.xlu0 %v9212_v30, %s4903_s4  ;;  %v9220_v48 = vld [vmem:[#allocation91_spill] sm:$0xff] }
 0x1de   :  { %v6505_v2 = vpop.permute.xlu1 %845  ;;  %v6507_v25 = vpop.permute.xlu0 %843 }
 0x1df   :  { %9213 = vst [vmem:[#allocation75_spill] sm:$0xff] %v6505_v2  ;;  %9214 = vst [vmem:[#allocation76_spill] sm:$0xff] %v6507_v25  ;;  %v9223_v25 = vld [vmem:[#allocation92_spill] sm:$0xff] }
 0x1e0   :  { %1023 = vrot.lane.b32.xlu1 %v9215_v52, %s4903_s4  ;;  %1021 = vrot.lane.b32.xlu0 %v9216_v33, %s4903_s4  ;;  %v9224_v52 = vld [vmem:[#allocation95_spill] sm:$0xff] }
 0x1e2   :  { %v6513_v22 = vpop.permute.xlu1 %849  ;;  %v6515_v44 = vpop.permute.xlu0 %847 }
 0x1e3   :  { %9217 = vst [vmem:[#allocation79_spill] sm:$0xff] %v6513_v22  ;;  %9218 = vst [vmem:[#allocation83_spill] sm:$0xff] %v6515_v44  ;;  %v9227_v44 = vld [vmem:[#allocation96_spill] sm:$0xff] }
 0x1e4   :  { %1027 = vrot.lane.b32.xlu1 %v9219_v27, %s4903_s4  ;;  %1025 = vrot.lane.b32.xlu0 %v9220_v48, %s4903_s4  ;;  %v9228_v27 = vld [vmem:[#allocation99_spill] sm:$0xff] }
 0x1e6   :  { %v6521_v12 = vpop.permute.xlu1 %853  ;;  %v6523_v2 = vpop.permute.xlu0 %851 }
 0x1e7   :  { %9221 = vst [vmem:[#allocation240_spill] sm:$0xff] %v6521_v12  ;;  %9222 = vst [vmem:[#allocation241_spill] sm:$0xff] %v6523_v2 }
 0x1e8   :  { %1031 = vrot.lane.b32.xlu1 %v9223_v25, %s4903_s4  ;;  %1029 = vrot.lane.b32.xlu0 %v9224_v52, %s4903_s4  ;;  %v6665_v52 = vld [vmem:[%s8661_s0 + $0x30] sm:$0xff] }
 0x1ea   :  { %v6529_v33 = vpop.permute.xlu1 %857  ;;  %v6531_v22 = vpop.permute.xlu0 %855 }
 0x1eb   :  { %9225 = vst [vmem:[#allocation242_spill] sm:$0xff] %v6529_v33  ;;  %9226 = vst [vmem:[#allocation243_spill] sm:$0xff] %v6531_v22  ;;  %v987_v33 = vrot.slane %v6077_v59, 2  ;;  %v6547_v22 = vrot.slane %v6072_v55, 2  ;;  %v3117_v55 = vld [vmem:[%s8662_s1] sm:$0xff] }
 0x1ec   :  { %1035 = vrot.lane.b32.xlu1 %v9227_v44, %s4903_s4  ;;  %1033 = vrot.lane.b32.xlu0 %v9228_v27, %s4903_s4  ;;  %v9234_v27 = vld [vmem:[#allocation104_spill] sm:$0xff] }
 0x1ed   :  { %9231 = vst [vmem:[#allocation246_spill] sm:$0xff] %v6547_v22 }
 0x1ee   :  { %v6537_v48 = vpop.permute.xlu1 %861  ;;  %v6539_v12 = vpop.permute.xlu0 %859 }
 0x1ef   :  { %9229 = vst [vmem:[#allocation244_spill] sm:$0xff] %v6537_v48  ;;  %9230 = vst [vmem:[#allocation245_spill] sm:$0xff] %v6539_v12  ;;  %v9235_v48 = vld [vmem:[#allocation107_spill] sm:$0xff]  ;;  %v6559_v12 = vsel %vm388_vm1, %v987_v33, %v6547_v22 }
 0x1f0   :  { %1039 = vrot.lane.b32.xlu1 %v5709_v6, %s4903_s4  ;;  %1037 = vrot.lane.b32.xlu0 %v5722_v36, %s4903_s4  ;;  %9236 = vst [vmem:[#allocation249_spill] sm:$0xff] %v6559_v12 }
 0x1f2   :  { %v6549_v2 = vpop.permute.xlu1 %865  ;;  %v6551_v44 = vpop.permute.xlu0 %863 }
 0x1f3   :  { %9232 = vst [vmem:[#allocation247_spill] sm:$0xff] %v6549_v2  ;;  %9233 = vst [vmem:[#allocation248_spill] sm:$0xff] %v6551_v44  ;;  %v3118_v2 = vld [vmem:[%s8662_s1 + $0x8] sm:$0xff] }
 0x1f4   :  { %1043 = vrot.lane.b32.xlu1 %v9234_v27, %s4903_s4  ;;  %1041 = vrot.lane.b32.xlu0 %v9235_v48, %s4903_s4 }
 0x1f6   :  { %v6561_v6 = vpop.permute.xlu1 %869  ;;  %v6563_v59 = vpop.permute.xlu0 %867 }
 0x1f7   :  { %9237 = vst [vmem:[#allocation250_spill] sm:$0xff] %v6561_v6  ;;  %9238 = vst [vmem:[#allocation251_spill] sm:$0xff] %v6563_v59  ;;  %v4752_v6 = vpack.c.bf16 %v3118_v2, %v3117_v55  ;;  %v4904_v59 = vmov 0.0|0.0  }
 0x1f8   :  { %1047 = vrot.lane.b32.xlu1 %v6547_v22, %s4903_s4  ;;  %1045 = vrot.lane.b32.xlu0 %v6559_v12, %s4903_s4  ;;  %v9241_v22 = vld [vmem:[#allocation112_spill] sm:$0xff]  ;;  %v3119_v12 = vld [vmem:[%s8662_s1 + $0x10] sm:$0xff] }
 0x1f9   :  { %4751 = vmatprep.subr.bf16.mxu0 %v4904_v59  ;;  %4757 = vmatprep.subr.bf16.mxu1 %v4904_v59 }
 0x1fa   :  { %v6575_v33 = vpop.permute.xlu1 %873  ;;  %v6577_v44 = vpop.permute.xlu0 %871  ;;  %4753 = vmatpush3.bf16.msra.mxu0 %v4752_v6  ;;  %4760 = vmatpush3.bf16.msra.mxu1 %v4752_v6 }
 0x1fb   :  { %9239 = vst [vmem:[#allocation252_spill] sm:$0xff] %v6575_v33  ;;  %9240 = vst [vmem:[#allocation253_spill] sm:$0xff] %v6577_v44  ;;  %v3120_v33 = vld [vmem:[%s8662_s1 + $0x18] sm:$0xff]  ;;  %4754 = vmatprep.subr.bf16.mxu0 %v4904_v59  ;;  %4758 = vmatprep.subr.bf16.mxu1 %v4904_v59  ;;  %v3121_v59 = vld [vmem:[%s8662_s1 + $0x20] sm:$0xf] }
 0x1fc   :  { %1051 = vrot.lane.b32.xlu1 %v5752_v16, %s4903_s4  ;;  %1049 = vrot.lane.b32.xlu0 %v9241_v22, %s4903_s4  ;;  %v4755_v44 = vpack.c.bf16 %v3120_v33, %v3119_v12  ;;  %v6596_v16 = vld [vmem:[%s8661_s0 + $0x20] sm:$0xff]  ;;  %v8868_v12 = vmov 0.0  }
 0x1fd   :  { %v9242_v22 = vld [vmem:[#allocation116_spill] sm:$0xff]  ;;  %4604 = vmatprep.mubr.msk.f32.mxu0 %vm4909_vm3, %v8868_v12  ;;  %4679 = vmatprep.mubr.msk.f32.mxu1 %vm4909_vm3, %v8868_v12 }
 0x1fe   :  { %v6589_v2 = vpop.permute.xlu1 %877  ;;  %v6591_v55 = vpop.permute.xlu0 %875  ;;  %4756 = vmatpush3.bf16.msra.mxu0 %v4755_v44  ;;  %4761 = vmatpush3.bf16.msra.mxu1 %v4755_v44 }
 0x1ff   :  { %4602 = vmatprep.subr.mxu0 %v8868_v12  ;;  %4759 = vmatprep.subr.mxu1 %v8868_v12 }
 0x200   :  { %1165 = vrot.lane.b32.xlu1 %v6596_v16, %s4905_s15  ;;  %1053 = vrot.lane.b32.xlu0 %v9242_v22, %s4903_s4 }
 0x202   :  { %v6602_v6 = vpop.permute.xlu1 %881  ;;  %v6604_v27 = vpop.permute.xlu0 %879  ;;  %4603 = vmatpush3.msk.msra.mxu0 %vm4061_vm2, %v3121_v59  ;;  %4762 = vmatpush3.msk.msra.mxu1 %vm4061_vm2, %v3121_v59  ;;  %v6639_v59 = vld [vmem:[%s8661_s0 + $0x128] sm:$0xff] }
 0x204   :  { %1513 = vrot.lane.b32.xlu1 %v9193_v8, %s4907_s18  ;;  %1339 = vrot.lane.b32.xlu0 %v9087_v32, %s4908_s19  ;;  %v6628_v8 = vld [vmem:[%s8661_s0 + $0x120] sm:$0xff] }
 0x206   :  { %v6617_v44 = vpop.permute.xlu1 %885  ;;  %v6619_v33 = vpop.permute.xlu0 %883 }
 0x208   :  { %1395 = vrot.lane.b32.xlu1 %v9140_v31, %s4908_s19  ;;  %1221 = vrot.lane.b32.xlu0 %v6628_v8, %s4905_s15  ;;  %v6646_v31 = vld [vmem:[%s8661_s0 + $0x28] sm:$0xff] }
 0x20a   :  { %v6632_v32 = vpop.permute.xlu1 %889  ;;  %v6634_v48 = vpop.permute.xlu0 %887 }
 0x20b   :  { %9243 = vst [vmem:[#allocation112_spill] sm:$0xff] %v6632_v32 }
 0x20c   :  { %1223 = vrot.lane.b32.xlu1 %v6639_v59, %s4905_s15  ;;  %1167 = vrot.lane.b32.xlu0 %v6646_v31, %s4905_s15 }
 0x20e   :  { %v6650_v12 = vpop.permute.xlu1 %893  ;;  %v6652_v36 = vpop.permute.xlu0 %891 }
 0x20f   :  { %9244 = vst [vmem:[#allocation116_spill] sm:$0xff] %v6650_v12  ;;  %9245 = vst [vmem:[#allocation254_spill] sm:$0xff] %v6652_v36  ;;  %v6686_v36 = vld [vmem:[%s8661_s0 + $0x130] sm:$0xff] }
 0x210   :  { %1341 = vrot.lane.b32.xlu1 %v9086_v61, %s4908_s19  ;;  %1569 = vrot.lane.b32.xlu0 %v9242_v22, %s4907_s18  ;;  %v9250_v22 = vld [vmem:[#allocation113_spill] sm:$0xff] }
 0x212   :  { %v6658_v25 = vpop.permute.xlu1 %897  ;;  %v6660_v32 = vpop.permute.xlu0 %895 }
 0x213   :  { %9246 = vst [vmem:[#allocation255_spill] sm:$0xff] %v6658_v25  ;;  %9247 = vst [vmem:[#allocation256_spill] sm:$0xff] %v6660_v32 }
 0x214   :  { %1169 = vrot.lane.b32.xlu1 %v6665_v52, %s4905_s15  ;;  %1397 = vrot.lane.b32.xlu0 %v9139_v35, %s4908_s19 }
 0x216   :  { %v6671_v12 = vpop.permute.xlu1 %901  ;;  %v6673_v61 = vpop.permute.xlu0 %899 }
 0x217   :  { %9248 = vst [vmem:[#allocation257_spill] sm:$0xff] %v6671_v12  ;;  %9249 = vst [vmem:[#allocation258_spill] sm:$0xff] %v6673_v61 }
 0x218   :  { %1571 = vrot.lane.b32.xlu1 %v9250_v22, %s4907_s18  ;;  %1515 = vrot.lane.b32.xlu0 %v9192_v39, %s4907_s18 }
 0x21a   :  { %v6679_v25 = vpop.permute.xlu1 %905  ;;  %v6681_v32 = vpop.permute.xlu0 %903 }
 0x21b   :  { %9251 = vst [vmem:[#allocation113_spill] sm:$0xff] %v6679_v25  ;;  %9252 = vst [vmem:[#allocation259_spill] sm:$0xff] %v6681_v32  ;;  %v9257_v32 = vld [vmem:[#allocation120_spill] sm:$0xff] }
 0x21c   :  { %1225 = vrot.lane.b32.xlu1 %v6686_v36, %s4905_s15  ;;  %1343 = vrot.lane.b32.xlu0 %v9090_v54, %s4908_s19  ;;  %v6709_v54 = vld [vmem:[%s8661_s0 + $0x38] sm:$0xff] }
 0x21e   :  { %v6692_v35 = vpop.permute.xlu1 %909  ;;  %v6694_v12 = vpop.permute.xlu0 %907 }
 0x21f   :  { %9253 = vst [vmem:[#allocation260_spill] sm:$0xff] %v6692_v35  ;;  %9254 = vst [vmem:[#allocation261_spill] sm:$0xff] %v6694_v12 }
 0x220   :  { %1399 = vrot.lane.b32.xlu1 %v9143_v3, %s4908_s19  ;;  %1517 = vrot.lane.b32.xlu0 %v9196_v28, %s4907_s18 }
 0x222   :  { %v6700_v39 = vpop.permute.xlu1 %913  ;;  %v6702_v25 = vpop.permute.xlu0 %911 }
 0x223   :  { %9255 = vst [vmem:[#allocation262_spill] sm:$0xff] %v6700_v39  ;;  %9256 = vst [vmem:[#allocation263_spill] sm:$0xff] %v6702_v25  ;;  %v6728_v25 = vld [vmem:[%s8661_s0 + $0x138] sm:$0xff] }
 0x224   :  { %1573 = vrot.lane.b32.xlu1 %v9257_v32, %s4907_s18  ;;  %1171 = vrot.lane.b32.xlu0 %v6709_v54, %s4905_s15  ;;  %9262 = vst [vmem:[#allocation267_spill] sm:$0xff] %v6728_v25 }
 0x226   :  { %v6713_v35 = vpop.permute.xlu1 %917  ;;  %v6715_v3 = vpop.permute.xlu0 %915 }
 0x227   :  { %9258 = vst [vmem:[#allocation120_spill] sm:$0xff] %v6713_v35  ;;  %9259 = vst [vmem:[#allocation264_spill] sm:$0xff] %v6715_v3  ;;  %v6735_v35 = vld [vmem:[%s8661_s0 + $0x40] sm:$0xff] }
 0x228   :  { %1345 = vrot.lane.b32.xlu1 %v9089_v50, %s4908_s19  ;;  %1055 = vrot.lane.b32.xlu0 %v9250_v22, %s4903_s4  ;;  %9263 = vst [vmem:[#allocation268_spill] sm:$0xff] %v6735_v35 }
 0x22a   :  { %v6721_v28 = vpop.permute.xlu1 %921  ;;  %v6723_v39 = vpop.permute.xlu0 %919 }
 0x22b   :  { %9260 = vst [vmem:[#allocation265_spill] sm:$0xff] %v6721_v28  ;;  %9261 = vst [vmem:[#allocation266_spill] sm:$0xff] %v6723_v39 }
 0x22c   :  { %1227 = vrot.lane.b32.xlu1 %v6728_v25, %s4905_s15  ;;  %1173 = vrot.lane.b32.xlu0 %v6735_v35, %s4905_s15  ;;  %v4788_v25 = vld [vmem:[%s8661_s0 + $0x50] sm:$0xff] }
 0x22e   :  { %v6739_v50 = vpop.permute.xlu1 %925  ;;  %v6741_v22 = vpop.permute.xlu0 %923 }
 0x22f   :  { %9264 = vst [vmem:[#allocation269_spill] sm:$0xff] %v6739_v50  ;;  %9265 = vst [vmem:[#allocation270_spill] sm:$0xff] %v6741_v22  ;;  %v4787_v22 = vld [vmem:[%s8661_s0 + $0x48] sm:$0xff] }
 0x230   :  { %1057 = vrot.lane.b32.xlu1 %v9257_v32, %s4903_s4  ;;  %1519 = vrot.lane.b32.xlu0 %v9195_v63, %s4907_s18  ;;  %v6764_v63 = vld [vmem:[%s8661_s0 + $0x140] sm:$0xff] }
 0x231   :  { %9268 = vst [vmem:[#allocation273_spill] sm:$0xff] %v6764_v63 }
 0x232   :  { %v6747_v28 = vpop.permute.xlu1 %929  ;;  %v6749_v39 = vpop.permute.xlu0 %927 }
 0x233   :  { %9266 = vst [vmem:[#allocation271_spill] sm:$0xff] %v6747_v28  ;;  %9267 = vst [vmem:[#allocation272_spill] sm:$0xff] %v6749_v39  ;;  %v9270_v39 = vld [vmem:[#allocation124_spill] sm:$0xff] }
 0x234   :  { %1401 = vrot.lane.b32.xlu1 %v9142_v24, %s4908_s19  ;;  %1347 = vrot.lane.b32.xlu0 %v9094_v37, %s4908_s19  ;;  %v9269_v37 = vld [vmem:[#allocation117_spill] sm:$0xff] }
 0x236   :  { %v6755_v3 = vpop.permute.xlu1 %995  ;;  %v6757_v50 = vpop.permute.xlu0 %993 }
 0x238   :  { %1521 = vrot.lane.b32.xlu1 %v9200_v42, %s4907_s18  ;;  %1229 = vrot.lane.b32.xlu0 %v6764_v63, %s4905_s15 }
 0x23a   :  { %v6768_v32 = vpop.permute.xlu1 %999  ;;  %v6770_v24 = vpop.permute.xlu0 %997 }
 0x23c   :  { %1403 = vrot.lane.b32.xlu1 %v9147_v14, %s4908_s19  ;;  %1575 = vrot.lane.b32.xlu0 %v9269_v37, %s4907_s18 }
 0x23e   :  { %v6776_v28 = vpop.permute.xlu1 %1003  ;;  %v6778_v42 = vpop.permute.xlu0 %1001 }
 0x240   :  { %1577 = vrot.lane.b32.xlu1 %v9270_v39, %s4907_s18  ;;  %1175 = vrot.lane.b32.xlu0 %v4787_v22, %s4905_s15 }
 0x242   :  { %v6786_v12 = vpop.permute.xlu1 %1007  ;;  %v6788_v61 = vpop.permute.xlu0 %1005 }
 0x244   :  { %1523 = vrot.lane.b32.xlu1 %v9199_v47, %s4907_s18  ;;  %1349 = vrot.lane.b32.xlu0 %v9093_v11, %s4908_s19  ;;  %v6813_v47 = vld [vmem:[%s8661_s0 + $0x148] sm:$0xff] }
 0x246   :  { %v6794_v14 = vpop.permute.xlu1 %1011  ;;  %v6796_v63 = vpop.permute.xlu0 %1009 }
 0x248   :  { %1177 = vrot.lane.b32.xlu1 %v4788_v25, %s4905_s15  ;;  %1059 = vrot.lane.b32.xlu0 %v9269_v37, %s4903_s4 }
 0x24a   :  { %v6804_v22 = vpop.permute.xlu1 %1015  ;;  %v6806_v35 = vpop.permute.xlu0 %1013 }
 0x24b   :  { %9271 = vst [vmem:[#allocation117_spill] sm:$0xff] %v6804_v22  ;;  %v4790_v22 = vld [vmem:[%s8661_s0 + $0x150] sm:$0xff] }
 0x24c   :  { %1061 = vrot.lane.b32.xlu1 %v9270_v39, %s4903_s4  ;;  %1231 = vrot.lane.b32.xlu0 %v6813_v47, %s4905_s15 }
 0x24e   :  { %v6817_v11 = vpop.permute.xlu1 %1019  ;;  %v6819_v25 = vpop.permute.xlu0 %1017 }
 0x24f   :  { %9272 = vst [vmem:[#allocation124_spill] sm:$0xff] %v6817_v11  ;;  %9273 = vst [vmem:[#allocation274_spill] sm:$0xff] %v6819_v25 }
 0x250   :  { %1405 = vrot.lane.b32.xlu1 %v9146_v62, %s4908_s19  ;;  %1351 = vrot.lane.b32.xlu0 %v9098_v40, %s4908_s19  ;;  %v9278_v40 = vld [vmem:[#allocation121_spill] sm:$0xff] }
 0x252   :  { %v6825_v37 = vpop.permute.xlu1 %1023  ;;  %v6827_v39 = vpop.permute.xlu0 %1021 }
 0x253   :  { %9274 = vst [vmem:[#allocation275_spill] sm:$0xff] %v6825_v37  ;;  %9275 = vst [vmem:[#allocation276_spill] sm:$0xff] %v6827_v39 }
 0x254   :  { %1525 = vrot.lane.b32.xlu1 %v9204_v43, %s4907_s18  ;;  %1233 = vrot.lane.b32.xlu0 %v4790_v22, %s4905_s15  ;;  %v9281_v43 = vld [vmem:[#allocation128_spill] sm:$0xff]  ;;  %v4791_v22 = vld [vmem:[%s8661_s0 + $0x58] sm:$0xff] }
 0x256   :  { %v6835_v11 = vpop.permute.xlu1 %1027  ;;  %v6837_v25 = vpop.permute.xlu0 %1025 }
 0x257   :  { %9276 = vst [vmem:[#allocation277_spill] sm:$0xff] %v6835_v11  ;;  %9277 = vst [vmem:[#allocation278_spill] sm:$0xff] %v6837_v25 }
 0x258   :  { %1407 = vrot.lane.b32.xlu1 %v9151_v34, %s4908_s19  ;;  %1579 = vrot.lane.b32.xlu0 %v9278_v40, %s4907_s18 }
 0x25a   :  { %v6843_v62 = vpop.permute.xlu1 %1031  ;;  %v6845_v37 = vpop.permute.xlu0 %1029 }
 0x25b   :  { %9279 = vst [vmem:[#allocation121_spill] sm:$0xff] %v6843_v62  ;;  %9280 = vst [vmem:[#allocation279_spill] sm:$0xff] %v6845_v37  ;;  %v4792_v37 = vld [vmem:[%s8661_s0 + $0x158] sm:$0xff] }
 0x25c   :  { %1581 = vrot.lane.b32.xlu1 %v9281_v43, %s4907_s18  ;;  %1179 = vrot.lane.b32.xlu0 %v4791_v22, %s4905_s15  ;;  %v4793_v22 = vld [vmem:[%s8661_s0 + $0x60] sm:$0xff] }
 0x25e   :  { %v6853_v11 = vpop.permute.xlu1 %1035  ;;  %v6855_v25 = vpop.permute.xlu0 %1033 }
 0x25f   :  { %9282 = vst [vmem:[#allocation128_spill] sm:$0xff] %v6853_v11  ;;  %9283 = vst [vmem:[#allocation280_spill] sm:$0xff] %v6855_v25 }
 0x260   :  { %1353 = vrot.lane.b32.xlu1 %v9097_v53, %s4908_s19  ;;  %1063 = vrot.lane.b32.xlu0 %v9278_v40, %s4903_s4 }
 0x262   :  { %v6861_v34 = vpop.permute.xlu1 %1039  ;;  %v6863_v62 = vpop.permute.xlu0 %1037 }
 0x263   :  { %9284 = vst [vmem:[#allocation281_spill] sm:$0xff] %v6861_v34  ;;  %9285 = vst [vmem:[#allocation282_spill] sm:$0xff] %v6863_v62 }
 0x264   :  { %1235 = vrot.lane.b32.xlu1 %v4792_v37, %s4905_s15  ;;  %1181 = vrot.lane.b32.xlu0 %v4793_v22, %s4905_s15  ;;  %v4910_v37 = vmov 1983009808  }
 0x265   :  { %v2195_v22 = vunpack.c.l.s4 %v4910_v37 }
 0x266   :  { %v6873_v53 = vpop.permute.xlu1 %1043  ;;  %v6875_v11 = vpop.permute.xlu0 %1041 }
 0x267   :  { %9286 = vst [vmem:[#allocation283_spill] sm:$0xff] %v6873_v53  ;;  %9287 = vst [vmem:[#allocation284_spill] sm:$0xff] %v6875_v11  ;;  %v2197_v53 = vlaneseq  ;;  %v2196_v37 = vunpack.c.0.s8 %v2195_v22  ;;  %v9291_v22 = vld [vmem:[#allocation125_spill] sm:$0xff] }
 0x268   :  { %1065 = vrot.lane.b32.xlu1 %v9281_v43, %s4903_s4  ;;  %1527 = vrot.lane.b32.xlu0 %v9203_v0, %s4907_s18  ;;  %v4794_v0 = vld [vmem:[%s8661_s0 + $0x160] sm:$0xff] }
 0x26a   :  { %v6881_v40 = vpop.permute.xlu1 %1047  ;;  %v6883_v34 = vpop.permute.xlu0 %1045 }
 0x26b   :  { %9288 = vst [vmem:[#allocation285_spill] sm:$0xff] %v6881_v40  ;;  %9289 = vst [vmem:[#allocation286_spill] sm:$0xff] %v6883_v34  ;;  %v2198_v40 = vshrl.u32 %v2197_v53, 7 }
 0x26c   :  { %1409 = vrot.lane.b32.xlu1 %v9150_v9, %s4908_s19  ;;  %1355 = vrot.lane.b32.xlu0 %v9102_v38, %s4908_s19  ;;  %v4795_v9 = vld [vmem:[%s8661_s0] sm:$0xff]  ;;  %v9290_v38 = vld [vmem:[#allocation66_spill] sm:$0xff] }
 0x26d   :  { %v1682_v43 = vsel %vm1681_vm5, %v4795_v9, %v9290_v38  ;;  %v6916_v53 = vsub.s32 %v2196_v37, %v2198_v40  ;;  %v9293_v40 = vld [vmem:[#allocation115_spill] sm:$0xff] }
 0x26e   :  { %v6889_v11 = vpop.permute.xlu1 %1051  ;;  %v1050_v62 = vpop.permute.xlu0 %1049  ;;  %v1739_v34 = vsel %vm1738_vm4, %v1682_v43, %v5975_v1 }
 0x270   :  { %1529 = vrot.lane.b32.xlu1 %v9208_v57, %s4907_s18  ;;  %1237 = vrot.lane.b32.xlu0 %v4794_v0, %s4905_s15  ;;  %v1796_v0 = vsel %vm1795_vm6, %v1739_v34, %v6219_v51 }
 0x271   :  { %v1853_v39 = vsel %vm1852_vm7, %v1796_v0, %v6459_v17 }
 0x272   :  { %v1166_v57 = vpop.permute.xlu1 %1165  ;;  %v6904_v25 = vpop.permute.xlu0 %1053  ;;  %v1910_v1 = vsel %vm1909_vm8, %v1853_v39, %v6757_v50  ;;  %v4796_v39 = vld [vmem:[%s8661_s0 + $0x100] sm:$0xff] }
 0x273   :  { %v1967_v9 = vsel %vm1966_vm9, %v1910_v1, %v1166_v57  ;;  %v1710_v37 = vsel %vm1681_vm5, %v4796_v39, %v9293_v40 }
 0x274   :  { %1411 = vrot.lane.b32.xlu1 %v9155_v7, %s4908_s19  ;;  %1583 = vrot.lane.b32.xlu0 %v9291_v22, %s4907_s18  ;;  %v9292_v7 = vld [vmem:[#allocation132_spill] sm:$0xff]  ;;  %v1767_v1 = vsel %vm1738_vm4, %v1710_v37, %v6097_v60 }
 0x276   :  { %v1514_v51 = vpop.permute.xlu1 %1513  ;;  %v1340_v34 = vpop.permute.xlu0 %1339 }
 0x277   :  { %v2024_v38 = vsel %vm2023_vm10, %v1967_v9, %v1340_v34  ;;  %v4797_v34 = vld [vmem:[%s8661_s0 + $0x168] sm:$0xff] }
 0x278   :  { %v2081_v17 = vsel %vm2080_vm11, %v2024_v38, %v1514_v51  ;;  %1067 = vrot.lane.b32.xlu1 %v9291_v22, %s4903_s4  ;;  %1585 = vrot.lane.b32.xlu0 %v9292_v7, %s4907_s18  ;;  %v1824_v51 = vsel %vm1795_vm6, %v1767_v1, %v6339_v5  ;;  %v4798_v38 = vld [vmem:[%s8661_s0 + $0x68] sm:$0xff] }
 0x279   :  { %v2193_v43 = vcombine.high %v2081_v17, %v2081_v17  ;;  %v2200_v50 = vrot.slane %v2081_v17, %v6916_v53  ;;  %v1881_v60 = vsel %vm1852_vm7, %v1824_v51, %v6591_v55  ;;  %v4800_v51 = vld [vmem:[%s8661_s0 + $0x108] sm:$0xff] }
 0x27a   :  { %v1396_v57 = vpop.permute.xlu1 %1395  ;;  %v1222_v0 = vpop.permute.xlu0 %1221  ;;  %v1938_v39 = vsel %vm1909_vm8, %v1881_v60, %v1050_v62  ;;  %v9295_v60 = vld [vmem:[#allocation114_spill] sm:$0xff] }
 0x27b   :  { %v2207_v22 = vrot.slane %v2193_v43, %v6916_v53  ;;  %v2208_v9 = vcombine.high %v2200_v50, %v2200_v50  ;;  %v1995_v1 = vsel %vm1966_vm9, %v1938_v39, %v1222_v0  ;;  %v9294_v0 = vld [vmem:[#allocation62_spill] sm:$0xff] }
 0x27c   :  { %1239 = vrot.lane.b32.xlu1 %v4797_v34, %s4905_s15  ;;  %1183 = vrot.lane.b32.xlu0 %v4798_v38, %s4905_s15 }
 0x27d   :  { %v2209_v17 = vcombine.high %v2207_v22, %v2207_v22  ;;  %v3129_v43 = vcombine.low %v2200_v50, %v2208_v9  ;;  %v2052_v50 = vsel %vm2023_vm10, %v1995_v1, %v1396_v57  ;;  %v1711_v57 = vsel %vm1681_vm5, %v4800_v51, %v9295_v60 }
 0x27e   :  { %v1224_v5 = vpop.permute.xlu1 %1223  ;;  %v1168_v40 = vpop.permute.xlu0 %1167 }
 0x27f   :  { %v3130_v37 = vcombine.low %v2207_v22, %v2209_v17  ;;  %v3137_v34 = vrot.slane %v3129_v43, %v6916_v53  ;;  %v4801_v43 = vld [vmem:[%s8661_s0 + $0x70] sm:$0xff] }
 0x280   :  { %1413 = vrot.lane.b32.xlu1 %v9154_v45, %s4908_s19  ;;  %1357 = vrot.lane.b32.xlu0 %v9101_v10, %s4908_s19  ;;  %v4799_v45 = vld [vmem:[%s8661_s0 + $0x8] sm:$0xff] }
 0x281   :  { %v3144_v38 = vrot.slane %v3130_v37, %v6916_v53  ;;  %v1683_v10 = vsel %vm1681_vm5, %v4799_v45, %v9294_v0  ;;  %v1768_v37 = vsel %vm1738_vm4, %v1711_v57, %v6095_v49  ;;  %v9298_v57 = vld [vmem:[#allocation65_spill] sm:$0xff] }
 0x282   :  { %v1342_v55 = vpop.permute.xlu1 %1341  ;;  %v1570_v9 = vpop.permute.xlu0 %1569  ;;  %v1740_v39 = vsel %vm1738_vm4, %v1683_v10, %v5973_v21 }
 0x283   :  { %v6956_v62 = vsel %vm2080_vm11, %v2052_v50, %v1570_v9  ;;  %v3145_v22 = vcombine.low %v3137_v34, %v3144_v38  ;;  %v1797_v1 = vsel %vm1795_vm6, %v1740_v39, %v6217_v56  ;;  %v9296_v9 = vmov 0.0  }
 0x284   :  { %v2655_v17 = vcombine.high %v6956_v62, %v6956_v62  ;;  %1531 = vrot.lane.b32.xlu1 %v9207_v26, %s4907_s18  ;;  %1185 = vrot.lane.b32.xlu0 %v4801_v43, %s4905_s15  ;;  %v1825_v26 = vsel %vm1795_vm6, %v1768_v37, %v6337_v58  ;;  %v1854_v21 = vsel %vm1852_vm7, %v1797_v1, %v6457_v19  ;;  %v9297_v58 = vld [vmem:[#allocation129_spill] sm:$0xff] }
 0x285   :  { %4605 = vmatmul.mubr.msk.f32.vlgmr.msra.gmra.mrb[0].mxu0 %vm3962_vm12, %v3145_v22  ;;  %v1882_v49 = vsel %vm1852_vm7, %v1825_v26, %v6589_v2  ;;  %v1911_v22 = vsel %vm1909_vm8, %v1854_v21, %v6755_v3  ;;  %v4804_v21 = vld [vmem:[%s8661_s0 + $0x110] sm:$0xff] }
 0x286   :  { %v2669_v34 = vrot.slane %v2655_v17, %v6916_v53  ;;  %v1170_v38 = vpop.permute.xlu1 %1169  ;;  %v1398_v50 = vpop.permute.xlu0 %1397  ;;  %4607 = vmatprep.mubr.msk.f32.mxu0 %vm4909_vm3, %v9296_v9  ;;  %v1939_v56 = vsel %vm1909_vm8, %v1882_v49, %v6889_v11  ;;  %v1968_v0 = vsel %vm1966_vm9, %v1911_v22, %v1168_v40  ;;  %v9299_v49 = vld [vmem:[#allocation119_spill] sm:$0xff] }
 0x287   :  { %v1996_v45 = vsel %vm1966_vm9, %v1939_v56, %v1224_v5  ;;  %v2025_v19 = vsel %vm2023_vm10, %v1968_v0, %v1342_v55  ;;  %v4803_v55 = vld [vmem:[%s8661_s0 + $0x170] sm:$0xff]  ;;  %v1712_v22 = vsel %vm1681_vm5, %v4804_v21, %v9299_v49 }
 0x288   :  { %1069 = vrot.lane.b32.xlu1 %v9292_v7, %s4903_s4  ;;  %1587 = vrot.lane.b32.xlu0 %v9297_v58, %s4907_s18  ;;  %v2671_v10 = vcombine.high %v2669_v34, %v2669_v34  ;;  %v2053_v2 = vsel %vm2023_vm10, %v1996_v45, %v1398_v50  ;;  %v4802_v7 = vld [vmem:[%s8661_s0 + $0x10] sm:$0xff] }
 0x289   :  { %v1684_v5 = vsel %vm1681_vm5, %v4802_v7, %v9298_v57 }
 0x28a   :  { %v1572_v51 = vpop.permute.xlu1 %1571  ;;  %v1516_v3 = vpop.permute.xlu0 %1515  ;;  %v1741_v17 = vsel %vm1738_vm4, %v1684_v5, %v5983_v23  ;;  %v3554_v37 = vcombine.low %v2669_v34, %v2671_v10  ;;  %v4805_v5 = vld [vmem:[%s8661_s0 + $0x78] sm:$0xff] }
 0x28b   :  { %v2110_v60 = vsel %vm2080_vm11, %v2053_v2, %v1572_v51  ;;  %v2082_v11 = vsel %vm2080_vm11, %v2025_v19, %v1516_v3  ;;  %v1798_v39 = vsel %vm1795_vm6, %v1741_v17, %v6227_v46 }
 0x28c   :  { %v2679_v40 = vrot.slane %v2110_v60, %v6916_v53  ;;  %1241 = vrot.lane.b32.xlu1 %v4803_v55, %s4905_s15  ;;  %v2217_v43 = vrot.slane %v2082_v11, %v6916_v53  ;;  %1359 = vrot.lane.b32.xlu0 %v9106_v41, %s4908_s19  ;;  %v1855_v23 = vsel %vm1852_vm7, %v1798_v39, %v6467_v15 }
 0x28d   :  { %v1769_v41 = vsel %vm1738_vm4, %v1712_v22, %v6105_v4  ;;  %v1912_v46 = vsel %vm1909_vm8, %v1855_v23, %v6770_v24  ;;  %v2210_v56 = vcombine.high %v2082_v11, %v2082_v11  ;;  %v3562_v4 = vrot.slane %v3554_v37, %v6916_v53 }
 0x28e   :  { %v2687_v1 = vcombine.high %v2679_v40, %v2679_v40  ;;  %v1226_v26 = vpop.permute.xlu1 %1225  ;;  %v1344_v50 = vpop.permute.xlu0 %1343  ;;  %v1826_v45 = vsel %vm1795_vm6, %v1769_v41, %v6347_v20  ;;  %v1969_v0 = vsel %vm1966_vm9, %v1912_v46, %v1170_v38  ;;  %v2225_v19 = vcombine.high %v2217_v43, %v2217_v43  ;;  %v4806_v46 = vld [vmem:[%s8661_s0 + $0x18] sm:$0xff] }
 0x28f   :  { %v1883_v15 = vsel %vm1852_vm7, %v1826_v45, %v6604_v27  ;;  %v2026_v10 = vsel %vm2023_vm10, %v1969_v0, %v1344_v50  ;;  %v2672_v51 = vcombine.high %v2110_v60, %v2110_v60  ;;  %v2224_v3 = vrot.slane %v2210_v56, %v6916_v53  ;;  %v9300_v27 = vld [vmem:[#allocation136_spill] sm:$0xff] }
 0x290   :  { %v3555_v34 = vcombine.low %v2679_v40, %v2687_v1  ;;  %1415 = vrot.lane.b32.xlu1 %v9159_v13, %s4908_s19  ;;  %1533 = vrot.lane.b32.xlu0 %v9212_v30, %s4907_s18  ;;  %v1940_v20 = vsel %vm1909_vm8, %v1883_v15, %v6904_v25  ;;  %v3146_v7 = vcombine.low %v2217_v43, %v2225_v19  ;;  %v4808_v19 = vld [vmem:[%s8661_s0 + $0x80] sm:$0xff]  ;;  %v9302_v15 = vld [vmem:[#allocation5_spill] sm:$0xff] }
 0x291   :  { %v1997_v57 = vsel %vm1966_vm9, %v1940_v20, %v1226_v26  ;;  %v2686_v43 = vrot.slane %v2672_v51, %v6916_v53 }
 0x292   :  { %v3569_v24 = vrot.slane %v3555_v34, %v6916_v53  ;;  %v1400_v2 = vpop.permute.xlu1 %1399  ;;  %v1518_v13 = vpop.permute.xlu0 %1517  ;;  %v3154_v26 = vrot.slane %v3146_v7, %v6916_v53  ;;  %v9301_v34 = vld [vmem:[#allocation61_spill] sm:$0xff] }
 0x293   :  { %v2083_v38 = vsel %vm2080_vm11, %v2026_v10, %v1518_v13  ;;  %v2054_v25 = vsel %vm2023_vm10, %v1997_v57, %v1400_v2  ;;  %v9304_v57 = vld [vmem:[#allocation80_spill] sm:$0xff] }
 0x294   :  { %v2233_v30 = vrot.slane %v2083_v38, %v6916_v53  ;;  %1589 = vrot.lane.b32.xlu1 %v9300_v27, %s4907_s18  ;;  %v3570_v11 = vcombine.low %v3562_v4, %v3569_v24  ;;  %1187 = vrot.lane.b32.xlu0 %v4805_v5, %s4905_s15  ;;  %v2226_v56 = vcombine.high %v2083_v38, %v2083_v38 }
 0x296   :  { %v3147_v60 = vcombine.low %v2224_v3, %v2233_v30  ;;  %v1574_v40 = vpop.permute.xlu1 %1573  ;;  %4680 = vmatmul.mubr.msk.f32.vlgmr.msra.gmra.mrb[0].mxu1 %vm3962_vm12, %v3570_v11  ;;  %v1172_v55 = vpop.permute.xlu0 %1171  ;;  %v2240_v51 = vrot.slane %v2226_v56, %v6916_v53  ;;  %v2241_v3 = vcombine.high %v2233_v30, %v2233_v30  ;;  %v9305_v30 = vld [vmem:[#allocation70_spill] sm:$0xff] }
 0x297   :  { %v2111_v17 = vsel %vm2080_vm11, %v2054_v25, %v1574_v40  ;;  %4682 = vmatprep.mubr.msk.f32.mxu1 %vm4909_vm3, %v9296_v9  ;;  %v9311_v56 = vld [vmem:[#allocation118_spill] sm:$0xff] }
 0x298   :  { %v3161_v39 = vrot.slane %v3147_v60, %v6916_v53  ;;  %v2688_v37 = vcombine.high %v2111_v17, %v2111_v17  ;;  %v2695_v1 = vrot.slane %v2111_v17, %v6916_v53  ;;  %1361 = vrot.lane.b32.xlu1 %v9105_v29, %s4908_s19  ;;  %1071 = vrot.lane.b32.xlu0 %v9297_v58, %s4903_s4  ;;  %v4807_v58 = vld [vmem:[%s8661_s0 + $0x178] sm:$0xff] }
 0x299   :  { %v1685_v29 = vsel %vm1681_vm5, %v4806_v46, %v9301_v34  ;;  %v3163_v40 = vcombine.low %v2241_v3, %v2240_v51 }
 0x29a   :  { %v7072_v50 = vrot.slane %v2688_v37, %v6916_v53  ;;  %v2703_v21 = vcombine.high %v2695_v1, %v2695_v1  ;;  %v3571_v49 = vcombine.low %v2686_v43, %v2695_v1  ;;  %v1346_v22 = vpop.permute.xlu1 %1345  ;;  %v7074_v23 = vpop.permute.xlu0 %1055  ;;  %v3162_v41 = vcombine.low %v3154_v26, %v3161_v39  ;;  %v9306_v43 = vld [vmem:[#allocation44_spill] sm:$0xff]  ;;  %v9307_v39 = vld [vmem:[#allocation166_spill] sm:$0xff]  ;;  %v9309_v26 = vld [vmem:[#allocation7_spill] sm:$0xff] }
 0x29b   :  { %v1742_v0 = vsel %vm1738_vm4, %v1685_v29, %v5981_v18  ;;  %v9303_v18 = vld [vmem:[#allocation58_spill] sm:$0xff]  ;;  %v9308_v1 = vld [vmem:[#allocation20_spill] sm:$0xff]  ;;  %v4809_v29 = vld [vmem:[%s8661_s0 + $0x118] sm:$0xff] }
 0x29c   :  { %v3572_v45 = vcombine.low %v2703_v21, %v7072_v50  ;;  %1243 = vrot.lane.b32.xlu1 %v4807_v58, %s4905_s15  ;;  %1189 = vrot.lane.b32.xlu0 %v4808_v19, %s4905_s15  ;;  %v1799_v4 = vsel %vm1795_vm6, %v1742_v0, %v9302_v15  ;;  %v3579_v24 = vrot.slane %v3571_v49, %v6916_v53  ;;  %v9312_v15 = vld [vmem:[#allocation87_spill] sm:$0xff] }
 0x29d   :  { %4608 = vmatmul.mubr.msk.f32.gmra.mrb[2].mxu0 %vm3962_vm12, %v3162_v41  ;;  %v1856_v20 = vsel %vm1852_vm7, %v1799_v4, %v9303_v18  ;;  %v3171_v0 = vrot.slane %v3163_v40, %v6916_v53  ;;  %v9313_v4 = vld [vmem:[#allocation188_spill] sm:$0xff] }
 0x29e   :  { %v3586_v10 = vrot.slane %v3572_v45, %v6916_v53  ;;  %v1228_v2 = vpop.permute.xlu1 %1227  ;;  %v1174_v13 = vpop.permute.xlu0 %1173  ;;  %4610 = vmatprep.mubr.msk.f32.mxu0 %vm4909_vm3, %v9296_v9  ;;  %v1913_v38 = vsel %vm1909_vm8, %v1856_v20, %v6768_v32  ;;  %v1713_v45 = vsel %vm1681_vm5, %v4809_v29, %v9311_v56  ;;  %v4810_v18 = vld [vmem:[%s8661_s0 + $0x180] sm:$0xff]  ;;  %v9314_v20 = vld [vmem:[#allocation69_spill] sm:$0xff] }
 0x29f   :  { %v1970_v7 = vsel %vm1966_vm9, %v1913_v38, %v1172_v55  ;;  %v2242_v55 = vcombine.high %v2240_v51, %v2240_v51  ;;  %v9315_v38 = vld [vmem:[#allocation32_spill] sm:$0xff] }
 0x2a0   :  { %1073 = vrot.lane.b32.xlu1 %v9300_v27, %s4903_s4  ;;  %v3587_v11 = vcombine.low %v3579_v24, %v3586_v10  ;;  %1535 = vrot.lane.b32.xlu0 %v9304_v57, %s4907_s18  ;;  %v2027_v5 = vsel %vm2023_vm10, %v1970_v7, %v1346_v22  ;;  %v1686_v27 = vsel %vm1681_vm5, %v6596_v16, %v9305_v30  ;;  %v9310_v16 = vld [vmem:[#allocation60_spill] sm:$0xff]  ;;  %v9316_v30 = vld [vmem:[#allocation123_spill] sm:$0xff] }
 0x2a1   :  { %v1743_v37 = vsel %vm1738_vm4, %v1686_v27, %v9307_v39  ;;  %v1770_v24 = vsel %vm1738_vm4, %v1713_v45, %v9313_v4 }
 0x2a2   :  { %v1058_v25 = vpop.permute.xlu1 %1057  ;;  %4683 = vmatmul.mubr.msk.f32.gmra.mrb[2].mxu1 %vm3962_vm12, %v3587_v11  ;;  %v1520_v60 = vpop.permute.xlu0 %1519  ;;  %v1800_v21 = vsel %vm1795_vm6, %v1743_v37, %v9309_v26  ;;  %v1827_v51 = vsel %vm1795_vm6, %v1770_v24, %v9315_v38  ;;  %v9322_v26 = vld [vmem:[#allocation34_spill] sm:$0xff] }
 0x2a3   :  { %v2084_v32 = vsel %vm2080_vm11, %v2027_v5, %v1520_v60  ;;  %4685 = vmatprep.mubr.msk.f32.mxu1 %vm4909_vm3, %v9296_v9  ;;  %v1857_v46 = vsel %vm1852_vm7, %v1800_v21, %v9310_v16 }
 0x2a4   :  { %v2250_v17 = vrot.slane %v2084_v32, %v6916_v53  ;;  %1417 = vrot.lane.b32.xlu1 %v9306_v43, %s4908_s19  ;;  %1363 = vrot.lane.b32.xlu0 %v9308_v1, %s4908_s19  ;;  %v2243_v34 = vcombine.high %v2084_v32, %v2084_v32  ;;  %v1914_v58 = vsel %vm1909_vm8, %v1857_v46, %v6778_v42 }
 0x2a5   :  { %v1971_v10 = vsel %vm1966_vm9, %v1914_v58, %v1174_v13  ;;  %v1687_v42 = vsel %vm1681_vm5, %v6646_v31, %v9314_v20  ;;  %v1884_v13 = vsel %vm1852_vm7, %v1827_v51, %v6602_v6  ;;  %v1714_v31 = vsel %vm1681_vm5, %v6628_v8, %v9316_v30  ;;  %v9318_v6 = vld [vmem:[#allocation165_spill] sm:$0xff] }
 0x2a6   :  { %v3164_v49 = vcombine.low %v2242_v55, %v2250_v17  ;;  %v1402_v22 = vpop.permute.xlu1 %1401  ;;  %v1348_v41 = vpop.permute.xlu0 %1347  ;;  %v2257_v5 = vrot.slane %v2243_v34, %v6916_v53  ;;  %v2258_v60 = vcombine.high %v2250_v17, %v2250_v17  ;;  %v1941_v27 = vsel %vm1909_vm8, %v1884_v13, %v7074_v23  ;;  %v9317_v55 = vld [vmem:[#allocation47_spill] sm:$0xff]  ;;  %v9319_v17 = vld [vmem:[#allocation190_spill] sm:$0xff]  ;;  %v9320_v8 = vld [vmem:[#allocation133_spill] sm:$0xff] }
 0x2a7   :  { %v2028_v3 = vsel %vm2023_vm10, %v1971_v10, %v1348_v41  ;;  %v1744_v43 = vsel %vm1738_vm4, %v1687_v42, %v9318_v6  ;;  %v1771_v39 = vsel %vm1738_vm4, %v1714_v31, %v9319_v17  ;;  %v1998_v37 = vsel %vm1966_vm9, %v1941_v27, %v1228_v2  ;;  %v9321_v23 = vld [vmem:[#allocation6_spill] sm:$0xff]  ;;  %v4811_v10 = vld [vmem:[%s8661_s0 + $0x88] sm:$0xff]  ;;  %v9326_v31 = vld [vmem:[#allocation19_spill] sm:$0xff] }
 0x2a8   :  { %v3178_v19 = vrot.slane %v3164_v49, %v6916_v53  ;;  %1537 = vrot.lane.b32.xlu1 %v9312_v15, %s4907_s18  ;;  %1245 = vrot.lane.b32.xlu0 %v4810_v18, %s4905_s15  ;;  %v1801_v1 = vsel %vm1795_vm6, %v1744_v43, %v9321_v23  ;;  %v1828_v21 = vsel %vm1795_vm6, %v1771_v39, %v9322_v26  ;;  %v9323_v15 = vld [vmem:[#allocation140_spill] sm:$0xff] }
 0x2a9   :  { %v2055_v49 = vsel %vm2023_vm10, %v1998_v37, %v1402_v22  ;;  %v1885_v2 = vsel %vm1852_vm7, %v1828_v21, %v6619_v33  ;;  %v3180_v34 = vcombine.low %v2258_v60, %v2257_v5  ;;  %v9324_v22 = vld [vmem:[#allocation59_spill] sm:$0xff]  ;;  %v2704_v33 = vcombine.high %v7072_v50, %v7072_v50  ;;  %v4812_v21 = vld [vmem:[%s8661_s0 + $0x90] sm:$0xff] }
 0x2aa   :  { %v1522_v11 = vpop.permute.xlu1 %1521  ;;  %v1230_v7 = vpop.permute.xlu0 %1229  ;;  %v3179_v57 = vcombine.low %v3171_v0, %v3178_v19  ;;  %v1942_v45 = vsel %vm1909_vm8, %v1885_v2, %v1058_v25  ;;  %v1858_v4 = vsel %vm1852_vm7, %v1801_v1, %v9324_v22 }
 0x2ab   :  { %v2085_v32 = vsel %vm2080_vm11, %v2028_v3, %v1522_v11  ;;  %v1999_v24 = vsel %vm1966_vm9, %v1942_v45, %v1230_v7  ;;  %v3188_v3 = vrot.slane %v3180_v34, %v6916_v53 }
 0x2ac   :  { %v2266_v40 = vrot.slane %v2085_v32, %v6916_v53  ;;  %1419 = vrot.lane.b32.xlu1 %v9317_v55, %s4908_s19  ;;  %4611 = vmatmul.mubr.msk.f32.gmra.mrb[4].mxu0 %vm3962_vm12, %v3179_v57  ;;  %v2259_v29 = vcombine.high %v2085_v32, %v2085_v32  ;;  %v1915_v57 = vsel %vm1909_vm8, %v1858_v4, %v6776_v28  ;;  %v9325_v32 = vld [vmem:[#allocation84_spill] sm:$0xff] }
 0x2ad   :  { %1591 = vrot.lane.b32.xlu0 %v9320_v8, %s4907_s18  ;;  %4613 = vmatprep.mubr.msk.f32.mxu0 %vm4909_vm3, %v9296_v9 }
 0x2ae   :  { %v2274_v41 = vcombine.high %v2266_v40, %v2266_v40  ;;  %v1404_v16 = vpop.permute.xlu1 %1403  ;;  %v1576_v46 = vpop.permute.xlu0 %1575  ;;  %v2273_v11 = vrot.slane %v2259_v29, %v6916_v53 }
 0x2af   :  { %v2112_v56 = vsel %vm2080_vm11, %v2055_v49, %v1576_v46  ;;  %v2056_v18 = vsel %vm2023_vm10, %v1999_v24, %v1404_v16 }
 0x2b0   :  { %v3181_v58 = vcombine.low %v2266_v40, %v2274_v41  ;;  %v2705_v0 = vcombine.high %v2112_v56, %v2112_v56  ;;  %v2712_v19 = vrot.slane %v2112_v56, %v6916_v53  ;;  %1593 = vrot.lane.b32.xlu1 %v9323_v15, %s4907_s18  ;;  %v2275_v39 = vcombine.high %v2273_v11, %v2273_v11 }
 0x2b1   :  { %1191 = vrot.lane.b32.xlu0 %v4811_v10, %s4905_s15 }
 0x2b2   :  { %v3195_v25 = vrot.slane %v3181_v58, %v6916_v53  ;;  %v2719_v20 = vrot.slane %v2705_v0, %v6916_v53  ;;  %v2720_v42 = vcombine.high %v2712_v19, %v2712_v19  ;;  %v1578_v38 = vpop.permute.xlu1 %1577  ;;  %v1176_v51 = vpop.permute.xlu0 %1175  ;;  %v3588_v50 = vcombine.low %v2704_v33, %v2712_v19  ;;  %v4813_v58 = vld [vmem:[%s8661_s0 + $0x188] sm:$0xff]  ;;  %v9327_v33 = vld [vmem:[#allocation74_spill] sm:$0xff] }
 0x2b3   :  { %v2113_v7 = vsel %vm2080_vm11, %v2056_v18, %v1578_v38  ;;  %v1972_v30 = vsel %vm1966_vm9, %v1915_v57, %v1176_v51  ;;  %v3197_v34 = vcombine.low %v2273_v11, %v2275_v39  ;;  %v1688_v10 = vsel %vm1681_vm5, %v6665_v52, %v9327_v33  ;;  %v9331_v38 = vld [vmem:[#allocation9_spill] sm:$0xff]  ;;  %v9332_v11 = vld [vmem:[#allocation64_spill] sm:$0xff] }
 0x2b4   :  { %v3589_v13 = vcombine.low %v2720_v42, %v2719_v20  ;;  %v2721_v5 = vcombine.high %v2113_v7, %v2113_v7  ;;  %v2728_v60 = vrot.slane %v2113_v7, %v6916_v53  ;;  %1539 = vrot.lane.b32.xlu1 %v9325_v32, %s4907_s18  ;;  %v3196_v27 = vcombine.low %v3188_v3, %v3195_v25  ;;  %v9329_v25 = vld [vmem:[#allocation168_spill] sm:$0xff]  ;;  %v9330_v20 = vld [vmem:[#allocation22_spill] sm:$0xff]  ;;  %v9335_v32 = vld [vmem:[#allocation189_spill] sm:$0xff] }
 0x2b5   :  { %1365 = vrot.lane.b32.xlu0 %v9326_v31, %s4908_s19  ;;  %v3596_v40 = vrot.slane %v3588_v50, %v6916_v53  ;;  %v3205_v4 = vrot.slane %v3197_v34, %v6916_v53  ;;  %v1745_v18 = vsel %vm1738_vm4, %v1688_v10, %v9329_v25  ;;  %v9333_v7 = vld [vmem:[#allocation122_spill] sm:$0xff]  ;;  %v9341_v34 = vld [vmem:[#allocation137_spill] sm:$0xff]  ;;  %v9342_v10 = vld [vmem:[#allocation144_spill] sm:$0xff] }
 0x2b6   :  { %v3603_v55 = vrot.slane %v3589_v13, %v6916_v53  ;;  %v2735_v6 = vrot.slane %v2721_v5, %v6916_v53  ;;  %v2736_v28 = vcombine.high %v2728_v60, %v2728_v60  ;;  %v1524_v43 = vpop.permute.xlu1 %1523  ;;  %v1350_v17 = vpop.permute.xlu0 %1349  ;;  %4614 = vmatmul.mubr.msk.f32.gmra.mrb[6].mxu0 %vm3962_vm12, %v3196_v27  ;;  %v1802_v51 = vsel %vm1795_vm6, %v1745_v18, %v9331_v38  ;;  %v4814_v27 = vld [vmem:[%s8661_s0 + $0x190] sm:$0xff]  ;;  %v4815_v25 = vld [vmem:[%s8661_s0 + $0x98] sm:$0xff] }
 0x2b7   :  { %v2029_v37 = vsel %vm2023_vm10, %v1972_v30, %v1350_v17  ;;  %4616 = vmatprep.mubr.msk.f32.mxu0 %vm4909_vm3, %v9296_v9  ;;  %v1859_v50 = vsel %vm1852_vm7, %v1802_v51, %v9332_v11  ;;  %v1715_v57 = vsel %vm1681_vm5, %v6639_v59, %v9333_v7  ;;  %v9336_v59 = vld [vmem:[#allocation127_spill] sm:$0xff]  ;;  %v9338_v17 = vld [vmem:[#allocation192_spill] sm:$0xff] }
 0x2b8   :  { %v2737_v23 = vcombine.high %v2735_v6, %v2735_v6  ;;  %v3605_v1 = vcombine.low %v2728_v60, %v2736_v28  ;;  %v2086_v26 = vsel %vm2080_vm11, %v2029_v37, %v1524_v43  ;;  %1193 = vrot.lane.b32.xlu1 %v4812_v21, %s4905_s15  ;;  %v3604_v49 = vcombine.low %v3596_v40, %v3603_v55  ;;  %v9334_v60 = vld [vmem:[#allocation91_spill] sm:$0xff]  ;;  %v9337_v40 = vld [vmem:[#allocation33_spill] sm:$0xff] }
 0x2b9   :  { %v2283_v41 = vrot.slane %v2086_v26, %v6916_v53  ;;  %1075 = vrot.lane.b32.xlu0 %v9320_v8, %s4903_s4  ;;  %v1916_v13 = vsel %vm1909_vm8, %v1859_v50, %v6788_v61  ;;  %v2276_v5 = vcombine.high %v2086_v26, %v2086_v26  ;;  %v1772_v30 = vsel %vm1738_vm4, %v1715_v57, %v9335_v32  ;;  %v9343_v50 = vld [vmem:[#allocation21_spill] sm:$0xff] }
 0x2ba   :  { %v3606_v16 = vcombine.low %v2735_v6, %v2737_v23  ;;  %v1178_v46 = vpop.permute.xlu1 %1177  ;;  %4686 = vmatmul.mubr.msk.f32.gmra.mrb[4].mxu1 %vm3962_vm12, %v3604_v49  ;;  %v1060_v2 = vpop.permute.xlu0 %1059  ;;  %v3613_v56 = vrot.slane %v3605_v1, %v6916_v53  ;;  %v1716_v61 = vsel %vm1681_vm5, %v6686_v36, %v9336_v59  ;;  %v1829_v55 = vsel %vm1795_vm6, %v1772_v30, %v9337_v40  ;;  %v9339_v49 = vld [vmem:[#allocation49_spill] sm:$0xff]  ;;  %v9345_v59 = vld [vmem:[#allocation167_spill] sm:$0xff]  ;;  %v4817_v40 = vld [vmem:[%s8661_s0 + $0xa0] sm:$0xff] }
 0x2bb   :  { %v2291_v29 = vcombine.high %v2283_v41, %v2283_v41  ;;  %4688 = vmatprep.mubr.msk.f32.mxu1 %vm4909_vm3, %v9296_v9  ;;  %v1973_v31 = vsel %vm1966_vm9, %v1916_v13, %v1178_v46  ;;  %v1773_v39 = vsel %vm1738_vm4, %v1716_v61, %v9338_v17  ;;  %v1886_v37 = vsel %vm1852_vm7, %v1829_v55, %v6617_v44  ;;  %v9347_v17 = vld [vmem:[#allocation63_spill] sm:$0xff] }
 0x2bc   :  { %v3620_v45 = vrot.slane %v3606_v16, %v6916_v53  ;;  %1077 = vrot.lane.b32.xlu1 %v9323_v15, %s4903_s4  ;;  %v9328_v15 = vld [vmem:[#allocation46_spill] sm:$0xff]  ;;  %v1943_v1 = vsel %vm1909_vm8, %v1886_v37, %v1060_v2  ;;  %v2290_v26 = vrot.slane %v2276_v5, %v6916_v53 }
 0x2bd   :  { %v3198_v8 = vcombine.low %v2283_v41, %v2291_v29  ;;  %1247 = vrot.lane.b32.xlu0 %v4813_v58, %s4905_s15  ;;  %v9340_v41 = vld [vmem:[#allocation36_spill] sm:$0xff] }
 0x2be   :  { %v1062_v0 = vpop.permute.xlu1 %1061  ;;  %v1232_v19 = vpop.permute.xlu0 %1231  ;;  %v3621_v22 = vcombine.low %v3613_v56, %v3620_v45  ;;  %v1830_v16 = vsel %vm1795_vm6, %v1773_v39, %v9340_v41  ;;  %v9350_v41 = vld [vmem:[#allocation268_spill] sm:$0xff] }
 0x2bf   :  { %v3212_v24 = vrot.slane %v3198_v8, %v6916_v53  ;;  %v2000_v46 = vsel %vm1966_vm9, %v1943_v1, %v1232_v19  ;;  %v1887_v58 = vsel %vm1852_vm7, %v1830_v16, %v6634_v48  ;;  %v9348_v1 = vld [vmem:[#allocation88_spill] sm:$0xff] }
 0x2c0   :  { %1421 = vrot.lane.b32.xlu1 %v9328_v15, %s4908_s19  ;;  %4689 = vmatmul.mubr.msk.f32.gmra.mrb[6].mxu1 %vm3962_vm12, %v3621_v22 }
 0x2c1   :  { %1367 = vrot.lane.b32.xlu0 %v9330_v20, %s4908_s19  ;;  %v3213_v42 = vcombine.low %v3205_v4, %v3212_v24  ;;  %4691 = vmatprep.mubr.msk.f32.mxu1 %vm4909_vm3, %v9296_v9  ;;  %v1944_v4 = vsel %vm1909_vm8, %v1887_v58, %v1062_v0  ;;  %v9354_v58 = vld [vmem:[#allocation11_spill] sm:$0xff] }
 0x2c2   :  { %v1406_v3 = vpop.permute.xlu1 %1405  ;;  %v1352_v52 = vpop.permute.xlu0 %1351 }
 0x2c3   :  { %4617 = vmatmul.mubr.msk.f32.gmra.mrb[8].mxu0 %vm3962_vm12, %v3213_v42  ;;  %v2030_v6 = vsel %vm2023_vm10, %v1973_v31, %v1352_v52  ;;  %v2057_v44 = vsel %vm2023_vm10, %v2000_v46, %v1406_v3 }
 0x2c4   :  { %1541 = vrot.lane.b32.xlu1 %v9334_v60, %s4907_s18  ;;  %4619 = vmatprep.mubr.msk.f32.mxu0 %vm4909_vm3, %v9296_v9  ;;  %v9344_v60 = vld [vmem:[#allocation73_spill] sm:$0xff] }
 0x2c5   :  { %1249 = vrot.lane.b32.xlu0 %v4814_v27, %s4905_s15  ;;  %v1689_v32 = vsel %vm1681_vm5, %v6709_v54, %v9344_v60  ;;  %v4816_v27 = vld [vmem:[%s8661_s0 + $0x198] sm:$0xff]  ;;  %v9346_v54 = vld [vmem:[#allocation8_spill] sm:$0xff] }
 0x2c6   :  { %v1526_v28 = vpop.permute.xlu1 %1525  ;;  %v1234_v43 = vpop.permute.xlu0 %1233  ;;  %v1746_v61 = vsel %vm1738_vm4, %v1689_v32, %v9345_v59  ;;  %v9362_v60 = vld [vmem:[#allocation35_spill] sm:$0xff] }
 0x2c7   :  { %v2087_v23 = vsel %vm2080_vm11, %v2030_v6, %v1526_v28  ;;  %v2001_v15 = vsel %vm1966_vm9, %v1944_v4, %v1234_v43  ;;  %v1803_v55 = vsel %vm1795_vm6, %v1746_v61, %v9346_v54  ;;  %v9364_v54 = vld [vmem:[#allocation112_spill] sm:$0xff] }
 0x2c8   :  { %v2292_v36 = vcombine.high %v2087_v23, %v2087_v23  ;;  %v2299_v21 = vrot.slane %v2087_v23, %v6916_v53  ;;  %1423 = vrot.lane.b32.xlu1 %v9339_v49, %s4908_s19  ;;  %v1860_v39 = vsel %vm1852_vm7, %v1803_v55, %v9347_v17 }
 0x2c9   :  { %1595 = vrot.lane.b32.xlu0 %v9341_v34, %s4907_s18  ;;  %v1917_v37 = vsel %vm1909_vm8, %v1860_v39, %v6786_v12  ;;  %v9349_v12 = vld [vmem:[#allocation78_spill] sm:$0xff] }
 0x2ca   :  { %v7293_v2 = vrot.slane %v2292_v36, %v6916_v53  ;;  %v2307_v29 = vcombine.high %v2299_v21, %v2299_v21  ;;  %v3214_v56 = vcombine.low %v2290_v26, %v2299_v21  ;;  %v1408_v45 = vpop.permute.xlu1 %1407  ;;  %v1580_v8 = vpop.permute.xlu0 %1579  ;;  %v1690_v16 = vsel %vm1681_vm5, %v9350_v41, %v9349_v12  ;;  %v9367_v41 = vld [vmem:[#allocation141_spill] sm:$0xff] }
 0x2cb   :  { %v2114_v22 = vsel %vm2080_vm11, %v2057_v44, %v1580_v8  ;;  %v2058_v18 = vsel %vm2023_vm10, %v2001_v15, %v1408_v45  ;;  %v9353_v8 = vld [vmem:[#allocation24_spill] sm:$0xff] }
 0x2cc   :  { %v3215_v19 = vcombine.low %v2307_v29, %v7293_v2  ;;  %v2738_v24 = vcombine.high %v2114_v22, %v2114_v22  ;;  %v2745_v33 = vrot.slane %v2114_v22, %v6916_v53  ;;  %1597 = vrot.lane.b32.xlu1 %v9342_v10, %s4907_s18  ;;  %v3222_v48 = vrot.slane %v3214_v56, %v6916_v53  ;;  %v9351_v29 = vld [vmem:[#allocation48_spill] sm:$0xff]  ;;  %v9352_v56 = vld [vmem:[#allocation170_spill] sm:$0xff] }
 0x2cd   :  { %1195 = vrot.lane.b32.xlu0 %v4815_v25, %s4905_s15  ;;  %v2308_v46 = vcombine.high %v7293_v2, %v7293_v2  ;;  %v1747_v45 = vsel %vm1738_vm4, %v1690_v16, %v9352_v56  ;;  %v9356_v25 = vld [vmem:[#allocation126_spill] sm:$0xff] }
 0x2ce   :  { %v3229_v0 = vrot.slane %v3215_v19, %v6916_v53  ;;  %v2753_v20 = vcombine.high %v2745_v33, %v2745_v33  ;;  %v1582_v42 = vpop.permute.xlu1 %1581  ;;  %v1180_v38 = vpop.permute.xlu0 %1179  ;;  %v2752_v3 = vrot.slane %v2738_v24, %v6916_v53  ;;  %v1804_v22 = vsel %vm1795_vm6, %v1747_v45, %v9354_v58 }
 0x2cf   :  { %v7312_v51 = vsel %vm2080_vm11, %v2058_v18, %v1582_v42  ;;  %v1974_v23 = vsel %vm1966_vm9, %v1917_v37, %v1180_v38  ;;  %v9358_v42 = vld [vmem:[#allocation95_spill] sm:$0xff] }
 0x2d0   :  { %v3622_v52 = vcombine.low %v2745_v33, %v2753_v20  ;;  %v7317_v11 = vrot.slane %v7312_v51, %v6916_v53  ;;  %1369 = vrot.lane.b32.xlu1 %v9343_v50, %s4908_s19  ;;  %v3230_v7 = vcombine.low %v3222_v48, %v3229_v0  ;;  %v9357_v48 = vld [vmem:[#allocation267_spill] sm:$0xff] }
 0x2d1   :  { %1079 = vrot.lane.b32.xlu0 %v9341_v34, %s4903_s4  ;;  %v1717_v0 = vsel %vm1681_vm5, %v9357_v48, %v9356_v25  ;;  %v9359_v38 = vld [vmem:[#allocation131_spill] sm:$0xff] }
 0x2d2   :  { %v3623_v57 = vcombine.low %v2752_v3, %v7317_v11  ;;  %v1354_v13 = vpop.permute.xlu1 %1353  ;;  %4620 = vmatmul.mubr.msk.f32.gmra.mrb[10].mxu0 %vm3962_vm12, %v3230_v7  ;;  %v1064_v5 = vpop.permute.xlu0 %1063  ;;  %v3630_v30 = vrot.slane %v3622_v52, %v6916_v53  ;;  %v9360_v3 = vld [vmem:[#allocation273_spill] sm:$0xff]  ;;  %v9361_v50 = vld [vmem:[#allocation191_spill] sm:$0xff] }
 0x2d3   :  { %4622 = vmatprep.mubr.msk.f32.mxu0 %vm4909_vm3, %v9296_v9  ;;  %v2031_v26 = vsel %vm2023_vm10, %v1974_v23, %v1354_v13  ;;  %v1718_v52 = vsel %vm1681_vm5, %v9360_v3, %v9359_v38  ;;  %v1774_v7 = vsel %vm1738_vm4, %v1717_v0, %v9361_v50  ;;  %v9365_v37 = vld [vmem:[#allocation51_spill] sm:$0xff]  ;;  %v4819_v3 = vld [vmem:[%s8661_s0 + $0x1a8] sm:$0xff] }
 0x2d4   :  { %v3637_v31 = vrot.slane %v3623_v57, %v6916_v53  ;;  %1251 = vrot.lane.b32.xlu1 %v4816_v27, %s4905_s15  ;;  %v2754_v57 = vcombine.high %v7312_v51, %v7312_v51  ;;  %v1831_v32 = vsel %vm1795_vm6, %v1774_v7, %v9362_v60  ;;  %v9363_v51 = vld [vmem:[#allocation194_spill] sm:$0xff]  ;;  %v4820_v7 = vld [vmem:[%s8661_s0 + $0xa8] sm:$0xff] }
 0x2d5   :  { %1197 = vrot.lane.b32.xlu0 %v4817_v40, %s4905_s15  ;;  %v1775_v40 = vsel %vm1738_vm4, %v1718_v52, %v9363_v51  ;;  %v1888_v55 = vsel %vm1852_vm7, %v1831_v32, %v9364_v54 }
 0x2d6   :  { %v1236_v6 = vpop.permute.xlu1 %1235  ;;  %v1182_v28 = vpop.permute.xlu0 %1181  ;;  %v3638_v43 = vcombine.low %v3630_v30, %v3637_v31 }
 0x2d8   :  { %1081 = vrot.lane.b32.xlu1 %v9342_v10, %s4903_s4  ;;  %4692 = vmatmul.mubr.msk.f32.gmra.mrb[8].mxu1 %vm3962_vm12, %v3638_v43  ;;  %v9355_v10 = vld [vmem:[#allocation68_spill] sm:$0xff]  ;;  %v1945_v43 = vsel %vm1909_vm8, %v1888_v55, %v1064_v5  ;;  %v9368_v5 = vld [vmem:[#allocation254_spill] sm:$0xff] }
 0x2d9   :  { %1543 = vrot.lane.b32.xlu0 %v9348_v1, %s4907_s18  ;;  %4694 = vmatprep.mubr.msk.f32.mxu1 %vm4909_vm3, %v9296_v9  ;;  %v1861_v15 = vsel %vm1852_vm7, %v1804_v22, %v9355_v10  ;;  %v9366_v1 = vld [vmem:[#allocation38_spill] sm:$0xff]  ;;  %v2002_v12 = vsel %vm1966_vm9, %v1945_v43, %v1236_v6  ;;  %v9372_v43 = vld [vmem:[#allocation77_spill] sm:$0xff] }
 0x2da   :  { %v1066_v36 = vpop.permute.xlu1 %1065  ;;  %v1528_v21 = vpop.permute.xlu0 %1527  ;;  %v1918_v18 = vsel %vm1909_vm8, %v1861_v15, %v6796_v63  ;;  %v4818_v63 = vld [vmem:[%s8661_s0 + $0x1a0] sm:$0xff] }
 0x2db   :  { %v2088_v49 = vsel %vm2080_vm11, %v2031_v26, %v1528_v21  ;;  %v1975_v13 = vsel %vm1966_vm9, %v1918_v18, %v1182_v28  ;;  %v1832_v26 = vsel %vm1795_vm6, %v1775_v40, %v9366_v1  ;;  %v2768_v21 = vrot.slane %v2754_v57, %v6916_v53 }
 0x2dc   :  { %v2309_v34 = vcombine.high %v2088_v49, %v2088_v49  ;;  %v2316_v44 = vrot.slane %v2088_v49, %v6916_v53  ;;  %1425 = vrot.lane.b32.xlu1 %v9351_v29, %s4908_s19  ;;  %v2769_v49 = vcombine.high %v7317_v11, %v7317_v11  ;;  %v1889_v16 = vsel %vm1852_vm7, %v1832_v26, %v9368_v5  ;;  %v9375_v26 = vld [vmem:[#allocation92_spill] sm:$0xff] }
 0x2dd   :  { %1371 = vrot.lane.b32.xlu0 %v9353_v8, %s4908_s19  ;;  %v1946_v45 = vsel %vm1909_vm8, %v1889_v16, %v1066_v36  ;;  %v4822_v16 = vld [vmem:[%s8661_s0 + $0xb0] sm:$0xff] }
 0x2de   :  { %v2323_v4 = vrot.slane %v2309_v34, %v6916_v53  ;;  %v2324_v19 = vcombine.high %v2316_v44, %v2316_v44  ;;  %v3231_v24 = vcombine.low %v2308_v46, %v2316_v44  ;;  %v1410_v2 = vpop.permute.xlu1 %1409  ;;  %v1356_v33 = vpop.permute.xlu0 %1355 }
 0x2df   :  { %v2032_v27 = vsel %vm2023_vm10, %v1975_v13, %v1356_v33  ;;  %v2059_v46 = vsel %vm2023_vm10, %v2002_v12, %v1410_v2  ;;  %v9369_v2 = vld [vmem:[#allocation148_spill] sm:$0xff] }
 0x2e0   :  { %v3232_v20 = vcombine.low %v2324_v19, %v2323_v4  ;;  %1545 = vrot.lane.b32.xlu1 %v9358_v42, %s4907_s18  ;;  %v3239_v30 = vrot.slane %v3231_v24, %v6916_v53  ;;  %v3639_v4 = vcombine.low %v2769_v49, %v2768_v21  ;;  %v2770_v24 = vcombine.high %v2768_v21, %v2768_v21  ;;  %v9376_v49 = vld [vmem:[#allocation193_spill] sm:$0xff] }
 0x2e1   :  { %1253 = vrot.lane.b32.xlu0 %v4818_v63, %s4905_s15 }
 0x2e2   :  { %v3246_v31 = vrot.slane %v3232_v20, %v6916_v53  ;;  %v1530_v59 = vpop.permute.xlu1 %1529  ;;  %v1238_v61 = vpop.permute.xlu0 %1237  ;;  %v3647_v52 = vrot.slane %v3639_v4, %v6916_v53 }
 0x2e3   :  { %v2089_v28 = vsel %vm2080_vm11, %v2032_v27, %v1530_v59  ;;  %v2003_v19 = vsel %vm1966_vm9, %v1946_v45, %v1238_v61  ;;  %v9370_v27 = vld [vmem:[#allocation50_spill] sm:$0xff]  ;;  %v9371_v59 = vld [vmem:[#allocation23_spill] sm:$0xff] }
 0x2e4   :  { %v2325_v17 = vcombine.high %v2089_v28, %v2089_v28  ;;  %v2332_v39 = vrot.slane %v2089_v28, %v6916_v53  ;;  %1427 = vrot.lane.b32.xlu1 %v9365_v37, %s4908_s19  ;;  %v3247_v23 = vcombine.low %v3239_v30, %v3246_v31  ;;  %v4821_v28 = vld [vmem:[%s8661_s0 + $0x48] sm:$0xff] }
 0x2e5   :  { %1599 = vrot.lane.b32.xlu0 %v9367_v41, %s4907_s18 }
 0x2e6   :  { %v2339_v34 = vrot.slane %v2325_v17, %v6916_v53  ;;  %v2340_v44 = vcombine.high %v2332_v39, %v2332_v39  ;;  %v1412_v29 = vpop.permute.xlu1 %1411  ;;  %4623 = vmatmul.mubr.msk.f32.gmra.mrb[12].mxu0 %vm3962_vm12, %v3247_v23  ;;  %v1584_v56 = vpop.permute.xlu0 %1583  ;;  %v1691_v17 = vsel %vm1681_vm5, %v4821_v28, %v9372_v43  ;;  %v9374_v23 = vld [vmem:[#allocation169_spill] sm:$0xff] }
 0x2e7   :  { %v2116_v11 = vsel %vm2080_vm11, %v2059_v46, %v1584_v56  ;;  %4625 = vmatprep.mubr.msk.f32.mxu0 %vm4909_vm3, %v9296_v9  ;;  %v2060_v33 = vsel %vm2023_vm10, %v2003_v19, %v1412_v29  ;;  %v1748_v1 = vsel %vm1738_vm4, %v1691_v17, %v9374_v23  ;;  %v9390_v17 = vld [vmem:[#allocation99_spill] sm:$0xff] }
 0x2e8   :  { %v2341_v6 = vcombine.high %v2339_v34, %v2339_v34  ;;  %v3248_v8 = vcombine.low %v2332_v39, %v2340_v44  ;;  %v2771_v58 = vcombine.high %v2116_v11, %v2116_v11  ;;  %v2778_v22 = vrot.slane %v2116_v11, %v6916_v53  ;;  %1083 = vrot.lane.b32.xlu1 %v9367_v41, %s4903_s4  ;;  %v9373_v39 = vld [vmem:[#allocation130_spill] sm:$0xff]  ;;  %v9380_v11 = vld [vmem:[#allocation116_spill] sm:$0xff] }
 0x2e9   :  { %1601 = vrot.lane.b32.xlu0 %v9369_v2, %s4907_s18  ;;  %v1719_v37 = vsel %vm1681_vm5, %v6813_v47, %v9373_v39  ;;  %v9377_v41 = vld [vmem:[#allocation10_spill] sm:$0xff]  ;;  %v9378_v47 = vld [vmem:[#allocation37_spill] sm:$0xff]  ;;  %v9391_v39 = vld [vmem:[#allocation40_spill] sm:$0xff] }
 0x2ea   :  { %v3249_v36 = vcombine.low %v2339_v34, %v2341_v6  ;;  %v2785_v10 = vrot.slane %v2771_v58, %v6916_v53  ;;  %v2786_v15 = vcombine.high %v2778_v22, %v2778_v22  ;;  %v1068_v25 = vpop.permute.xlu1 %1067  ;;  %v1586_v48 = vpop.permute.xlu0 %1585  ;;  %v3640_v0 = vcombine.low %v2770_v24, %v2778_v22  ;;  %v9379_v34 = vld [vmem:[#allocation67_spill] sm:$0xff]  ;;  %v9381_v24 = vld [vmem:[#allocation145_spill] sm:$0xff] }
 0x2eb   :  { %v2117_v18 = vsel %vm2080_vm11, %v2060_v33, %v1586_v48  ;;  %v3256_v20 = vrot.slane %v3248_v8, %v6916_v53  ;;  %v1776_v12 = vsel %vm1738_vm4, %v1719_v37, %v9376_v49  ;;  %v1805_v5 = vsel %vm1795_vm6, %v1748_v1, %v9377_v41  ;;  %v9392_v49 = vld [vmem:[#allocation256_spill] sm:$0xff] }
 0x2ec   :  { %v3263_v42 = vrot.slane %v3249_v36, %v6916_v53  ;;  %v2794_v38 = vrot.slane %v2117_v18, %v6916_v53  ;;  %1255 = vrot.lane.b32.xlu1 %v4819_v3, %s4905_s15  ;;  %v3654_v50 = vrot.slane %v3640_v0, %v6916_v53  ;;  %v3656_v57 = vcombine.low %v2786_v15, %v2785_v10  ;;  %v4824_v0 = vld [vmem:[%s8661_s0 + $0x50] sm:$0xff]  ;;  %v9384_v3 = vld [vmem:[#allocation172_spill] sm:$0xff] }
 0x2ed   :  { %1199 = vrot.lane.b32.xlu0 %v4820_v7, %s4905_s15  ;;  %v2787_v51 = vcombine.high %v2117_v18, %v2117_v18  ;;  %v1833_v46 = vsel %vm1795_vm6, %v1776_v12, %v9378_v47  ;;  %v1862_v44 = vsel %vm1852_vm7, %v1805_v5, %v9379_v34  ;;  %v9382_v18 = vld [vmem:[#allocation82_spill] sm:$0xff] }
 0x2ee   :  { %v2802_v13 = vcombine.high %v2794_v38, %v2794_v38  ;;  %v1240_v63 = vpop.permute.xlu1 %1239  ;;  %v1184_v60 = vpop.permute.xlu0 %1183  ;;  %v3264_v32 = vcombine.low %v3256_v20, %v3263_v42  ;;  %v3655_v30 = vcombine.low %v3647_v52, %v3654_v50  ;;  %v3664_v61 = vrot.slane %v3656_v57, %v6916_v53 }
 0x2ef   :  { %v2801_v29 = vrot.slane %v2787_v51, %v6916_v53  ;;  %v1890_v6 = vsel %vm1852_vm7, %v1833_v46, %v9380_v11  ;;  %v1919_v8 = vsel %vm1909_vm8, %v1862_v44, %v6794_v14  ;;  %v1692_v20 = vsel %vm1681_vm5, %v4824_v0, %v9382_v18  ;;  %v9388_v51 = vld [vmem:[#allocation53_spill] sm:$0xff]  ;;  %v9393_v46 = vld [vmem:[#allocation152_spill] sm:$0xff]  ;;  %v4826_v11 = vld [vmem:[%s8661_s0 + $0xb8] sm:$0xff] }
 0x2f0   :  { %v3657_v31 = vcombine.low %v2794_v38, %v2802_v13  ;;  %1429 = vrot.lane.b32.xlu1 %v9370_v27, %s4908_s19  ;;  %4626 = vmatmul.mubr.msk.f32.gmra.mrb[14].mxu0 %vm3962_vm12, %v3264_v32  ;;  %v1947_v58 = vsel %vm1909_vm8, %v1890_v6, %v1068_v25  ;;  %v1976_v22 = vsel %vm1966_vm9, %v1919_v8, %v1184_v60  ;;  %v9383_v38 = vld [vmem:[#allocation26_spill] sm:$0xff]  ;;  %v9385_v13 = vld [vmem:[#allocation13_spill] sm:$0xff]  ;;  %v9387_v27 = vld [vmem:[#allocation72_spill] sm:$0xff] }
 0x2f1   :  { %1373 = vrot.lane.b32.xlu0 %v9371_v59, %s4908_s19  ;;  %4695 = vmatmul.mubr.msk.f32.gmra.mrb[10].mxu1 %vm3962_vm12, %v3655_v30  ;;  %v2004_v4 = vsel %vm1966_vm9, %v1947_v58, %v1240_v63  ;;  %v2803_v36 = vcombine.high %v2801_v29, %v2801_v29  ;;  %v1749_v52 = vsel %vm1738_vm4, %v1692_v20, %v9384_v3  ;;  %v4825_v32 = vld [vmem:[%s8661_s0 + $0x150] sm:$0xff]  ;;  %v9386_v30 = vld [vmem:[#allocation135_spill] sm:$0xff]  ;;  %v9395_v3 = vld [vmem:[#allocation81_spill] sm:$0xff] }
 0x2f2   :  { %v3671_v40 = vrot.slane %v3657_v31, %v6916_v53  ;;  %v1414_v54 = vpop.permute.xlu1 %1413  ;;  %v1358_v55 = vpop.permute.xlu0 %1357  ;;  %4697 = vmatprep.mubr.msk.f32.mxu1 %vm4909_vm3, %v9296_v9  ;;  %4628 = vmatprep.mubr.msk.f32.mxu0 %vm4909_vm3, %v9296_v9  ;;  %v1806_v63 = vsel %vm1795_vm6, %v1749_v52, %v9385_v13  ;;  %v1720_v31 = vsel %vm1681_vm5, %v4825_v32, %v9386_v30  ;;  %v9397_v30 = vld [vmem:[#allocation12_spill] sm:$0xff] }
 0x2f3   :  { %v2033_v19 = vsel %vm2023_vm10, %v1976_v22, %v1358_v55  ;;  %v2061_v14 = vsel %vm2023_vm10, %v2004_v4, %v1414_v54  ;;  %v3673_v50 = vcombine.low %v2801_v29, %v2803_v36  ;;  %v1863_v59 = vsel %vm1852_vm7, %v1806_v63, %v9387_v27 }
 0x2f4   :  { %1547 = vrot.lane.b32.xlu1 %v9375_v26, %s4907_s18  ;;  %v3672_v21 = vcombine.low %v3664_v61, %v3671_v40  ;;  %v9389_v40 = vld [vmem:[#allocation196_spill] sm:$0xff]  ;;  %v1920_v55 = vsel %vm1909_vm8, %v1863_v59, %v6806_v35  ;;  %v9398_v59 = vld [vmem:[#allocation71_spill] sm:$0xff] }
 0x2f5   :  { %1201 = vrot.lane.b32.xlu0 %v4822_v16, %s4905_s15  ;;  %v1777_v54 = vsel %vm1738_vm4, %v1720_v31, %v9389_v40  ;;  %v3681_v23 = vrot.slane %v3673_v50, %v6916_v53  ;;  %v9399_v40 = vld [vmem:[#allocation117_spill] sm:$0xff] }
 0x2f6   :  { %v1532_v56 = vpop.permute.xlu1 %1531  ;;  %4698 = vmatmul.mubr.msk.f32.gmra.mrb[12].mxu1 %vm3962_vm12, %v3672_v21  ;;  %v1186_v45 = vpop.permute.xlu0 %1185  ;;  %v1834_v37 = vsel %vm1795_vm6, %v1777_v54, %v9391_v39 }
 0x2f7   :  { %4700 = vmatprep.mubr.msk.f32.mxu1 %vm4909_vm3, %v9296_v9  ;;  %v2090_v33 = vsel %vm2080_vm11, %v2033_v19, %v1532_v56  ;;  %v1977_v1 = vsel %vm1966_vm9, %v1920_v55, %v1186_v45  ;;  %v1891_v12 = vsel %vm1852_vm7, %v1834_v37, %v9392_v49 }
 0x2f8   :  { %1085 = vrot.lane.b32.xlu1 %v9369_v2, %s4903_s4  ;;  %v4823_v2 = vld [vmem:[%s8661_s0 + $0x1b0] sm:$0xff]  ;;  %v2349_v42 = vrot.slane %v2090_v33, %v6916_v53  ;;  %v2342_v28 = vcombine.high %v2090_v33, %v2090_v33  ;;  %v9394_v33 = vld [vmem:[#allocation25_spill] sm:$0xff] }
 0x2f9   :  { %1603 = vrot.lane.b32.xlu0 %v9381_v24, %s4907_s18 }
 0x2fa   :  { %v1070_v10 = vpop.permute.xlu1 %1069  ;;  %v1588_v15 = vpop.permute.xlu0 %1587  ;;  %v2357_v43 = vcombine.high %v2349_v42, %v2349_v42  ;;  %v2356_v44 = vrot.slane %v2342_v28, %v6916_v53 }
 0x2fb   :  { %v2118_v25 = vsel %vm2080_vm11, %v2061_v14, %v1588_v15  ;;  %v1948_v5 = vsel %vm1909_vm8, %v1891_v12, %v1070_v10  ;;  %v9402_v12 = vld [vmem:[#allocation52_spill] sm:$0xff] }
 0x2fc   :  { %v2811_v48 = vrot.slane %v2118_v25, %v6916_v53  ;;  %1257 = vrot.lane.b32.xlu1 %v4823_v2, %s4905_s15  ;;  %v2804_v16 = vcombine.high %v2118_v25, %v2118_v25  ;;  %v3265_v29 = vcombine.low %v2349_v42, %v2357_v43  ;;  %v9400_v43 = vld [vmem:[#allocation96_spill] sm:$0xff] }
 0x2fd   :  { %1375 = vrot.lane.b32.xlu0 %v9383_v38, %s4908_s19  ;;  %v4827_v38 = vld [vmem:[%s8661_s0 + $0x1b8] sm:$0xff] }
 0x2fe   :  { %v2819_v7 = vcombine.high %v2811_v48, %v2811_v48  ;;  %v1242_v57 = vpop.permute.xlu1 %1241  ;;  %v1360_v60 = vpop.permute.xlu0 %1359  ;;  %v2818_v19 = vrot.slane %v2804_v16, %v6916_v53  ;;  %v3273_v10 = vrot.slane %v3265_v29, %v6916_v53 }
 0x2ff   :  { %v2034_v35 = vsel %vm2023_vm10, %v1977_v1, %v1360_v60  ;;  %v2005_v56 = vsel %vm1966_vm9, %v1948_v5, %v1242_v57  ;;  %v9396_v57 = vld [vmem:[#allocation171_spill] sm:$0xff]  ;;  %v4830_v1 = vld [vmem:[%s8661_s0 + $0x60] sm:$0xff] }
 0x300   :  { %v3674_v61 = vcombine.low %v2811_v48, %v2819_v7  ;;  %1431 = vrot.lane.b32.xlu1 %v9388_v51, %s4908_s19  ;;  %v4829_v7 = vld [vmem:[%s8661_s0 + $0xc0] sm:$0xff] }
 0x301   :  { %1549 = vrot.lane.b32.xlu0 %v9390_v17, %s4907_s18 }
 0x302   :  { %v3688_v26 = vrot.slane %v3674_v61, %v6916_v53  ;;  %v1416_v21 = vpop.permute.xlu1 %1415  ;;  %v1534_v41 = vpop.permute.xlu0 %1533 }
 0x303   :  { %v2091_v47 = vsel %vm2080_vm11, %v2034_v35, %v1534_v41  ;;  %v2062_v6 = vsel %vm2023_vm10, %v2005_v56, %v1416_v21  ;;  %v9403_v35 = vld [vmem:[#allocation174_spill] sm:$0xff] }
 0x304   :  { %1605 = vrot.lane.b32.xlu1 %v9393_v46, %s4907_s18  ;;  %v3689_v34 = vcombine.low %v3681_v23, %v3688_v26  ;;  %v2365_v45 = vrot.slane %v2091_v47, %v6916_v53  ;;  %v2358_v50 = vcombine.high %v2091_v47, %v2091_v47  ;;  %v9401_v26 = vld [vmem:[#allocation86_spill] sm:$0xff] }
 0x305   :  { %1203 = vrot.lane.b32.xlu0 %v4826_v11, %s4905_s15  ;;  %v1694_v21 = vsel %vm1681_vm5, %v4830_v1, %v9401_v26  ;;  %v4834_v26 = vld [vmem:[%s8661_s0 + $0x68] sm:$0xff] }
 0x306   :  { %v1590_v8 = vpop.permute.xlu1 %1589  ;;  %4701 = vmatmul.mubr.msk.f32.gmra.mrb[14].mxu1 %vm3962_vm12, %v3689_v34  ;;  %v3266_v58 = vcombine.low %v2356_v44, %v2365_v45  ;;  %v1188_v4 = vpop.permute.xlu0 %1187  ;;  %v2372_v55 = vrot.slane %v2358_v50, %v6916_v53  ;;  %v2373_v28 = vcombine.high %v2365_v45, %v2365_v45  ;;  %v1751_v41 = vsel %vm1738_vm4, %v1694_v21, %v9403_v35  ;;  %v9405_v34 = vld [vmem:[#allocation15_spill] sm:$0xff]  ;;  %v9406_v45 = vld [vmem:[#allocation76_spill] sm:$0xff]  ;;  %v9418_v21 = vld [vmem:[#allocation85_spill] sm:$0xff] }
 0x307   :  { %v2119_v22 = vsel %vm2080_vm11, %v2062_v6, %v1590_v8  ;;  %4703 = vmatprep.mubr.msk.f32.mxu1 %vm4909_vm3, %v9296_v9  ;;  %v1808_v44 = vsel %vm1795_vm6, %v1751_v41, %v9405_v34  ;;  %v9420_v41 = vld [vmem:[#allocation173_spill] sm:$0xff]  ;;  %v9421_v34 = vld [vmem:[#allocation156_spill] sm:$0xff] }
 0x308   :  { %v2820_v36 = vcombine.high %v2119_v22, %v2119_v22  ;;  %v2827_v14 = vrot.slane %v2119_v22, %v6916_v53  ;;  %1377 = vrot.lane.b32.xlu1 %v9394_v33, %s4908_s19  ;;  %v3280_v15 = vrot.slane %v3266_v58, %v6916_v53  ;;  %v3282_v5 = vcombine.low %v2373_v28, %v2372_v55  ;;  %v9407_v58 = vld [vmem:[#allocation274_spill] sm:$0xff]  ;;  %v9417_v28 = vld [vmem:[#allocation149_spill] sm:$0xff] }
 0x309   :  { %1087 = vrot.lane.b32.xlu0 %v9381_v24, %s4903_s4  ;;  %v4828_v24 = vld [vmem:[%s8661_s0 + $0x58] sm:$0xff]  ;;  %v2374_v16 = vcombine.high %v2372_v55, %v2372_v55  ;;  %v1865_v11 = vsel %vm1852_vm7, %v1808_v44, %v9406_v45 }
 0x30a   :  { %v7567_v25 = vrot.slane %v2820_v36, %v6916_v53  ;;  %v2835_v48 = vcombine.high %v2827_v14, %v2827_v14  ;;  %v3690_v2 = vcombine.low %v2818_v19, %v2827_v14  ;;  %v1362_v0 = vpop.permute.xlu1 %1361  ;;  %v7569_v18 = vpop.permute.xlu0 %1071  ;;  %v3281_v20 = vcombine.low %v3273_v10, %v3280_v15  ;;  %v4831_v19 = vld [vmem:[%s8661_s0 + $0x158] sm:$0xff]  ;;  %v9409_v36 = vld [vmem:[#allocation134_spill] sm:$0xff] }
 0x30b   :  { %v1693_v52 = vsel %vm1681_vm5, %v4828_v24, %v9395_v3  ;;  %v1922_v22 = vsel %vm1909_vm8, %v1865_v11, %v9407_v58  ;;  %v1721_v14 = vsel %vm1681_vm5, %v4831_v19, %v9409_v36  ;;  %v3290_v33 = vrot.slane %v3282_v5, %v6916_v53  ;;  %v4833_v3 = vld [vmem:[%s8661_s0 + $0x160] sm:$0xff]  ;;  %v4835_v11 = vld [vmem:[%s8661_s0 + $0xc8] sm:$0xff] }
 0x30c   :  { %v3691_v42 = vcombine.low %v2835_v48, %v7567_v25  ;;  %1259 = vrot.lane.b32.xlu1 %v4827_v38, %s4905_s15  ;;  %4629 = vmatmul.mubr.msk.f32.gmra.mrb[16].mxu0 %vm3962_vm12, %v3281_v20  ;;  %v1750_v13 = vsel %vm1738_vm4, %v1693_v52, %v9396_v57  ;;  %v3698_v63 = vrot.slane %v3690_v2, %v6916_v53  ;;  %v4832_v48 = vld [vmem:[%s8661_s0 + $0x1c0] sm:$0xff]  ;;  %v9410_v2 = vld [vmem:[#allocation195_spill] sm:$0xff] }
 0x30d   :  { %1205 = vrot.lane.b32.xlu0 %v4829_v7, %s4905_s15  ;;  %4631 = vmatprep.mubr.msk.f32.mxu0 %vm4909_vm3, %v9296_v9  ;;  %v1807_v31 = vsel %vm1795_vm6, %v1750_v13, %v9397_v30  ;;  %v9411_v52 = vld [vmem:[#allocation139_spill] sm:$0xff]  ;;  %v9413_v30 = vld [vmem:[#allocation198_spill] sm:$0xff] }
 0x30e   :  { %v3705_v60 = vrot.slane %v3691_v42, %v6916_v53  ;;  %v1244_v32 = vpop.permute.xlu1 %1243  ;;  %v1190_v27 = vpop.permute.xlu0 %1189  ;;  %v1864_v61 = vsel %vm1852_vm7, %v1807_v31, %v9398_v59  ;;  %v1722_v50 = vsel %vm1681_vm5, %v4833_v3, %v9411_v52  ;;  %v9412_v7 = vld [vmem:[#allocation39_spill] sm:$0xff]  ;;  %v9426_v3 = vld [vmem:[#allocation124_spill] sm:$0xff] }
 0x30f   :  { %v1921_v54 = vsel %vm1909_vm8, %v1864_v61, %v9399_v40  ;;  %v1979_v10 = vsel %vm1966_vm9, %v1922_v22, %v1190_v27  ;;  %v1779_v31 = vsel %vm1738_vm4, %v1722_v50, %v9413_v30  ;;  %v9414_v27 = vld [vmem:[#allocation255_spill] sm:$0xff]  ;;  %v9416_v40 = vld [vmem:[#allocation42_spill] sm:$0xff] }
 0x310   :  { %1089 = vrot.lane.b32.xlu1 %v9393_v46, %s4903_s4  ;;  %v3706_v51 = vcombine.low %v3698_v63, %v3705_v60  ;;  %v1978_v17 = vsel %vm1966_vm9, %v1921_v54, %v1188_v4  ;;  %v9404_v46 = vld [vmem:[#allocation29_spill] sm:$0xff]  ;;  %v9408_v4 = vld [vmem:[#allocation103_spill] sm:$0xff]  ;;  %v1836_v54 = vsel %vm1795_vm6, %v1779_v31, %v9416_v40 }
 0x311   :  { %1551 = vrot.lane.b32.xlu0 %v9400_v43, %s4907_s18  ;;  %v2035_v37 = vsel %vm2023_vm10, %v1978_v17, %v1362_v0  ;;  %v1778_v0 = vsel %vm1738_vm4, %v1721_v14, %v9410_v2  ;;  %v9423_v2 = vld [vmem:[#allocation100_spill] sm:$0xff] }
 0x312   :  { %v1074_v39 = vpop.permute.xlu1 %1073  ;;  %4704 = vmatmul.mubr.msk.f32.gmra.mrb[16].mxu1 %vm3962_vm12, %v3706_v51  ;;  %v1536_v23 = vpop.permute.xlu0 %1535  ;;  %v1835_v57 = vsel %vm1795_vm6, %v1778_v0, %v9412_v7  ;;  %v9415_v51 = vld [vmem:[#allocation55_spill] sm:$0xff] }
 0x313   :  { %4706 = vmatprep.mubr.msk.f32.mxu1 %vm4909_vm3, %v9296_v9  ;;  %v2092_v49 = vsel %vm2080_vm11, %v2035_v37, %v1536_v23  ;;  %v1892_v59 = vsel %vm1852_vm7, %v1835_v57, %v9414_v27  ;;  %v9424_v0 = vld [vmem:[#allocation75_spill] sm:$0xff] }
 0x314   :  { %1433 = vrot.lane.b32.xlu1 %v9402_v12, %s4908_s19  ;;  %v2382_v47 = vrot.slane %v2092_v49, %v6916_v53  ;;  %v2375_v29 = vcombine.high %v2092_v49, %v2092_v49  ;;  %v1949_v55 = vsel %vm1909_vm8, %v1892_v59, %v7569_v18  ;;  %v1695_v18 = vsel %vm1681_vm5, %v4834_v26, %v9418_v21  ;;  %v9419_v49 = vld [vmem:[#allocation258_spill] sm:$0xff] }
 0x315   :  { %1379 = vrot.lane.b32.xlu0 %v9404_v46, %s4908_s19  ;;  %v2006_v43 = vsel %vm1966_vm9, %v1949_v55, %v1244_v32  ;;  %v1893_v12 = vsel %vm1852_vm7, %v1836_v54, %v9419_v49  ;;  %v1752_v5 = vsel %vm1738_vm4, %v1695_v18, %v9420_v41  ;;  %v9427_v41 = vld [vmem:[#allocation90_spill] sm:$0xff] }
 0x316   :  { %v1418_v56 = vpop.permute.xlu1 %1417  ;;  %v3283_v6 = vcombine.low %v2374_v16, %v2382_v47  ;;  %v1364_v8 = vpop.permute.xlu0 %1363  ;;  %v2389_v20 = vrot.slane %v2375_v29, %v6916_v53  ;;  %v2390_v42 = vcombine.high %v2382_v47, %v2382_v47  ;;  %v1950_v16 = vsel %vm1909_vm8, %v1893_v12, %v1074_v39 }
 0x317   :  { %v2036_v38 = vsel %vm2023_vm10, %v1979_v10, %v1364_v8  ;;  %v2063_v35 = vsel %vm2023_vm10, %v2006_v43, %v1418_v56  ;;  %v2836_v29 = vcombine.high %v7567_v25, %v7567_v25 }
 0x318   :  { %1553 = vrot.lane.b32.xlu1 %v9408_v4, %s4907_s18  ;;  %v3297_v15 = vrot.slane %v3283_v6, %v6916_v53  ;;  %v3299_v17 = vcombine.low %v2390_v42, %v2389_v20 }
 0x319   :  { %1261 = vrot.lane.b32.xlu0 %v4832_v48, %s4905_s15 }
 0x31a   :  { %v1538_v24 = vpop.permute.xlu1 %1537  ;;  %v1246_v63 = vpop.permute.xlu0 %1245  ;;  %v3298_v60 = vcombine.low %v3290_v33, %v3297_v15  ;;  %v3307_v39 = vrot.slane %v3299_v17, %v6916_v53  ;;  %v9422_v33 = vld [vmem:[#allocation14_spill] sm:$0xff] }
 0x31b   :  { %v2093_v13 = vsel %vm2080_vm11, %v2036_v38, %v1538_v24  ;;  %v2007_v44 = vsel %vm1966_vm9, %v1950_v16, %v1246_v63  ;;  %v1809_v10 = vsel %vm1795_vm6, %v1752_v5, %v9422_v33  ;;  %v9425_v38 = vld [vmem:[#allocation27_spill] sm:$0xff] }
 0x31c   :  { %v2398_v61 = vrot.slane %v2093_v13, %v6916_v53  ;;  %1435 = vrot.lane.b32.xlu1 %v9415_v51, %s4908_s19  ;;  %4632 = vmatmul.mubr.msk.f32.gmra.mrb[18].mxu0 %vm3962_vm12, %v3298_v60  ;;  %v2391_v37 = vcombine.high %v2093_v13, %v2093_v13  ;;  %v1866_v20 = vsel %vm1852_vm7, %v1809_v10, %v9424_v0  ;;  %v4836_v51 = vld [vmem:[%s8661_s0 + $0xd0] sm:$0xff] }
 0x31d   :  { %1607 = vrot.lane.b32.xlu0 %v9417_v28, %s4907_s18  ;;  %4634 = vmatprep.mubr.msk.f32.mxu0 %vm4909_vm3, %v9296_v9  ;;  %v1923_v52 = vsel %vm1909_vm8, %v1866_v20, %v9426_v3  ;;  %v9437_v20 = vld [vmem:[#allocation197_spill] sm:$0xff]  ;;  %v9438_v3 = vld [vmem:[#allocation200_spill] sm:$0xff] }
 0x31e   :  { %v2406_v23 = vcombine.high %v2398_v61, %v2398_v61  ;;  %v1420_v1 = vpop.permute.xlu1 %1419  ;;  %v2405_v6 = vrot.slane %v2391_v37, %v6916_v53 }
 0x31f   :  { %v1592_v32 = vpop.permute.xlu0 %1591  ;;  %v2064_v58 = vsel %vm2023_vm10, %v2007_v44, %v1420_v1 }
 0x320   :  { %v3300_v47 = vcombine.low %v2398_v61, %v2406_v23  ;;  %v2120_v46 = vsel %vm2080_vm11, %v2063_v35, %v1592_v32  ;;  %1609 = vrot.lane.b32.xlu1 %v9421_v34, %s4907_s18  ;;  %v2407_v13 = vcombine.high %v2405_v6, %v2405_v6  ;;  %v4838_v32 = vld [vmem:[%s8661_s0 + $0x70] sm:$0xff] }
 0x321   :  { %v2837_v45 = vcombine.high %v2120_v46, %v2120_v46  ;;  %v2844_v56 = vrot.slane %v2120_v46, %v6916_v53  ;;  %1207 = vrot.lane.b32.xlu0 %v4835_v11, %s4905_s15  ;;  %v1696_v5 = vsel %vm1681_vm5, %v4838_v32, %v9427_v41  ;;  %v9428_v46 = vld [vmem:[#allocation54_spill] sm:$0xff] }
 0x322   :  { %v3314_v8 = vrot.slane %v3300_v47, %v6916_v53  ;;  %v1594_v22 = vpop.permute.xlu1 %1593  ;;  %v3316_v37 = vcombine.low %v2405_v6, %v2407_v13  ;;  %v9432_v6 = vld [vmem:[#allocation83_spill] sm:$0xff] }
 0x323   :  { %v2851_v25 = vrot.slane %v2837_v45, %v6916_v53  ;;  %v2852_v4 = vcombine.high %v2844_v56, %v2844_v56  ;;  %v3707_v19 = vcombine.low %v2836_v29, %v2844_v56  ;;  %v2121_v36 = vsel %vm2080_vm11, %v2064_v58, %v1594_v22  ;;  %v1192_v14 = vpop.permute.xlu0 %1191  ;;  %v9430_v29 = vld [vmem:[#allocation31_spill] sm:$0xff]  ;;  %v9431_v45 = vld [vmem:[#allocation17_spill] sm:$0xff]  ;;  %v9433_v22 = vld [vmem:[#allocation276_spill] sm:$0xff] }
 0x324   :  { %v2853_v15 = vcombine.high %v2121_v36, %v2121_v36  ;;  %v2860_v48 = vrot.slane %v2121_v36, %v6916_v53  ;;  %1555 = vrot.lane.b32.xlu1 %v9423_v2, %s4907_s18  ;;  %v3315_v24 = vcombine.low %v3307_v39, %v3314_v8  ;;  %v1980_v30 = vsel %vm1966_vm9, %v1923_v52, %v1192_v14  ;;  %v4839_v36 = vld [vmem:[%s8661_s0 + $0x168] sm:$0xff]  ;;  %v9435_v14 = vld [vmem:[#allocation138_spill] sm:$0xff]  ;;  %v9436_v2 = vld [vmem:[#allocation143_spill] sm:$0xff] }
 0x325   :  { %v3708_v42 = vcombine.low %v2852_v4, %v2851_v25  ;;  %1381 = vrot.lane.b32.xlu0 %v9425_v38, %s4908_s19  ;;  %v3715_v63 = vrot.slane %v3707_v19, %v6916_v53  ;;  %v3324_v16 = vrot.slane %v3316_v37, %v6916_v53  ;;  %v9434_v19 = vld [vmem:[#allocation107_spill] sm:$0xff]  ;;  %v1723_v33 = vsel %vm1681_vm5, %v4839_v36, %v9435_v14 }
 0x326   :  { %v2867_v50 = vrot.slane %v2853_v15, %v6916_v53  ;;  %v2868_v7 = vcombine.high %v2860_v48, %v2860_v48  ;;  %v1540_v57 = vpop.permute.xlu1 %1539  ;;  %4635 = vmatmul.mubr.msk.f32.gmra.mrb[20].mxu0 %vm3962_vm12, %v3315_v24  ;;  %v4840_v15 = vld [vmem:[%s8661_s0 + $0x1d0] sm:$0xff]  ;;  %v4843_v14 = vld [vmem:[%s8661_s0 + $0x1d8] sm:$0xff] }
 0x327   :  { %v3722_v60 = vrot.slane %v3708_v42, %v6916_v53  ;;  %v1366_v31 = vpop.permute.xlu0 %1365  ;;  %4637 = vmatprep.mubr.msk.f32.mxu0 %vm4909_vm3, %v9296_v9  ;;  %v1780_v42 = vsel %vm1738_vm4, %v1723_v33, %v9437_v20  ;;  %v4844_v33 = vld [vmem:[%s8661_s0 + $0x78] sm:$0xff] }
 0x328   :  { %v2869_v27 = vcombine.high %v2867_v50, %v2867_v50  ;;  %v3724_v59 = vcombine.low %v2860_v48, %v2868_v7  ;;  %v2037_v61 = vsel %vm2023_vm10, %v1980_v30, %v1366_v31  ;;  %1209 = vrot.lane.b32.xlu1 %v4836_v51, %s4905_s15  ;;  %v4841_v48 = vld [vmem:[%s8661_s0 + $0x170] sm:$0xff] }
 0x329   :  { %v2094_v40 = vsel %vm2080_vm11, %v2037_v61, %v1540_v57  ;;  %1091 = vrot.lane.b32.xlu0 %v9417_v28, %s4903_s4  ;;  %v3723_v54 = vcombine.low %v3715_v63, %v3722_v60  ;;  %v4837_v28 = vld [vmem:[%s8661_s0 + $0x1c8] sm:$0xff]  ;;  %v1724_v0 = vsel %vm1681_vm5, %v4841_v48, %v9436_v2  ;;  %v4845_v48 = vld [vmem:[%s8661_s0 + $0xe0] sm:$0xff]  ;;  %v9448_v2 = vld [vmem:[#allocation175_spill] sm:$0xff] }
 0x32a   :  { %v3725_v55 = vcombine.low %v2867_v50, %v2869_v27  ;;  %v2415_v43 = vrot.slane %v2094_v40, %v6916_v53  ;;  %v1194_v17 = vpop.permute.xlu1 %1193  ;;  %v3732_v1 = vrot.slane %v3724_v59, %v6916_v53  ;;  %v2408_v4 = vcombine.high %v2094_v40, %v2094_v40  ;;  %v9439_v50 = vld [vmem:[#allocation41_spill] sm:$0xff] }
 0x32b   :  { %4707 = vmatmul.mubr.msk.f32.gmra.mrb[18].mxu1 %vm3962_vm12, %v3723_v54  ;;  %v1076_v23 = vpop.permute.xlu0 %1075  ;;  %v1781_v52 = vsel %vm1738_vm4, %v1724_v0, %v9438_v3  ;;  %v1837_v7 = vsel %vm1795_vm6, %v1780_v42, %v9439_v50  ;;  %v9440_v63 = vld [vmem:[#allocation257_spill] sm:$0xff] }
 0x32c   :  { %v3739_v26 = vrot.slane %v3725_v55, %v6916_v53  ;;  %v2423_v21 = vcombine.high %v2415_v43, %v2415_v43  ;;  %1093 = vrot.lane.b32.xlu1 %v9421_v34, %s4903_s4  ;;  %4709 = vmatprep.mubr.msk.f32.mxu1 %vm4909_vm3, %v9296_v9  ;;  %v9429_v34 = vld [vmem:[#allocation176_spill] sm:$0xff]  ;;  %v1894_v60 = vsel %vm1852_vm7, %v1837_v7, %v9440_v63  ;;  %v9441_v59 = vld [vmem:[#allocation57_spill] sm:$0xff]  ;;  %v9451_v7 = vld [vmem:[#allocation275_spill] sm:$0xff] }
 0x32d   :  { %1263 = vrot.lane.b32.xlu0 %v4837_v28, %s4905_s15  ;;  %v1753_v44 = vsel %vm1738_vm4, %v1696_v5, %v9429_v34  ;;  %v2422_v30 = vrot.slane %v2408_v4, %v6916_v53  ;;  %v9442_v61 = vld [vmem:[#allocation45_spill] sm:$0xff]  ;;  %v1951_v40 = vsel %vm1909_vm8, %v1894_v60, %v1076_v23 }
 0x32e   :  { %v3317_v18 = vcombine.low %v2415_v43, %v2423_v21  ;;  %v1078_v49 = vpop.permute.xlu1 %1077  ;;  %v3740_v12 = vcombine.low %v3732_v1, %v3739_v26  ;;  %v1810_v56 = vsel %vm1795_vm6, %v1753_v44, %v9431_v45  ;;  %v1838_v51 = vsel %vm1795_vm6, %v1781_v52, %v9442_v61  ;;  %v9443_v54 = vld [vmem:[#allocation153_spill] sm:$0xff]  ;;  %v9444_v26 = vld [vmem:[#allocation259_spill] sm:$0xff] }
 0x32f   :  { %v1248_v35 = vpop.permute.xlu0 %1247  ;;  %v1867_v8 = vsel %vm1852_vm7, %v1810_v56, %v9432_v6  ;;  %v1895_v21 = vsel %vm1852_vm7, %v1838_v51, %v9444_v26  ;;  %v9446_v6 = vld [vmem:[#allocation30_spill] sm:$0xff]  ;;  %v9450_v52 = vld [vmem:[#allocation79_spill] sm:$0xff] }
 0x330   :  { %v3331_v47 = vrot.slane %v3317_v18, %v6916_v53  ;;  %1437 = vrot.lane.b32.xlu1 %v9428_v46, %s4908_s19  ;;  %4710 = vmatmul.mubr.msk.f32.gmra.mrb[20].mxu1 %vm3962_vm12, %v3740_v12  ;;  %v1924_v25 = vsel %vm1909_vm8, %v1867_v8, %v9433_v22  ;;  %v2008_v55 = vsel %vm1966_vm9, %v1951_v40, %v1248_v35  ;;  %v9445_v35 = vld [vmem:[#allocation160_spill] sm:$0xff]  ;;  %v9454_v51 = vld [vmem:[#allocation178_spill] sm:$0xff] }
 0x331   :  { %1383 = vrot.lane.b32.xlu0 %v9430_v29, %s4908_s19  ;;  %4712 = vmatprep.mubr.msk.f32.mxu1 %vm4909_vm3, %v9296_v9  ;;  %v1981_v10 = vsel %vm1966_vm9, %v1924_v25, %v1194_v17  ;;  %v1952_v12 = vsel %vm1909_vm8, %v1895_v21, %v1078_v49 }
 0x332   :  { %v1422_v11 = vpop.permute.xlu1 %1421  ;;  %v3332_v39 = vcombine.low %v3324_v16, %v3331_v47  ;;  %v4842_v47 = vld [vmem:[%s8661_s0 + $0xd8] sm:$0xff] }
 0x333   :  { %v1368_v58 = vpop.permute.xlu0 %1367  ;;  %v2065_v28 = vsel %vm2023_vm10, %v2008_v55, %v1422_v11  ;;  %v9455_v55 = vld [vmem:[#allocation56_spill] sm:$0xff] }
 0x334   :  { %4638 = vmatmul.mubr.msk.f32.gmra.mrb[22].mxu0 %vm3962_vm12, %v3332_v39  ;;  %1557 = vrot.lane.b32.xlu1 %v9434_v19, %s4907_s18  ;;  %v2038_v38 = vsel %vm2023_vm10, %v1981_v10, %v1368_v58  ;;  %v9447_v10 = vld [vmem:[#allocation89_spill] sm:$0xff] }
 0x335   :  { %1265 = vrot.lane.b32.xlu0 %v4840_v15, %s4905_s15  ;;  %4640 = vmatprep.mubr.msk.f32.mxu0 %vm4909_vm3, %v9296_v9  ;;  %v1697_v15 = vsel %vm1681_vm5, %v4844_v33, %v9447_v10  ;;  %v9465_v10 = vld [vmem:[#allocation43_spill] sm:$0xff] }
 0x336   :  { %v1542_v24 = vpop.permute.xlu1 %1541  ;;  %v1754_v0 = vsel %vm1738_vm4, %v1697_v15, %v9448_v2 }
 0x337   :  { %v2095_v57 = vsel %vm2080_vm11, %v2038_v38, %v1542_v24  ;;  %v1250_v13 = vpop.permute.xlu0 %1249  ;;  %v9449_v38 = vld [vmem:[#allocation16_spill] sm:$0xff] }
 0x338   :  { %v2424_v31 = vcombine.high %v2095_v57, %v2095_v57  ;;  %v2431_v27 = vrot.slane %v2095_v57, %v6916_v53  ;;  %1439 = vrot.lane.b32.xlu1 %v9441_v59, %s4908_s19  ;;  %v2009_v41 = vsel %vm1966_vm9, %v1952_v12, %v1250_v13  ;;  %v1811_v24 = vsel %vm1795_vm6, %v1754_v0, %v9449_v38  ;;  %v9452_v13 = vld [vmem:[#allocation104_spill] sm:$0xff] }
 0x339   :  { %1611 = vrot.lane.b32.xlu0 %v9443_v54, %s4907_s18  ;;  %v1868_v50 = vsel %vm1852_vm7, %v1811_v24, %v9450_v52  ;;  %v9466_v52 = vld [vmem:[#allocation227_spill] sm:$0xff] }
 0x33a   :  { %v7799_v43 = vrot.slane %v2424_v31, %v6916_v53  ;;  %v2439_v17 = vcombine.high %v2431_v27, %v2431_v27  ;;  %v3333_v37 = vcombine.low %v2422_v30, %v2431_v27  ;;  %v1424_v1 = vpop.permute.xlu1 %1423  ;;  %v1925_v57 = vsel %vm1909_vm8, %v1868_v50, %v9451_v7  ;;  %v4846_v30 = vld [vmem:[%s8661_s0 + $0x80] sm:$0xff]  ;;  %v9453_v31 = vld [vmem:[#allocation94_spill] sm:$0xff]  ;;  %v9467_v7 = vld [vmem:[#allocation113_spill] sm:$0xff] }
 0x33b   :  { %v1596_v18 = vpop.permute.xlu0 %1595  ;;  %v2066_v34 = vsel %vm2023_vm10, %v2009_v41, %v1424_v1  ;;  %v1698_v27 = vsel %vm1681_vm5, %v4846_v30, %v9453_v31  ;;  %v9468_v30 = vld [vmem:[#allocation235_spill] sm:$0xff]  ;;  %v9469_v31 = vld [vmem:[#allocation261_spill] sm:$0xff] }
 0x33c   :  { %v3334_v23 = vcombine.low %v2439_v17, %v7799_v43  ;;  %v2122_v32 = vsel %vm2080_vm11, %v2065_v28, %v1596_v18  ;;  %1613 = vrot.lane.b32.xlu1 %v9445_v35, %s4907_s18  ;;  %v3341_v49 = vrot.slane %v3333_v37, %v6916_v53  ;;  %v1755_v40 = vsel %vm1738_vm4, %v1698_v27, %v9454_v51  ;;  %v9456_v17 = vld [vmem:[#allocation213_spill] sm:$0xff] }
 0x33d   :  { %v2870_v5 = vcombine.high %v2122_v32, %v2122_v32  ;;  %v2877_v16 = vrot.slane %v2122_v32, %v6916_v53  ;;  %1211 = vrot.lane.b32.xlu0 %v4842_v47, %s4905_s15  ;;  %v1812_v37 = vsel %vm1795_vm6, %v1755_v40, %v9456_v17  ;;  %v2440_v1 = vcombine.high %v7799_v43, %v7799_v43  ;;  %v9457_v28 = vld [vmem:[#allocation221_spill] sm:$0xff]  ;;  %v4847_v43 = vld [vmem:[%s8661_s0 + $0x178] sm:$0xff]  ;;  %v9459_v47 = vld [vmem:[#allocation142_spill] sm:$0xff] }
 0x33e   :  { %v3348_v46 = vrot.slane %v3334_v23, %v6916_v53  ;;  %v1598_v44 = vpop.permute.xlu1 %1597  ;;  %v9458_v18 = vld [vmem:[#allocation241_spill] sm:$0xff] }
 0x33f   :  { %v2885_v29 = vcombine.high %v2877_v16, %v2877_v16  ;;  %v7819_v45 = vsel %vm2080_vm11, %v2066_v34, %v1598_v44  ;;  %v1196_v56 = vpop.permute.xlu0 %1195  ;;  %v2884_v11 = vrot.slane %v2870_v5, %v6916_v53  ;;  %v1869_v12 = vsel %vm1852_vm7, %v1812_v37, %v9458_v18  ;;  %v9460_v34 = vld [vmem:[#allocation147_spill] sm:$0xff] }
 0x340   :  { %v7824_v39 = vrot.slane %v7819_v45, %v6916_v53  ;;  %1385 = vrot.lane.b32.xlu1 %v9446_v6, %s4908_s19  ;;  %v3349_v8 = vcombine.low %v3341_v49, %v3348_v46  ;;  %v1982_v63 = vsel %vm1966_vm9, %v1925_v57, %v1196_v56  ;;  %v2886_v32 = vcombine.high %v7819_v45, %v7819_v45  ;;  %v4848_v46 = vld [vmem:[%s8661_s0 + $0x180] sm:$0xff]  ;;  %v9461_v56 = vld [vmem:[#allocation278_spill] sm:$0xff]  ;;  %v9462_v6 = vld [vmem:[#allocation249_spill] sm:$0xff] }
 0x341   :  { %v3741_v58 = vcombine.low %v2877_v16, %v2885_v29  ;;  %1095 = vrot.lane.b32.xlu0 %v9443_v54, %s4903_s4  ;;  %v1725_v49 = vsel %vm1681_vm5, %v4847_v43, %v9459_v47  ;;  %v1726_v44 = vsel %vm1681_vm5, %v4848_v46, %v9460_v34  ;;  %v7905_v29 = vld [vmem:[%s8661_s0 + $0x1e8] sm:$0xff] }
 0x342   :  { %v3742_v22 = vcombine.low %v2884_v11, %v7824_v39  ;;  %v1370_v25 = vpop.permute.xlu1 %1369  ;;  %4641 = vmatmul.mubr.msk.f32.gmra.mrb[24].mxu0 %vm3962_vm12, %v3349_v8  ;;  %v7908_v45 = vrot.slane %v7905_v29, 2  ;;  %v1926_v11 = vsel %vm1909_vm8, %v1869_v12, %v9461_v56  ;;  %v9463_v8 = vld [vmem:[#allocation199_spill] sm:$0xff]  ;;  %v2900_v0 = vrot.slane %v2886_v32, %v6916_v53 }
 0x343   :  { %v7832_v4 = vpop.permute.xlu0 %1079  ;;  %4643 = vmatprep.mubr.msk.f32.mxu0 %vm4909_vm3, %v9296_v9  ;;  %v3749_v19 = vrot.slane %v3741_v58, %v6916_v53  ;;  %v2039_v59 = vsel %vm2023_vm10, %v1982_v63, %v1370_v25  ;;  %v1782_v58 = vsel %vm1738_vm4, %v1725_v49, %v9463_v8 }
 0x344   :  { %v3756_v36 = vrot.slane %v3742_v22, %v6916_v53  ;;  %1267 = vrot.lane.b32.xlu1 %v4843_v14, %s4905_s15  ;;  %v4850_v22 = vld [vmem:[%s8661_s0 + $0x1e0] sm:$0xff]  ;;  %v9464_v14 = vld [vmem:[#allocation202_spill] sm:$0xff]  ;;  %v1839_v15 = vsel %vm1795_vm6, %v1782_v58, %v9465_v10 }
 0x345   :  { %1213 = vrot.lane.b32.xlu0 %v4845_v48, %s4905_s15  ;;  %v990_v25 = vrot.slane %v4850_v22, 2  ;;  %v1783_v33 = vsel %vm1738_vm4, %v1726_v44, %v9464_v14  ;;  %v1896_v57 = vsel %vm1852_vm7, %v1839_v15, %v9467_v7 }
 0x346   :  { %v7853_v20 = vpop.permute.xlu1 %1251  ;;  %v3757_v42 = vcombine.low %v3749_v19, %v3756_v36  ;;  %v1840_v50 = vsel %vm1795_vm6, %v1783_v33, %v9466_v52  ;;  %v4852_v52 = vld [vmem:[%s8661_s0 + $0x88] sm:$0xff] }
 0x347   :  { %v1198_v3 = vpop.permute.xlu0 %1197  ;;  %v1897_v27 = vsel %vm1852_vm7, %v1840_v50, %v9469_v31  ;;  %v7945_v40 = vsel %vm388_vm1, %v990_v25, %v7908_v45  ;;  %v9473_v50 = vld [vmem:[#allocation93_spill] sm:$0xff] }
 0x348   :  { %1097 = vrot.lane.b32.xlu1 %v9445_v35, %s4903_s4  ;;  %4713 = vmatmul.mubr.msk.f32.gmra.mrb[22].mxu1 %vm3962_vm12, %v3757_v42  ;;  %v1983_v19 = vsel %vm1966_vm9, %v1926_v11, %v1198_v3  ;;  %v1699_v7 = vsel %vm1681_vm5, %v4852_v52, %v9473_v50  ;;  %v4853_v31 = vld [vmem:[%s8661_s0 + $0x188] sm:$0xff] }
 0x349   :  { %1559 = vrot.lane.b32.xlu0 %v9452_v13, %s4907_s18  ;;  %4715 = vmatprep.mubr.msk.f32.mxu1 %vm4909_vm3, %v9296_v9 }
 0x34a   :  { %v1082_v60 = vpop.permute.xlu1 %1081 }
 0x34b   :  { %v1544_v61 = vpop.permute.xlu0 %1543 }
 0x34c   :  { %v2096_v54 = vsel %vm2080_vm11, %v2039_v59, %v1544_v61  ;;  %1441 = vrot.lane.b32.xlu1 %v9455_v55, %s4908_s19  ;;  %v1953_v59 = vsel %vm1909_vm8, %v1896_v57, %v7832_v4  ;;  %v9470_v61 = vld [vmem:[#allocation157_spill] sm:$0xff]  ;;  %v7955_v4 = vld [vmem:[%s8663_s2] ss:$0 sm:$0xff] }
 0x34d   :  { %v2441_v26 = vcombine.high %v2096_v54, %v2096_v54  ;;  %v2448_v21 = vrot.slane %v2096_v54, %v6916_v53  ;;  %1387 = vrot.lane.b32.xlu0 %v9457_v28, %s4908_s19  ;;  %v2901_v54 = vcombine.high %v7824_v39, %v7824_v39  ;;  %v2010_v55 = vsel %vm1966_vm9, %v1953_v59, %v7853_v20 }
 0x34e   :  { %v1426_v23 = vpop.permute.xlu1 %1425  ;;  %v2902_v28 = vcombine.high %v2900_v0, %v2900_v0 }
 0x34f   :  { %v2455_v35 = vrot.slane %v2441_v26, %v6916_v53  ;;  %v2456_v41 = vcombine.high %v2448_v21, %v2448_v21  ;;  %v3350_v5 = vcombine.low %v2440_v1, %v2448_v21  ;;  %v1372_v16 = vpop.permute.xlu0 %1371  ;;  %v1954_v26 = vsel %vm1909_vm8, %v1897_v27, %v1082_v60  ;;  %v9474_v27 = vld [vmem:[#allocation146_spill] sm:$0xff] }
 0x350   :  { %1561 = vrot.lane.b32.xlu1 %v9462_v6, %s4907_s18  ;;  %v2040_v48 = vsel %vm2023_vm10, %v1983_v19, %v1372_v16  ;;  %v2067_v21 = vsel %vm2023_vm10, %v2010_v55, %v1426_v23  ;;  %v3758_v16 = vcombine.low %v2901_v54, %v2900_v0  ;;  %v4851_v19 = vld [vmem:[%s8661_s0 + $0xe8] sm:$0xff]  ;;  %v1727_v59 = vsel %vm1681_vm5, %v4853_v31, %v9474_v27  ;;  %v9476_v54 = vld [vmem:[#allocation246_spill] sm:$0xff]  ;;  %v9486_v31 = vld [vmem:[#allocation215_spill] sm:$0xff] }
 0x351   :  { %v3351_v36 = vcombine.low %v2456_v41, %v2455_v35  ;;  %1269 = vrot.lane.b32.xlu0 %v4850_v22, %s4905_s15  ;;  %v3358_v42 = vrot.slane %v3350_v5, %v6916_v53  ;;  %v9477_v55 = vld [vmem:[#allocation18_spill] sm:$0xff] }
 0x352   :  { %v1546_v2 = vpop.permute.xlu1 %1545 }
 0x353   :  { %v3365_v38 = vrot.slane %v3351_v36, %v6916_v53  ;;  %v2097_v24 = vsel %vm2080_vm11, %v2040_v48, %v1546_v2  ;;  %v1254_v3 = vpop.permute.xlu0 %1253  ;;  %v3766_v36 = vrot.slane %v3758_v16, %v6916_v53 }
 0x354   :  { %v2457_v13 = vcombine.high %v2097_v24, %v2097_v24  ;;  %v2464_v63 = vrot.slane %v2097_v24, %v6916_v53  ;;  %1443 = vrot.lane.b32.xlu1 %v9468_v30, %s4908_s19  ;;  %v2011_v35 = vsel %vm1966_vm9, %v1954_v26, %v1254_v3  ;;  %v7997_v24 = vld [vmem:[%s8661_s0 + $0xf0] sm:$0xff]  ;;  %v8002_v3 = vld [vmem:[%s8661_s0 + $0xf8] sm:$0xff] }
 0x355   :  { %1615 = vrot.lane.b32.xlu0 %v9470_v61, %s4907_s18  ;;  %v3366_v51 = vcombine.low %v3358_v42, %v3365_v38  ;;  %v9472_v42 = vld [vmem:[#allocation218_spill] sm:$0xff] }
 0x356   :  { %v2471_v17 = vrot.slane %v2457_v13, %v6916_v53  ;;  %v2472_v37 = vcombine.high %v2464_v63, %v2464_v63  ;;  %v1428_v1 = vpop.permute.xlu1 %1427  ;;  %v8030_v26 = vld [vmem:[%s8661_s0 + $0x1f0] sm:$0xff] }
 0x357   :  { %4644 = vmatmul.mubr.msk.f32.gmra.mrb[26].mxu0 %vm3962_vm12, %v3366_v51  ;;  %v1600_v39 = vpop.permute.xlu0 %1599  ;;  %v2068_v47 = vsel %vm2023_vm10, %v2011_v35, %v1428_v1  ;;  %v9480_v35 = vld [vmem:[#allocation226_spill] sm:$0xff] }
 0x358   :  { %v2473_v18 = vcombine.high %v2471_v17, %v2471_v17  ;;  %v3367_v12 = vcombine.low %v2464_v63, %v2472_v37  ;;  %v2124_v20 = vsel %vm2080_vm11, %v2067_v21, %v1600_v39  ;;  %1099 = vrot.lane.b32.xlu1 %v9470_v61, %s4903_s4  ;;  %v4131_v32 = vpop.f32.mrb[0].mxu0  ;;  %4646 = vmatprep.mubr.msk.f32.mxu0 %vm4909_vm3, %v9296_v9  ;;  %v9475_v61 = vld [vmem:[#allocation177_spill] sm:$0xff]  ;;  %v1333_v37 = vrot.slane %v7997_v24, 1 }
 0x359   :  { %v2903_v60 = vcombine.high %v2124_v20, %v2124_v20  ;;  %v2910_v23 = vrot.slane %v2124_v20, %v6916_v53  ;;  %v4132_v41 = vadd.f32 %v7955_v4, %v4131_v32  ;;  %1617 = vrot.lane.b32.xlu0 %v7945_v40, %s4907_s18  ;;  %v4606_v5 = vpop.f32.mrb[1].mxu0  ;;  %v1756_v51 = vsel %vm1738_vm4, %v1699_v7, %v9475_v61  ;;  %v9478_v39 = vld [vmem:[#allocation201_spill] sm:$0xff] }
 0x35a   :  { %v3368_v43 = vcombine.low %v2471_v17, %v2473_v18  ;;  %v7971_v49 = vpop.permute.xlu1 %1083  ;;  %v3375_v6 = vrot.slane %v3367_v12, %v6916_v53  ;;  %v1813_v17 = vsel %vm1795_vm6, %v1756_v51, %v9477_v55  ;;  %v1334_v21 = vrot.slane %v8002_v3, 1  ;;  %v9479_v12 = vld [vmem:[#allocation240_spill] sm:$0xff]  ;;  %v9488_v55 = vld [vmem:[#allocation243_spill] sm:$0xff] }
 0x35b   :  { %v2917_v46 = vrot.slane %v2903_v60, %v6916_v53  ;;  %v2918_v34 = vcombine.high %v2910_v23, %v2910_v23  ;;  %v3759_v44 = vcombine.low %v2902_v28, %v2910_v23  ;;  %v4375_v56 = vmax.f32 %v4132_v41, 0.0  ;;  %v1602_v11 = vpop.permute.xlu0 %1601  ;;  %v8036_v28 = vld [vmem:[%s8661_s0 + $0x1f8] sm:$0xff]  ;;  %v9481_v23 = vld [vmem:[#allocation277_spill] sm:$0xff]  ;;  %v9487_v51 = vld [vmem:[#allocation204_spill] sm:$0xff] }
 0x35c   :  { %v3382_v8 = vrot.slane %v3368_v43, %v6916_v53  ;;  %v2125_v58 = vsel %vm2080_vm11, %v2068_v47, %v1602_v11  ;;  %1271 = vrot.lane.b32.xlu1 %v7905_v29, %s4905_s15  ;;  %v9471_v29 = vld [vmem:[#allocation232_spill] sm:$0xff]  ;;  %v1784_v18 = vsel %vm1738_vm4, %v1727_v59, %v9478_v39  ;;  %v1870_v20 = vsel %vm1852_vm7, %v1813_v17, %v9479_v12  ;;  %v9489_v39 = vld [vmem:[#allocation229_spill] sm:$0xff]  ;;  %v9490_v12 = vld [vmem:[#allocation279_spill] sm:$0xff] }
 0x35d   :  { %v3773_v22 = vrot.slane %v3759_v44, %v6916_v53  ;;  %4424 = vst [vmem:[#allocation2] sm:$0xff] %v4375_v56  ;;  %v2926_v25 = vrot.slane %v2125_v58, %v6916_v53  ;;  %1215 = vrot.lane.b32.xlu0 %v4851_v19, %s4905_s15  ;;  %v3775_v10 = vcombine.low %v2918_v34, %v2917_v46  ;;  %v9482_v43 = vld [vmem:[#allocation260_spill] sm:$0xff]  ;;  %v1336_v34 = vrot.slane %v8030_v26, 1 }
 0x35e   :  { %v1256_v14 = vpop.permute.xlu1 %1255  ;;  %v3383_v33 = vcombine.low %v3375_v6, %v3382_v8  ;;  %v2919_v13 = vcombine.high %v2125_v58, %v2125_v58  ;;  %v1841_v60 = vsel %vm1795_vm6, %v1784_v18, %v9480_v35  ;;  %v1927_v41 = vsel %vm1909_vm8, %v1870_v20, %v9481_v23 }
 0x35f   :  { %v2934_v15 = vcombine.high %v2926_v25, %v2926_v25  ;;  %v1200_v48 = vpop.permute.xlu0 %1199  ;;  %v3774_v2 = vcombine.low %v3766_v36, %v3773_v22  ;;  %v3783_v57 = vrot.slane %v3775_v10, %v6916_v53  ;;  %v1898_v47 = vsel %vm1852_vm7, %v1841_v60, %v9482_v43  ;;  %v9483_v10 = vld [vmem:[#allocation98_spill] sm:$0xff] }
 0x360   :  { %1445 = vrot.lane.b32.xlu1 %v9471_v29, %s4908_s19  ;;  %4647 = vmatmul.mubr.msk.f32.gmra.mrb[28].mxu0 %vm3962_vm12, %v3383_v33  ;;  %v2933_v5 = vrot.slane %v2919_v13, %v6916_v53  ;;  %v1984_v46 = vsel %vm1966_vm9, %v1927_v41, %v1200_v48  ;;  %v1337_v44 = vrot.slane %v8036_v28, 1  ;;  %v1955_v56 = vsel %vm1909_vm8, %v1898_v47, %v7971_v49  ;;  %v4854_v33 = vld [vmem:[%s8661_s0 + $0x90] sm:$0xff]  ;;  %v9491_v47 = vld [vmem:[#allocation263_spill] sm:$0xff] }
 0x361   :  { %v3776_v0 = vcombine.low %v2926_v25, %v2934_v15  ;;  %1389 = vrot.lane.b32.xlu0 %v9472_v42, %s4908_s19  ;;  %4649 = vmatprep.mubr.msk.f32.mxu0 %vm4909_vm3, %v9296_v9  ;;  %v1507_v6 = vrot.slane %v7997_v24, 2  ;;  %v2012_v58 = vsel %vm1966_vm9, %v1955_v56, %v1256_v14  ;;  %v1508_v36 = vrot.slane %v8002_v3, 2  ;;  %v9484_v14 = vld [vmem:[#allocation180_spill] sm:$0xff]  ;;  %v4855_v13 = vld [vmem:[%s8661_s0 + $0x190] sm:$0xff] }
 0x362   :  { %4716 = vmatmul.mubr.msk.f32.gmra.mrb[24].mxu1 %vm3962_vm12, %v3774_v2  ;;  %v1430_v38 = vpop.permute.xlu1 %1429  ;;  %v1700_v15 = vsel %vm1681_vm5, %v4854_v33, %v9483_v10  ;;  %v2935_v48 = vcombine.high %v2933_v5, %v2933_v5  ;;  %v1338_v52 = vsel %vm135_vm0, %v1336_v34, %v1337_v44 }
 0x363   :  { %v3790_v63 = vrot.slane %v3776_v0, %v6916_v53  ;;  %v1374_v30 = vpop.permute.xlu0 %1373  ;;  %4718 = vmatprep.mubr.msk.f32.mxu1 %vm4909_vm3, %v9296_v9  ;;  %v2069_v29 = vsel %vm2023_vm10, %v2012_v58, %v1430_v38  ;;  %v1757_v0 = vsel %vm1738_vm4, %v1700_v15, %v9484_v14  ;;  %v1510_v38 = vrot.slane %v8030_v26, 2 }
 0x364   :  { %1563 = vrot.lane.b32.xlu1 %v9476_v54, %s4907_s18  ;;  %v2041_v11 = vsel %vm2023_vm10, %v1984_v46, %v1374_v30  ;;  %v1814_v27 = vsel %vm1795_vm6, %v1757_v0, %v9486_v31  ;;  %v1509_v61 = vsel %vm388_vm1, %v1507_v6, %v1508_v36 }
 0x365   :  { %1217 = vrot.lane.b32.xlu0 %v7997_v24, %s4905_s15  ;;  %v3791_v1 = vcombine.low %v3783_v57, %v3790_v63  ;;  %v1511_v57 = vrot.slane %v8036_v28, 2  ;;  %v9485_v63 = vld [vmem:[#allocation151_spill] sm:$0xff]  ;;  %v1871_v17 = vsel %vm1852_vm7, %v1814_v27, %v9488_v55  ;;  %v9492_v55 = vld [vmem:[#allocation97_spill] sm:$0xff] }
 0x366   :  { %v1548_v32 = vpop.permute.xlu1 %1547  ;;  %v1728_v30 = vsel %vm1681_vm5, %v4855_v13, %v9485_v63  ;;  %v1928_v20 = vsel %vm1909_vm8, %v1871_v17, %v9490_v12 }
 0x367   :  { %4719 = vmatmul.mubr.msk.f32.gmra.mrb[26].mxu1 %vm3962_vm12, %v3791_v1  ;;  %v1202_v16 = vpop.permute.xlu0 %1201  ;;  %v2098_v22 = vsel %vm2080_vm11, %v2041_v11, %v1548_v32  ;;  %v1785_v54 = vsel %vm1738_vm4, %v1728_v30, %v9487_v51 }
 0x368   :  { %1101 = vrot.lane.b32.xlu1 %v7945_v40, %s4903_s4  ;;  %4721 = vmatprep.mubr.msk.f32.mxu1 %vm4909_vm3, %v9296_v9  ;;  %v1335_v40 = vsel %vm135_vm0, %v1333_v37, %v1334_v21  ;;  %v2481_v50 = vrot.slane %v2098_v22, %v6916_v53  ;;  %v3792_v37 = vcombine.low %v2933_v5, %v2935_v48 }
 0x369   :  { %1619 = vrot.lane.b32.xlu0 %v7908_v45, %s4907_s18  ;;  %v4256_v8 = vpop.f32.mrb[0].mxu1  ;;  %v1842_v18 = vsel %vm1795_vm6, %v1785_v54, %v9489_v39  ;;  %v2474_v32 = vcombine.high %v2098_v22, %v2098_v22  ;;  %v1512_v5 = vsel %vm388_vm1, %v1510_v38, %v1511_v57  ;;  %v1985_v34 = vsel %vm1966_vm9, %v1928_v20, %v1202_v16 }
 0x36a   :  { %v4257_v25 = vadd.f32 %v7955_v4, %v4256_v8  ;;  %v1086_v19 = vpop.permute.xlu1 %1085  ;;  %v4681_v49 = vpop.f32.mrb[1].mxu1  ;;  %v2489_v60 = vcombine.high %v2481_v50, %v2481_v50  ;;  %v1899_v46 = vsel %vm1852_vm7, %v1842_v18, %v9491_v47  ;;  %v3800_v11 = vrot.slane %v3792_v37, %v6916_v53  ;;  %v9494_v18 = vld [vmem:[#allocation214_spill] sm:$0xff] }
 0x36b   :  { %v1604_v2 = vpop.permute.xlu0 %1603  ;;  %v2488_v22 = vrot.slane %v2474_v32, %v6916_v53 }
 0x36c   :  { %v4400_v42 = vmax.f32 %v4257_v25, 0.0  ;;  %v2126_v24 = vsel %vm2080_vm11, %v2069_v29, %v1604_v2  ;;  %1273 = vrot.lane.b32.xlu1 %v8030_v26, %s4905_s15  ;;  %v1956_v25 = vsel %vm1909_vm8, %v1899_v46, %v1086_v19  ;;  %v3384_v10 = vcombine.low %v2481_v50, %v2489_v60 }
 0x36d   :  { %v2943_v7 = vrot.slane %v2126_v24, %v6916_v53  ;;  %1391 = vrot.lane.b32.xlu0 %v1335_v40, %s4908_s19  ;;  %v2936_v49 = vcombine.high %v2126_v24, %v2126_v24 }
 0x36e   :  { %4449 = vst [vmem:[#allocation2 + $0xc8] sm:$0xff] %v4400_v42  ;;  %v1258_v59 = vpop.permute.xlu1 %1257  ;;  %v3392_v63 = vrot.slane %v3384_v10, %v6916_v53 }
 0x36f   :  { %v2951_v1 = vcombine.high %v2943_v7, %v2943_v7  ;;  %v1376_v26 = vpop.permute.xlu0 %1375  ;;  %v2013_v16 = vsel %vm1966_vm9, %v1956_v25, %v1258_v59  ;;  %v2950_v50 = vrot.slane %v2936_v49, %v6916_v53 }
 0x370   :  { %v4136_v35 = vpop.f32.mrb[2].mxu0  ;;  %1447 = vrot.lane.b32.xlu1 %v1338_v52, %s4908_s19  ;;  %v2042_v8 = vsel %vm2023_vm10, %v1985_v34, %v1376_v26 }
 0x371   :  { %v3793_v23 = vcombine.low %v2943_v7, %v2951_v1  ;;  %v4137_v41 = vadd.f32 %v7955_v4, %v4136_v35  ;;  %v4609_v43 = vpop.f32.mrb[3].mxu0  ;;  %1565 = vrot.lane.b32.xlu0 %v1509_v61, %s4907_s18  ;;  %v9493_v1 = vld [vmem:[#allocation179_spill] sm:$0xff]  ;;  %v9495_v35 = vld [vmem:[#allocation242_spill] sm:$0xff] }
 0x372   :  { %v1432_v56 = vpop.permute.xlu1 %1431 }
 0x373   :  { %v3807_v6 = vrot.slane %v3793_v23, %v6916_v53  ;;  %v4376_v40 = vmax.f32 %v4137_v41, 0.0  ;;  %v1550_v58 = vpop.permute.xlu0 %1549  ;;  %v2070_v2 = vsel %vm2023_vm10, %v2013_v16, %v1432_v56  ;;  %v9499_v16 = vld [vmem:[#allocation217_spill] sm:$0xff] }
 0x374   :  { %v2099_v33 = vsel %vm2080_vm11, %v2042_v8, %v1550_v58  ;;  %1621 = vrot.lane.b32.xlu1 %v1512_v5, %s4907_s18  ;;  %v9496_v5 = vld [vmem:[#allocation121_spill] sm:$0xff]  ;;  %v9497_v58 = vld [vmem:[#allocation102_spill] sm:$0xff] }
 0x375   :  { %4425 = vst [vmem:[#allocation2 + $0x8] sm:$0xff] %v4376_v40  ;;  %v8125_v15 = vrot.slane %v2099_v33, %v6916_v53  ;;  %1219 = vrot.lane.b32.xlu0 %v8002_v3, %s4905_s15  ;;  %v4261_v48 = vpop.f32.mrb[2].mxu1  ;;  %v3808_v29 = vcombine.low %v3800_v11, %v3807_v6  ;;  %v2490_v37 = vcombine.high %v2099_v33, %v2099_v33  ;;  %v4857_v40 = vld [vmem:[%s8661_s0 + $0xa0] sm:$0xff] }
 0x376   :  { %v4262_v19 = vadd.f32 %v7955_v4, %v4261_v48  ;;  %v1606_v14 = vpop.permute.xlu1 %1605  ;;  %v4684_v0 = vpop.f32.mrb[3].mxu1 }
 0x377   :  { %v3385_v42 = vcombine.low %v2488_v22, %v8125_v15  ;;  %v2127_v24 = vsel %vm2080_vm11, %v2070_v2, %v1606_v14  ;;  %4722 = vmatmul.mubr.msk.f32.gmra.mrb[28].mxu1 %vm3962_vm12, %v3808_v29  ;;  %v1204_v52 = vpop.permute.xlu0 %1203  ;;  %v2504_v46 = vrot.slane %v2490_v37, %v6916_v53  ;;  %v2505_v34 = vcombine.high %v8125_v15, %v8125_v15  ;;  %v9498_v22 = vld [vmem:[#allocation182_spill] sm:$0xff]  ;;  %v9500_v2 = vld [vmem:[#allocation245_spill] sm:$0xff] }
 0x378   :  { %v4401_v7 = vmax.f32 %v4262_v19, 0.0  ;;  %v2952_v38 = vcombine.high %v2127_v24, %v2127_v24  ;;  %v2959_v13 = vrot.slane %v2127_v24, %v6916_v53  ;;  %1393 = vrot.lane.b32.xlu1 %v1334_v21, %s4908_s19  ;;  %4724 = vmatprep.mubr.msk.f32.mxu1 %vm4909_vm3, %v9296_v9  ;;  %v9501_v24 = vld [vmem:[#allocation150_spill] sm:$0xff] }
 0x379   :  { %v3399_v30 = vrot.slane %v3385_v42, %v6916_v53  ;;  %1103 = vrot.lane.b32.xlu0 %v7908_v45, %s4903_s4  ;;  %v4856_v45 = vld [vmem:[%s8661_s0 + $0x98] sm:$0xff]  ;;  %v3401_v49 = vcombine.low %v2505_v34, %v2504_v46  ;;  %v2506_v33 = vcombine.high %v2504_v46, %v2504_v46  ;;  %v9509_v46 = vld [vmem:[#allocation101_spill] sm:$0xff] }
 0x37a   :  { %4450 = vst [vmem:[#allocation2 + $0xd0] sm:$0xff] %v4401_v7  ;;  %v8146_v31 = vrot.slane %v2952_v38, %v6916_v53  ;;  %v2967_v27 = vcombine.high %v2959_v13, %v2959_v13  ;;  %v3809_v59 = vcombine.low %v2950_v50, %v2959_v13  ;;  %v1378_v61 = vpop.permute.xlu1 %1377  ;;  %v1701_v17 = vsel %vm1681_vm5, %v4856_v45, %v9492_v55  ;;  %v4858_v42 = vld [vmem:[%s8661_s0 + $0x198] sm:$0xff]  ;;  %v4859_v50 = vld [vmem:[%s8661_s0 + $0x1a0] sm:$0xff] }
 0x37b   :  { %v8148_v51 = vpop.permute.xlu0 %1087  ;;  %v3400_v21 = vcombine.low %v3392_v63, %v3399_v30  ;;  %v1758_v26 = vsel %vm1738_vm4, %v1701_v17, %v9493_v1  ;;  %v9502_v7 = vld [vmem:[#allocation155_spill] sm:$0xff]  ;;  %v9503_v13 = vld [vmem:[#allocation280_spill] sm:$0xff] }
 0x37c   :  { %v3810_v54 = vcombine.low %v2967_v27, %v8146_v31  ;;  %1567 = vrot.lane.b32.xlu1 %v1508_v36, %s4907_s18  ;;  %v3817_v39 = vrot.slane %v3809_v59, %v6916_v53  ;;  %v1815_v12 = vsel %vm1795_vm6, %v1758_v26, %v9494_v18  ;;  %v1730_v38 = vsel %vm1681_vm5, %v4859_v50, %v9502_v7  ;;  %v9504_v30 = vld [vmem:[#allocation203_spill] sm:$0xff] }
 0x37d   :  { %1275 = vrot.lane.b32.xlu0 %v8036_v28, %s4905_s15  ;;  %4650 = vmatmul.mubr.msk.f32.gmra.mrb[30].mxu0 %vm3962_vm12, %v3400_v21  ;;  %v1872_v60 = vsel %vm1852_vm7, %v1815_v12, %v9495_v35  ;;  %v1702_v28 = vsel %vm1681_vm5, %v4857_v40, %v9497_v58  ;;  %v3409_v59 = vrot.slane %v3401_v49, %v6916_v53 }
 0x37e   :  { %v3824_v3 = vrot.slane %v3810_v54, %v6916_v53  ;;  %v8166_v36 = vpop.permute.xlu1 %1259  ;;  %4652 = vmatprep.mubr.msk.f32.mxu0 %vm4909_vm3, %v9296_v9  ;;  %v1929_v47 = vsel %vm1909_vm8, %v1872_v60, %v9496_v5  ;;  %v1759_v25 = vsel %vm1738_vm4, %v1702_v28, %v9498_v22  ;;  %v9505_v54 = vld [vmem:[#allocation206_spill] sm:$0xff]  ;;  %v9507_v60 = vld [vmem:[#allocation231_spill] sm:$0xff] }
 0x37f   :  { %v1206_v20 = vpop.permute.xlu0 %1205  ;;  %v4141_v32 = vpop.f32.mrb[4].mxu0  ;;  %v1986_v56 = vsel %vm1966_vm9, %v1929_v47, %v1204_v52  ;;  %v1816_v15 = vsel %vm1795_vm6, %v1759_v25, %v9499_v16  ;;  %v1729_v52 = vsel %vm1681_vm5, %v4858_v42, %v9501_v24  ;;  %v1787_v45 = vsel %vm1738_vm4, %v1730_v38, %v9505_v54  ;;  %v4860_v47 = vld [vmem:[%s8661_s0 + $0xa8] sm:$0xff] }
 0x380   :  { %v4142_v23 = vadd.f32 %v7955_v4, %v4141_v32  ;;  %v4612_v41 = vpop.f32.mrb[5].mxu0  ;;  %1623 = vrot.lane.b32.xlu1 %v1511_v57, %s4907_s18  ;;  %v3825_v43 = vcombine.low %v3817_v39, %v3824_v3  ;;  %v2043_v57 = vsel %vm2023_vm10, %v1986_v56, %v1378_v61  ;;  %v1873_v19 = vsel %vm1852_vm7, %v1816_v15, %v9500_v2  ;;  %v9506_v39 = vld [vmem:[#allocation228_spill] sm:$0xff] }
 0x381   :  { %1449 = vrot.lane.b32.xlu0 %v1337_v44, %s4908_s19  ;;  %v1930_v63 = vsel %vm1909_vm8, %v1873_v19, %v9503_v13  ;;  %v1786_v27 = vsel %vm1738_vm4, %v1729_v52, %v9504_v30  ;;  %v9508_v41 = vld [vmem:[#allocation262_spill] sm:$0xff]  ;;  %v1703_v34 = vsel %vm1681_vm5, %v4860_v47, %v9509_v46  ;;  %v9510_v56 = vld [vmem:[#allocation264_spill] sm:$0xff] }
 0x382   :  { %v4377_v11 = vmax.f32 %v4142_v23, 0.0  ;;  %v1090_v6 = vpop.permute.xlu1 %1089  ;;  %4725 = vmatmul.mubr.msk.f32.gmra.mrb[30].mxu1 %vm3962_vm12, %v3825_v43  ;;  %v1987_v61 = vsel %vm1966_vm9, %v1930_v63, %v1206_v20  ;;  %v1843_v3 = vsel %vm1795_vm6, %v1786_v27, %v9506_v39  ;;  %v1844_v23 = vsel %vm1795_vm6, %v1787_v45, %v9507_v60  ;;  %v9512_v52 = vld [vmem:[#allocation216_spill] sm:$0xff] }
 0x383   :  { %v1552_v8 = vpop.permute.xlu0 %1551  ;;  %4727 = vmatprep.mubr.msk.f32.mxu1 %vm4909_vm3, %v9296_v9  ;;  %v1900_v43 = vsel %vm1852_vm7, %v1843_v3, %v9508_v41 }
 0x384   :  { %4426 = vst [vmem:[#allocation2 + $0x10] sm:$0xff] %v4377_v11  ;;  %v2100_v44 = vsel %vm2080_vm11, %v2043_v57, %v1552_v8  ;;  %v1901_v11 = vsel %vm1852_vm7, %v1844_v23, %v9510_v56  ;;  %v1957_v57 = vsel %vm1909_vm8, %v1900_v43, %v8148_v51 }
 0x385   :  { %v2514_v10 = vrot.slane %v2100_v44, %v6916_v53  ;;  %v2507_v48 = vcombine.high %v2100_v44, %v2100_v44  ;;  %v2014_v58 = vsel %vm1966_vm9, %v1957_v57, %v8166_v36  ;;  %v1958_v51 = vsel %vm1909_vm8, %v1901_v11, %v1090_v6 }
 0x386   :  { %v1434_v29 = vpop.permute.xlu1 %1433 }
 0x387   :  { %v3402_v14 = vcombine.low %v2506_v33, %v2514_v10  ;;  %v1380_v0 = vpop.permute.xlu0 %1379  ;;  %v2521_v55 = vrot.slane %v2507_v48, %v6916_v53  ;;  %v2522_v17 = vcombine.high %v2514_v10, %v2514_v10  ;;  %v9511_v33 = vld [vmem:[#allocation181_spill] sm:$0xff]  ;;  %v2071_v16 = vsel %vm2023_vm10, %v2014_v58, %v1434_v29 }
 0x388   :  { %v2044_v37 = vsel %vm2023_vm10, %v1987_v61, %v1380_v0  ;;  %v1760_v10 = vsel %vm1738_vm4, %v1703_v34, %v9511_v33  ;;  %v2968_v0 = vcombine.high %v8146_v31, %v8146_v31  ;;  %v9513_v61 = vld [vmem:[#allocation244_spill] sm:$0xff] }
 0x389   :  { %v3416_v21 = vrot.slane %v3402_v14, %v6916_v53  ;;  %v4146_v1 = vpop.f32.mrb[6].mxu0  ;;  %v3418_v28 = vcombine.low %v2522_v17, %v2521_v55  ;;  %v1817_v6 = vsel %vm1795_vm6, %v1760_v10, %v9512_v52  ;;  %v9517_v52 = vld [vmem:[#allocation220_spill] sm:$0xff] }
 0x38a   :  { %v1554_v26 = vpop.permute.xlu1 %1553  ;;  %v4147_v18 = vadd.f32 %v7955_v4, %v4146_v1  ;;  %v4615_v20 = vpop.f32.mrb[7].mxu0 }
 0x38b   :  { %v2101_v12 = vsel %vm2080_vm11, %v2044_v37, %v1554_v26  ;;  %v1262_v32 = vpop.permute.xlu0 %1261  ;;  %v3417_v35 = vcombine.low %v3409_v59, %v3416_v21  ;;  %v3426_v29 = vrot.slane %v3418_v28, %v6916_v53  ;;  %v1874_v21 = vsel %vm1852_vm7, %v1817_v6, %v9513_v61  ;;  %v9514_v37 = vld [vmem:[#allocation128_spill] sm:$0xff] }
 0x38c   :  { %v2530_v5 = vrot.slane %v2101_v12, %v6916_v53  ;;  %v4378_v8 = vmax.f32 %v4147_v18, 0.0  ;;  %v2523_v48 = vcombine.high %v2101_v12, %v2101_v12  ;;  %v2015_v14 = vsel %vm1966_vm9, %v1958_v51, %v1262_v32 }
 0x38d   :  { %4653 = vmatmul.mubr.msk.f32.gmra.mrb[32].mxu0 %vm3962_vm12, %v3417_v35  ;;  %v4266_v40 = vpop.f32.mrb[4].mxu1  ;;  %v1931_v1 = vsel %vm1909_vm8, %v1874_v21, %v9514_v37  ;;  %v9521_v21 = vld [vmem:[#allocation205_spill] sm:$0xff]  ;;  %v9522_v37 = vld [vmem:[#allocation159_spill] sm:$0xff] }
 0x38e   :  { %v2538_v44 = vcombine.high %v2530_v5, %v2530_v5  ;;  %v4267_v22 = vadd.f32 %v7955_v4, %v4266_v40  ;;  %v1436_v25 = vpop.permute.xlu1 %1435  ;;  %v4687_v49 = vpop.f32.mrb[5].mxu1  ;;  %4655 = vmatprep.mubr.msk.f32.mxu0 %vm4909_vm3, %v9296_v9  ;;  %4427 = vst [vmem:[#allocation2 + $0x18] sm:$0xff] %v4378_v8  ;;  %v2537_v54 = vrot.slane %v2523_v48, %v6916_v53 }
 0x38f   :  { %v1608_v15 = vpop.permute.xlu0 %1607  ;;  %v2072_v7 = vsel %vm2023_vm10, %v2015_v14, %v1436_v25 }
 0x390   :  { %v3419_v36 = vcombine.low %v2530_v5, %v2538_v44  ;;  %v4402_v2 = vmax.f32 %v4267_v22, 0.0  ;;  %v2128_v19 = vsel %vm2080_vm11, %v2071_v16, %v1608_v15  ;;  %v2539_v46 = vcombine.high %v2537_v54, %v2537_v54 }
 0x391   :  { %v2969_v42 = vcombine.high %v2128_v19, %v2128_v19  ;;  %v2976_v24 = vrot.slane %v2128_v19, %v6916_v53 }
 0x392   :  { %v3433_v50 = vrot.slane %v3419_v36, %v6916_v53  ;;  %4451 = vst [vmem:[#allocation2 + $0xd8] sm:$0xff] %v4402_v2  ;;  %v1610_v38 = vpop.permute.xlu1 %1609  ;;  %v3435_v25 = vcombine.low %v2537_v54, %v2539_v46  ;;  %v4861_v36 = vld [vmem:[%s8661_s0 + $0xb0] sm:$0xff] }
 0x393   :  { %v2983_v13 = vrot.slane %v2969_v42, %v6916_v53  ;;  %v2984_v63 = vcombine.high %v2976_v24, %v2976_v24  ;;  %v3826_v30 = vcombine.low %v2968_v0, %v2976_v24  ;;  %v2129_v31 = vsel %vm2080_vm11, %v2072_v7, %v1610_v38  ;;  %v1208_v27 = vpop.permute.xlu0 %1207  ;;  %v4271_v59 = vpop.f32.mrb[6].mxu1  ;;  %v9515_v2 = vld [vmem:[#allocation106_spill] sm:$0xff]  ;;  %v9516_v42 = vld [vmem:[#allocation184_spill] sm:$0xff] }
 0x394   :  { %v2985_v45 = vcombine.high %v2129_v31, %v2129_v31  ;;  %v2992_v55 = vrot.slane %v2129_v31, %v6916_v53  ;;  %v4690_v17 = vpop.f32.mrb[7].mxu1  ;;  %v4272_v39 = vadd.f32 %v7955_v4, %v4271_v59  ;;  %v3434_v3 = vcombine.low %v3426_v29, %v3433_v50  ;;  %v9518_v7 = vld [vmem:[#allocation248_spill] sm:$0xff] }
 0x395   :  { %v3827_v26 = vcombine.low %v2984_v63, %v2983_v13  ;;  %v1988_v20 = vsel %vm1966_vm9, %v1931_v1, %v1208_v27  ;;  %v3834_v60 = vrot.slane %v3826_v30, %v6916_v53  ;;  %v1704_v19 = vsel %vm1681_vm5, %v4861_v36, %v9515_v2  ;;  %v4862_v63 = vld [vmem:[%s8661_s0 + $0x1a8] sm:$0xff]  ;;  %v9519_v30 = vld [vmem:[#allocation154_spill] sm:$0xff] }
 0x396   :  { %v2999_v18 = vrot.slane %v2985_v45, %v6916_v53  ;;  %v3000_v12 = vcombine.high %v2992_v55, %v2992_v55  ;;  %v1556_v32 = vpop.permute.xlu1 %1555  ;;  %v4151_v35 = vpop.f32.mrb[8].mxu0  ;;  %v4403_v41 = vmax.f32 %v4272_v39, 0.0  ;;  %4656 = vmatmul.mubr.msk.f32.gmra.mrb[34].mxu0 %vm3962_vm12, %v3434_v3  ;;  %v3443_v14 = vrot.slane %v3435_v25, %v6916_v53  ;;  %v9520_v27 = vld [vmem:[#allocation282_spill] sm:$0xff] }
 0x397   :  { %v3841_v23 = vrot.slane %v3827_v26, %v6916_v53  ;;  %v4152_v43 = vadd.f32 %v7955_v4, %v4151_v35  ;;  %v1382_v5 = vpop.permute.xlu0 %1381  ;;  %v4618_v47 = vpop.f32.mrb[9].mxu0  ;;  %4658 = vmatprep.mubr.msk.f32.mxu0 %vm4909_vm3, %v9296_v9  ;;  %v1761_v24 = vsel %vm1738_vm4, %v1704_v19, %v9516_v42  ;;  %v1731_v31 = vsel %vm1681_vm5, %v4862_v63, %v9519_v30  ;;  %v4863_v17 = vld [vmem:[%s8661_s0 + $0x1b0] sm:$0xff] }
 0x398   :  { %v3001_v34 = vcombine.high %v2999_v18, %v2999_v18  ;;  %v3843_v56 = vcombine.low %v2992_v55, %v3000_v12  ;;  %v2045_v11 = vsel %vm2023_vm10, %v1988_v20, %v1382_v5  ;;  %4452 = vst [vmem:[#allocation2 + $0xe0] sm:$0xff] %v4403_v41  ;;  %v1818_v6 = vsel %vm1795_vm6, %v1761_v24, %v9517_v52  ;;  %v9523_v26 = vld [vmem:[#allocation230_spill] sm:$0xff] }
 0x399   :  { %v4379_v57 = vmax.f32 %v4152_v43, 0.0  ;;  %v2102_v8 = vsel %vm2080_vm11, %v2045_v11, %v1556_v32  ;;  %v3842_v40 = vcombine.low %v3834_v60, %v3841_v23  ;;  %v1875_v38 = vsel %vm1852_vm7, %v1818_v6, %v9518_v7  ;;  %v9524_v32 = vld [vmem:[#allocation208_spill] sm:$0xff]  ;;  %v9527_v25 = vld [vmem:[#allocation266_spill] sm:$0xff] }
 0x39a   :  { %v3844_v58 = vcombine.low %v2999_v18, %v3001_v34  ;;  %v2547_v28 = vrot.slane %v2102_v8, %v6916_v53  ;;  %v1210_v44 = vpop.permute.xlu1 %1209  ;;  %v3851_v49 = vrot.slane %v3843_v56, %v6916_v53  ;;  %v1932_v59 = vsel %vm1909_vm8, %v1875_v38, %v9520_v27  ;;  %v9525_v60 = vld [vmem:[#allocation120_spill] sm:$0xff]  ;;  %v9526_v56 = vld [vmem:[#allocation234_spill] sm:$0xff] }
 0x39b   :  { %4428 = vst [vmem:[#allocation2 + $0x20] sm:$0xff] %v4379_v57  ;;  %4728 = vmatmul.mubr.msk.f32.gmra.mrb[32].mxu1 %vm3962_vm12, %v3842_v40  ;;  %v1092_v22 = vpop.permute.xlu0 %1091  ;;  %v2540_v61 = vcombine.high %v2102_v8, %v2102_v8  ;;  %v1788_v54 = vsel %vm1738_vm4, %v1731_v31, %v9521_v21  ;;  %v1989_v45 = vsel %vm1966_vm9, %v1932_v59, %v1210_v44 }
 0x39c   :  { %v3858_v33 = vrot.slane %v3844_v58, %v6916_v53  ;;  %v2555_v10 = vcombine.high %v2547_v28, %v2547_v28  ;;  %4730 = vmatprep.mubr.msk.f32.mxu1 %vm4909_vm3, %v9296_v9  ;;  %v1732_v1 = vsel %vm1681_vm5, %v4863_v17, %v9522_v37  ;;  %v1845_v39 = vsel %vm1795_vm6, %v1788_v54, %v9523_v26  ;;  %v4864_v54 = vld [vmem:[%s8661_s0 + $0xb8] sm:$0xff] }
 0x39d   :  { %v1789_v35 = vsel %vm1738_vm4, %v1732_v1, %v9524_v32  ;;  %v1902_v23 = vsel %vm1852_vm7, %v1845_v39, %v9525_v60  ;;  %v2554_v47 = vrot.slane %v2540_v61, %v6916_v53  ;;  %v9529_v17 = vld [vmem:[#allocation183_spill] sm:$0xff]  ;;  %v9532_v32 = vld [vmem:[#allocation281_spill] sm:$0xff] }
 0x39e   :  { %v3436_v51 = vcombine.low %v2547_v28, %v2555_v10  ;;  %v1094_v16 = vpop.permute.xlu1 %1093  ;;  %v3859_v15 = vcombine.low %v3851_v49, %v3858_v33  ;;  %v1846_v11 = vsel %vm1795_vm6, %v1789_v35, %v9526_v56  ;;  %v1959_v57 = vsel %vm1909_vm8, %v1902_v23, %v1092_v22  ;;  %v9530_v39 = vld [vmem:[#allocation219_spill] sm:$0xff]  ;;  %v9533_v56 = vld [vmem:[#allocation109_spill] sm:$0xff] }
 0x39f   :  { %v1264_v48 = vpop.permute.xlu0 %1263  ;;  %v1903_v49 = vsel %vm1852_vm7, %v1846_v11, %v9527_v25 }
 0x3a0   :  { %v3450_v0 = vrot.slane %v3436_v51, %v6916_v53  ;;  %4731 = vmatmul.mubr.msk.f32.gmra.mrb[34].mxu1 %vm3962_vm12, %v3859_v15  ;;  %v2016_v8 = vsel %vm1966_vm9, %v1959_v57, %v1264_v48  ;;  %v1960_v15 = vsel %vm1909_vm8, %v1903_v49, %v1094_v16 }
 0x3a1   :  { %4733 = vmatprep.mubr.msk.f32.mxu1 %vm4909_vm3, %v9296_v9 }
 0x3a2   :  { %v1438_v29 = vpop.permute.xlu1 %1437  ;;  %v3451_v50 = vcombine.low %v3443_v14, %v3450_v0 }
 0x3a3   :  { %v1384_v13 = vpop.permute.xlu0 %1383  ;;  %v2073_v33 = vsel %vm2023_vm10, %v2016_v8, %v1438_v29 }
 0x3a4   :  { %4659 = vmatmul.mubr.msk.f32.gmra.mrb[36].mxu0 %vm3962_vm12, %v3451_v50  ;;  %v2046_v3 = vsel %vm2023_vm10, %v1989_v45, %v1384_v13  ;;  %v9528_v45 = vld [vmem:[#allocation105_spill] sm:$0xff] }
 0x3a5   :  { %v4156_v55 = vpop.f32.mrb[10].mxu0  ;;  %4661 = vmatprep.mubr.msk.f32.mxu0 %vm4909_vm3, %v9296_v9 }
 0x3a6   :  { %v4157_v18 = vadd.f32 %v7955_v4, %v4156_v55  ;;  %v1558_v12 = vpop.permute.xlu1 %1557  ;;  %v4621_v20 = vpop.f32.mrb[11].mxu0  ;;  %v1705_v55 = vsel %vm1681_vm5, %v4864_v54, %v9528_v45  ;;  %v9543_v45 = vld [vmem:[#allocation265_spill] sm:$0xff] }
 0x3a7   :  { %v2103_v41 = vsel %vm2080_vm11, %v2046_v3, %v1558_v12  ;;  %v1266_v43 = vpop.permute.xlu0 %1265  ;;  %v1762_v37 = vsel %vm1738_vm4, %v1705_v55, %v9529_v17  ;;  %v9531_v12 = vld [vmem:[#allocation247_spill] sm:$0xff] }
 0x3a8   :  { %v4380_v5 = vmax.f32 %v4157_v18, 0.0  ;;  %v2556_v46 = vcombine.high %v2103_v41, %v2103_v41  ;;  %v2563_v34 = vrot.slane %v2103_v41, %v6916_v53  ;;  %v2017_v19 = vsel %vm1966_vm9, %v1960_v15, %v1266_v43  ;;  %v9536_v15 = vld [vmem:[#allocation251_spill] sm:$0xff] }
 0x3a9   :  { %v1819_v3 = vsel %vm1795_vm6, %v1762_v37, %v9530_v39 }
 0x3aa   :  { %4429 = vst [vmem:[#allocation2 + $0x28] sm:$0xff] %v4380_v5  ;;  %v8338_v40 = vrot.slane %v2556_v46, %v6916_v53  ;;  %v2571_v58 = vcombine.high %v2563_v34, %v2563_v34  ;;  %v3452_v28 = vcombine.low %v2554_v47, %v2563_v34  ;;  %v1440_v44 = vpop.permute.xlu1 %1439  ;;  %v1876_v20 = vsel %vm1852_vm7, %v1819_v3, %v9531_v12  ;;  %v4865_v34 = vld [vmem:[%s8661_s0 + $0xc0] sm:$0xff] }
 0x3ab   :  { %v1612_v10 = vpop.permute.xlu0 %1611  ;;  %v4276_v51 = vpop.f32.mrb[8].mxu1  ;;  %v2074_v52 = vsel %vm2023_vm10, %v2017_v19, %v1440_v44  ;;  %v1933_v35 = vsel %vm1909_vm8, %v1876_v20, %v9532_v32  ;;  %v1706_v11 = vsel %vm1681_vm5, %v4865_v34, %v9533_v56 }
 0x3ac   :  { %v3453_v22 = vcombine.low %v2571_v58, %v8338_v40  ;;  %v2130_v48 = vsel %vm2080_vm11, %v2073_v33, %v1612_v10  ;;  %v4277_v36 = vadd.f32 %v7955_v4, %v4276_v51  ;;  %v4693_v2 = vpop.f32.mrb[9].mxu1  ;;  %v3460_v42 = vrot.slane %v3452_v28, %v6916_v53  ;;  %v9534_v58 = vld [vmem:[#allocation185_spill] sm:$0xff]  ;;  %v9535_v33 = vld [vmem:[#allocation223_spill] sm:$0xff] }
 0x3ad   :  { %v3002_v14 = vcombine.high %v2130_v48, %v2130_v48  ;;  %v3009_v0 = vrot.slane %v2130_v48, %v6916_v53  ;;  %v1763_v28 = vsel %vm1738_vm4, %v1706_v11, %v9534_v58  ;;  %v2572_v44 = vcombine.high %v8338_v40, %v8338_v40  ;;  %v4866_v40 = vld [vmem:[%s8661_s0 + $0x1b8] sm:$0xff]  ;;  %v9544_v58 = vld [vmem:[#allocation237_spill] sm:$0xff] }
 0x3ae   :  { %v3467_v24 = vrot.slane %v3453_v22, %v6916_v53  ;;  %v4404_v6 = vmax.f32 %v4277_v36, 0.0  ;;  %v1614_v16 = vpop.permute.xlu1 %1613  ;;  %v1820_v10 = vsel %vm1795_vm6, %v1763_v28, %v9535_v33 }
 0x3af   :  { %v3017_v29 = vcombine.high %v3009_v0, %v3009_v0  ;;  %v8353_v50 = vsel %vm2080_vm11, %v2074_v52, %v1614_v16  ;;  %v1212_v7 = vpop.permute.xlu0 %1211  ;;  %v3016_v38 = vrot.slane %v3002_v14, %v6916_v53  ;;  %v1877_v22 = vsel %vm1852_vm7, %v1820_v10, %v9536_v15  ;;  %v9537_v14 = vld [vmem:[#allocation158_spill] sm:$0xff] }
 0x3b0   :  { %4453 = vst [vmem:[#allocation2 + $0xe8] sm:$0xff] %v4404_v6  ;;  %v8358_v13 = vrot.slane %v8353_v50, %v6916_v53  ;;  %v3468_v63 = vcombine.low %v3460_v42, %v3467_v24  ;;  %v1990_v23 = vsel %vm1966_vm9, %v1933_v35, %v1212_v7  ;;  %v9538_v42 = vld [vmem:[#allocation284_spill] sm:$0xff]  ;;  %v3018_v52 = vcombine.high %v8353_v50, %v8353_v50  ;;  %v9539_v16 = vld [vmem:[#allocation162_spill] sm:$0xff]  ;;  %v9540_v7 = vld [vmem:[#allocation207_spill] sm:$0xff] }
 0x3b1   :  { %v3860_v30 = vcombine.low %v3009_v0, %v3017_v29  ;;  %v1733_v0 = vsel %vm1681_vm5, %v4866_v40, %v9537_v14  ;;  %v1934_v24 = vsel %vm1909_vm8, %v1877_v22, %v9538_v42  ;;  %v4867_v6 = vld [vmem:[%s8661_s0 + $0x1c0] sm:$0xff] }
 0x3b2   :  { %v3861_v31 = vcombine.low %v3016_v38, %v8358_v13  ;;  %v1386_v27 = vpop.permute.xlu1 %1385  ;;  %4662 = vmatmul.mubr.msk.f32.gmra.mrb[38].mxu0 %vm3962_vm12, %v3468_v63  ;;  %v1734_v29 = vsel %vm1681_vm5, %v4867_v6, %v9539_v16  ;;  %v1790_v38 = vsel %vm1738_vm4, %v1733_v0, %v9540_v7 }
 0x3b3   :  { %v8362_v59 = vpop.permute.xlu0 %1095  ;;  %4664 = vmatprep.mubr.msk.f32.mxu0 %vm4909_vm3, %v9296_v9  ;;  %v3868_v61 = vrot.slane %v3860_v30, %v6916_v53  ;;  %v2047_v47 = vsel %vm2023_vm10, %v1990_v23, %v1386_v27  ;;  %v3033_v23 = vcombine.high %v8358_v13, %v8358_v13 }
 0x3b4   :  { %v3875_v21 = vrot.slane %v3861_v31, %v6916_v53  ;;  %v9541_v31 = vld [vmem:[#allocation210_spill] sm:$0xff] }
 0x3b5   :  { %v1791_v27 = vsel %vm1738_vm4, %v1734_v29, %v9541_v31 }
 0x3b6   :  { %v1268_v1 = vpop.permute.xlu1 %1267  ;;  %v3876_v26 = vcombine.low %v3868_v61, %v3875_v21  ;;  %v9542_v61 = vld [vmem:[#allocation233_spill] sm:$0xff]  ;;  %v1848_v28 = vsel %vm1795_vm6, %v1791_v27, %v9544_v58  ;;  %v9552_v58 = vld [vmem:[#allocation236_spill] sm:$0xff] }
 0x3b7   :  { %v1214_v18 = vpop.permute.xlu0 %1213  ;;  %v1847_v21 = vsel %vm1795_vm6, %v1790_v38, %v9542_v61 }
 0x3b8   :  { %4734 = vmatmul.mubr.msk.f32.gmra.mrb[36].mxu1 %vm3962_vm12, %v3876_v26  ;;  %v1991_v63 = vsel %vm1966_vm9, %v1934_v24, %v1214_v18  ;;  %v1904_v55 = vsel %vm1852_vm7, %v1847_v21, %v9543_v45  ;;  %v3032_v18 = vrot.slane %v3018_v52, %v6916_v53 }
 0x3b9   :  { %v4161_v60 = vpop.f32.mrb[12].mxu0  ;;  %4736 = vmatprep.mubr.msk.f32.mxu1 %vm4909_vm3, %v9296_v9 }
 0x3ba   :  { %v4162_v41 = vadd.f32 %v7955_v4, %v4161_v60  ;;  %v8386_v43 = vpop.permute.xlu1 %1097  ;;  %v4624_v5 = vpop.f32.mrb[13].mxu0 }
 0x3bb   :  { %v1560_v46 = vpop.permute.xlu0 %1559 }
 0x3bc   :  { %v4381_v57 = vmax.f32 %v4162_v41, 0.0  ;;  %v2104_v8 = vsel %vm2080_vm11, %v2047_v47, %v1560_v46  ;;  %v1961_v41 = vsel %vm1909_vm8, %v1904_v55, %v8362_v59 }
 0x3bd   :  { %v2573_v25 = vcombine.high %v2104_v8, %v2104_v8  ;;  %v2580_v49 = vrot.slane %v2104_v8, %v6916_v53  ;;  %v2018_v34 = vsel %vm1966_vm9, %v1961_v41, %v1268_v1 }
 0x3be   :  { %4430 = vst [vmem:[#allocation2 + $0x30] sm:$0xff] %v4381_v57  ;;  %v1442_v51 = vpop.permute.xlu1 %1441 }
 0x3bf   :  { %v2587_v48 = vrot.slane %v2573_v25, %v6916_v53  ;;  %v2588_v36 = vcombine.high %v2580_v49, %v2580_v49  ;;  %v3469_v2 = vcombine.low %v2572_v44, %v2580_v49  ;;  %v1388_v19 = vpop.permute.xlu0 %1387  ;;  %v2075_v44 = vsel %vm2023_vm10, %v2018_v34, %v1442_v51  ;;  %v9545_v25 = vld [vmem:[#allocation270_spill] sm:$0xff]  ;;  %v9550_v34 = vld [vmem:[#allocation209_spill] sm:$0xff] }
 0x3c0   :  { %v2048_v50 = vsel %vm2023_vm10, %v1991_v63, %v1388_v19  ;;  %v1905_v49 = vsel %vm1852_vm7, %v1848_v28, %v9545_v25  ;;  %v3034_v51 = vcombine.high %v3032_v18, %v3032_v18 }
 0x3c1   :  { %v3470_v30 = vcombine.low %v2588_v36, %v2587_v48  ;;  %v3477_v17 = vrot.slane %v3469_v2, %v6916_v53  ;;  %v1962_v15 = vsel %vm1909_vm8, %v1905_v49, %v8386_v43  ;;  %v3877_v2 = vcombine.low %v3033_v23, %v3032_v18  ;;  %v9548_v23 = vld [vmem:[#allocation161_spill] sm:$0xff] }
 0x3c2   :  { %v1562_v54 = vpop.permute.xlu1 %1561  ;;  %v9554_v49 = vld [vmem:[#allocation269_spill] sm:$0xff] }
 0x3c3   :  { %v3484_v37 = vrot.slane %v3470_v30, %v6916_v53  ;;  %v2105_v26 = vsel %vm2080_vm11, %v2048_v50, %v1562_v54  ;;  %v1270_v39 = vpop.permute.xlu0 %1269  ;;  %v4166_v3 = vpop.f32.mrb[14].mxu0  ;;  %v3885_v31 = vrot.slane %v3877_v2, %v6916_v53 }
 0x3c4   :  { %v2589_v12 = vcombine.high %v2105_v26, %v2105_v26  ;;  %v2596_v20 = vrot.slane %v2105_v26, %v6916_v53  ;;  %v4167_v32 = vadd.f32 %v7955_v4, %v4166_v3  ;;  %v4281_v35 = vpop.f32.mrb[10].mxu1  ;;  %v4627_v60 = vpop.f32.mrb[15].mxu0  ;;  %v2019_v40 = vsel %vm1966_vm9, %v1962_v15, %v1270_v39  ;;  %v9546_v26 = vld [vmem:[#allocation108_spill] sm:$0xff] }
 0x3c5   :  { %v4282_v5 = vadd.f32 %v7955_v4, %v4281_v35  ;;  %v4696_v47 = vpop.f32.mrb[11].mxu1  ;;  %v3485_v46 = vcombine.low %v3477_v17, %v3484_v37  ;;  %v4868_v37 = vld [vmem:[%s8661_s0 + $0xc8] sm:$0xff] }
 0x3c6   :  { %v2603_v56 = vrot.slane %v2589_v12, %v6916_v53  ;;  %v2604_v11 = vcombine.high %v2596_v20, %v2596_v20  ;;  %v4382_v57 = vmax.f32 %v4167_v32, 0.0  ;;  %v1444_v8 = vpop.permute.xlu1 %1443  ;;  %v1707_v39 = vsel %vm1681_vm5, %v4868_v37, %v9546_v26  ;;  %v9547_v32 = vld [vmem:[#allocation28_spill] sm:$0xff]  ;;  %v4869_v60 = vld [vmem:[%s8661_s0 + $0x1c8] sm:$0xff]  ;;  %v9560_v37 = vld [vmem:[#allocation239_spill] sm:$0xff] }
 0x3c7   :  { %v4405_v13 = vmax.f32 %v4282_v5, 0.0  ;;  %4665 = vmatmul.mubr.msk.f32.gmra.mrb[40].mxu0 %vm3962_vm12, %v3485_v46  ;;  %v1616_v59 = vpop.permute.xlu0 %1615  ;;  %v2076_v24 = vsel %vm2023_vm10, %v2019_v40, %v1444_v8  ;;  %v1764_v35 = vsel %vm1738_vm4, %v1707_v39, %v9547_v32  ;;  %v1735_v41 = vsel %vm1681_vm5, %v4869_v60, %v9548_v23  ;;  %v9549_v5 = vld [vmem:[#allocation222_spill] sm:$0xff]  ;;  %v9561_v39 = vld [vmem:[#allocation253_spill] sm:$0xff] }
 0x3c8   :  { %v2605_v33 = vcombine.high %v2603_v56, %v2603_v56  ;;  %v3486_v10 = vcombine.low %v2596_v20, %v2604_v11  ;;  %4431 = vst [vmem:[#allocation2 + $0x38] sm:$0xff] %v4382_v57  ;;  %v2132_v1 = vsel %vm2080_vm11, %v2075_v44, %v1616_v59  ;;  %4667 = vmatprep.mubr.msk.f32.mxu0 %vm4909_vm3, %v9296_v9  ;;  %v9551_v11 = vld [vmem:[#allocation250_spill] sm:$0xff]  ;;  %v9553_v44 = vld [vmem:[#allocation283_spill] sm:$0xff] }
 0x3c9   :  { %4454 = vst [vmem:[#allocation2 + $0xf0] sm:$0xff] %v4405_v13  ;;  %v3035_v22 = vcombine.high %v2132_v1, %v2132_v1  ;;  %v3042_v48 = vrot.slane %v2132_v1, %v6916_v53  ;;  %v4286_v36 = vpop.f32.mrb[12].mxu1  ;;  %v1821_v47 = vsel %vm1795_vm6, %v1764_v35, %v9549_v5  ;;  %v9563_v5 = vld [vmem:[#allocation272_spill] sm:$0xff] }
 0x3ca   :  { %v3487_v19 = vcombine.low %v2603_v56, %v2605_v33  ;;  %v4287_v14 = vadd.f32 %v7955_v4, %v4286_v36  ;;  %v1100_v0 = vpop.permute.xlu1 %1099  ;;  %v4699_v42 = vpop.f32.mrb[13].mxu1  ;;  %v3494_v29 = vrot.slane %v3486_v10, %v6916_v53  ;;  %v1792_v56 = vsel %vm1738_vm4, %v1735_v41, %v9550_v34  ;;  %v8508_v36 = vld [vmem:[%s8663_s2] ss:$0 sm:$0xff] }
 0x3cb   :  { %v3049_v52 = vrot.slane %v3035_v22, %v6916_v53  ;;  %v3050_v6 = vcombine.high %v3042_v48, %v3042_v48  ;;  %v3878_v43 = vcombine.low %v3034_v51, %v3042_v48  ;;  %v1618_v16 = vpop.permute.xlu0 %1617  ;;  %v1878_v57 = vsel %vm1852_vm7, %v1821_v47, %v9551_v11 }
 0x3cc   :  { %v3501_v7 = vrot.slane %v3487_v19, %v6916_v53  ;;  %v4406_v38 = vmax.f32 %v4287_v14, 0.0  ;;  %v2133_v63 = vsel %vm2080_vm11, %v2076_v24, %v1618_v16  ;;  %v1849_v28 = vsel %vm1795_vm6, %v1792_v56, %v9552_v58 }
 0x3cd   :  { %v3892_v30 = vrot.slane %v3878_v43, %v6916_v53  ;;  %v3058_v4 = vrot.slane %v2133_v63, %v6916_v53  ;;  %v3894_v21 = vcombine.low %v3050_v6, %v3049_v52  ;;  %v3051_v18 = vcombine.high %v2133_v63, %v2133_v63  ;;  %v4871_v6 = vld [vmem:[%s8661_s0 + $0xd0] sm:$0xff]  ;;  %v9555_v43 = vld [vmem:[#allocation111_spill] sm:$0xff]  ;;  %v9556_v63 = vld [vmem:[#allocation164_spill] sm:$0xff] }
 0x3ce   :  { %4455 = vst [vmem:[#allocation2 + $0xf8] sm:$0xff] %v4406_v38  ;;  %v1272_v27 = vpop.permute.xlu1 %1271  ;;  %v3502_v61 = vcombine.low %v3494_v29, %v3501_v7  ;;  %v1935_v13 = vsel %vm1909_vm8, %v1878_v57, %v9553_v44  ;;  %v1906_v33 = vsel %vm1852_vm7, %v1849_v28, %v9554_v49  ;;  %v1708_v16 = vsel %vm1681_vm5, %v4871_v6, %v9555_v43  ;;  %v4872_v38 = vld [vmem:[%s8661_s0 + $0x1d0] sm:$0xff] }
 0x3cf   :  { %v3066_v50 = vcombine.high %v3058_v4, %v3058_v4  ;;  %v1216_v54 = vpop.permute.xlu0 %1215  ;;  %v3893_v45 = vcombine.low %v3885_v31, %v3892_v30  ;;  %v3902_v3 = vrot.slane %v3894_v21, %v6916_v53  ;;  %v3065_v59 = vrot.slane %v3051_v18, %v6916_v53 }
 0x3d0   :  { %4668 = vmatmul.mubr.msk.f32.gmra.mrb[42].mxu0 %vm3962_vm12, %v3502_v61  ;;  %v1992_v10 = vsel %vm1966_vm9, %v1935_v13, %v1216_v54  ;;  %v1963_v1 = vsel %vm1909_vm8, %v1906_v33, %v1100_v0  ;;  %v1736_v30 = vsel %vm1681_vm5, %v4872_v38, %v9556_v63  ;;  %v9558_v61 = vld [vmem:[#allocation212_spill] sm:$0xff] }
 0x3d1   :  { %v3895_v55 = vcombine.low %v3058_v4, %v3066_v50  ;;  %4670 = vmatprep.mubr.msk.f32.mxu0 %vm4909_vm3, %v9296_v9  ;;  %4737 = vmatmul.mubr.msk.f32.gmra.mrb[38].mxu1 %vm3962_vm12, %v3893_v45  ;;  %v2020_v22 = vsel %vm1966_vm9, %v1963_v1, %v1272_v27  ;;  %v3067_v14 = vcombine.high %v3065_v59, %v3065_v59  ;;  %v9557_v4 = vld [vmem:[#allocation187_spill] sm:$0xff]  ;;  %v9559_v50 = vld [vmem:[#allocation225_spill] sm:$0xff]  ;;  %v9566_v38 = vld [vmem:[#allocation224_spill] sm:$0xff] }
 0x3d2   :  { %v1446_v17 = vpop.permute.xlu1 %1445  ;;  %4739 = vmatprep.mubr.msk.f32.mxu1 %vm4909_vm3, %v9296_v9  ;;  %v1765_v31 = vsel %vm1738_vm4, %v1708_v16, %v9557_v4  ;;  %v1793_v21 = vsel %vm1738_vm4, %v1736_v30, %v9558_v61 }
 0x3d3   :  { %v3909_v12 = vrot.slane %v3895_v55, %v6916_v53  ;;  %v1390_v20 = vpop.permute.xlu0 %1389  ;;  %v2077_v42 = vsel %vm2023_vm10, %v2020_v22, %v1446_v17  ;;  %v1822_v54 = vsel %vm1795_vm6, %v1765_v31, %v9559_v50  ;;  %v3911_v45 = vcombine.low %v3065_v59, %v3067_v14  ;;  %v9565_v14 = vld [vmem:[#allocation186_spill] sm:$0xff]  ;;  %v9567_v31 = vld [vmem:[#allocation252_spill] sm:$0xff] }
 0x3d4   :  { %v2049_v15 = vsel %vm2023_vm10, %v1992_v10, %v1390_v20  ;;  %v1850_v26 = vsel %vm1795_vm6, %v1793_v21, %v9560_v37  ;;  %v9562_v20 = vld [vmem:[#allocation286_spill] sm:$0xff] }
 0x3d5   :  { %v3910_v46 = vcombine.low %v3902_v3, %v3909_v12  ;;  %v1879_v3 = vsel %vm1852_vm7, %v1822_v54, %v9561_v39  ;;  %v1907_v47 = vsel %vm1852_vm7, %v1850_v26, %v9563_v5  ;;  %v3919_v56 = vrot.slane %v3911_v45, %v6916_v53  ;;  %v9568_v39 = vld [vmem:[#allocation285_spill] sm:$0xff] }
 0x3d6   :  { %v1564_v8 = vpop.permute.xlu1 %1563  ;;  %v1936_v32 = vsel %vm1909_vm8, %v1879_v3, %v9562_v20  ;;  %v2662_v45 = vrot.slane %v6956_v62, %v6916_v53  ;;  %v9569_v20 = vld [vmem:[#allocation163_spill] sm:$0xff] }
 0x3d7   :  { %4740 = vmatmul.mubr.msk.f32.gmra.mrb[40].mxu1 %vm3962_vm12, %v3910_v46  ;;  %v1218_v25 = vpop.permute.xlu0 %1217  ;;  %v2106_v48 = vsel %vm2080_vm11, %v2049_v15, %v1564_v8  ;;  %v4873_v15 = vld [vmem:[%s8661_s0 + $0xd8] sm:$0xff] }
 0x3d8   :  { %4742 = vmatprep.mubr.msk.f32.mxu1 %vm4909_vm3, %v9296_v9  ;;  %v2613_v29 = vrot.slane %v2106_v48, %v6916_v53  ;;  %v2606_v18 = vcombine.high %v2106_v48, %v2106_v48  ;;  %v1993_v46 = vsel %vm1966_vm9, %v1936_v32, %v1218_v25  ;;  %v9570_v62 = vld [vmem:[#allocation211_spill] sm:$0xff] }
 0x3d9   :  { %v4291_v51 = vpop.f32.mrb[14].mxu1 }
 0x3da   :  { %v4292_v2 = vadd.f32 %v8508_v36, %v4291_v51  ;;  %v1102_v19 = vpop.permute.xlu1 %1101  ;;  %v4702_v40 = vpop.f32.mrb[15].mxu1  ;;  %v2621_v35 = vcombine.high %v2613_v29, %v2613_v29  ;;  %v2620_v28 = vrot.slane %v2606_v18, %v6916_v53  ;;  %v9564_v51 = vld [vmem:[#allocation110_spill] sm:$0xff] }
 0x3db   :  { %v1620_v0 = vpop.permute.xlu0 %1619  ;;  %v1964_v44 = vsel %vm1909_vm8, %v1907_v47, %v1102_v19  ;;  %v1709_v22 = vsel %vm1681_vm5, %v4873_v15, %v9564_v51 }
 0x3dc   :  { %v4407_v24 = vmax.f32 %v4292_v2, 0.0  ;;  %v2134_v52 = vsel %vm2080_vm11, %v2077_v42, %v1620_v0  ;;  %v3503_v49 = vcombine.low %v2613_v29, %v2621_v35  ;;  %v1766_v42 = vsel %vm1738_vm4, %v1709_v22, %v9565_v14 }
 0x3dd   :  { %v3075_v7 = vrot.slane %v2134_v52, %v6916_v53  ;;  %v3068_v13 = vcombine.high %v2134_v52, %v2134_v52  ;;  %v1823_v63 = vsel %vm1795_vm6, %v1766_v42, %v9566_v38 }
 0x3de   :  { %4456 = vst [vmem:[#allocation2 + $0x100] sm:$0xff] %v4407_v24  ;;  %v1274_v27 = vpop.permute.xlu1 %1273  ;;  %v3511_v30 = vrot.slane %v3503_v49, %v6916_v53  ;;  %v9572_v49 = vld [vmem:[#allocation271_spill] sm:$0xff] }
 0x3df   :  { %v3083_v55 = vcombine.high %v3075_v7, %v3075_v7  ;;  %v1392_v17 = vpop.permute.xlu0 %1391  ;;  %v4171_v12 = vpop.f32.mrb[16].mxu0  ;;  %v2021_v33 = vsel %vm1966_vm9, %v1964_v44, %v1274_v27  ;;  %v3082_v43 = vrot.slane %v3068_v13, %v6916_v53  ;;  %v1880_v27 = vsel %vm1852_vm7, %v1823_v63, %v9567_v31 }
 0x3e0   :  { %v4172_v23 = vadd.f32 %v8508_v36, %v4171_v12  ;;  %v4630_v41 = vpop.f32.mrb[17].mxu0  ;;  %v2050_v57 = vsel %vm2023_vm10, %v1993_v46, %v1392_v17  ;;  %v1937_v3 = vsel %vm1909_vm8, %v1880_v27, %v9568_v39  ;;  %v4874_v12 = vld [vmem:[%s8661_s0 + $0x1d8] sm:$0xff]  ;;  %v9571_v46 = vld [vmem:[#allocation238_spill] sm:$0xff]  ;;  %s4911_s0 = smov [#allocation2]  }
 0x3e1   :  { %v3912_v60 = vcombine.low %v3075_v7, %v3083_v55  ;;  %v1737_v32 = vsel %vm1681_vm5, %v4874_v12, %v9569_v20  ;;  %s4478_s5 = sshll.u32 %s4911_s0, 4  ;;  %s4479_s5 = int_to_ptr.vmem [resolvable:$true] %s4478_s5 }
 0x3e2   :  { %v1448_v34 = vpop.permute.xlu1 %1447  ;;  %v4383_v8 = vmax.f32 %v4172_v23, 0.0  ;;  %s4875_s6 = scalar_lea.vmem %s4479_s5, 6272  ;;  %p4880_p1 = scmp.lt.s32.totalorder %s4479_s5, %s4479_s5 }
 0x3e3   :  { %v3926_v11 = vrot.slane %v3912_v60, %v6916_v53  ;;  %v1566_v58 = vpop.permute.xlu0 %1565  ;;  %v2078_v48 = vsel %vm2023_vm10, %v2021_v33, %v1448_v34  ;;  %v1794_v60 = vsel %vm1738_vm4, %v1737_v32, %v9570_v62  ;;  %p4876_p0 = scmp.ne.s32.totalorder %s4479_s5, %s4875_s6  ;;  %p4881_p2 = scmp.lt.s32.totalorder %s4875_s6, %s4875_s6 }
 0x3e4   :  { %v2107_v59 = vsel %vm2080_vm11, %v2050_v57, %v1566_v58  ;;  %4432 = vst [vmem:[#allocation2 + $0x40] sm:$0xff] %v4383_v8  ;;  %v1851_v34 = vsel %vm1795_vm6, %v1794_v60, %v9571_v46 }
 0x3e5   :  { %v2629_v25 = vrot.slane %v2107_v59, %v6916_v53  ;;  %v4296_v10 = vpop.f32.mrb[16].mxu1  ;;  %v3927_v1 = vcombine.low %v3919_v56, %v3926_v11  ;;  %v2622_v0 = vcombine.high %v2107_v59, %v2107_v59  ;;  %v2670_v56 = vcombine.high %v2662_v45, %v2662_v45  ;;  %p4882_p3 = por %p4881_p2, %p4880_p1 }
 0x3e6   :  { %v4297_v2 = vadd.f32 %v8508_v36, %v4296_v10  ;;  %v1622_v19 = vpop.permute.xlu1 %1621  ;;  %v4705_v40 = vpop.f32.mrb[17].mxu1  ;;  %v1908_v33 = vsel %vm1852_vm7, %v1851_v34, %v9572_v49 }
 0x3e7   :  { %v3504_v24 = vcombine.low %v2620_v28, %v2629_v25  ;;  %v2135_v52 = vsel %vm2080_vm11, %v2078_v48, %v1622_v19  ;;  %4743 = vmatmul.mubr.msk.f32.gmra.mrb[42].mxu1 %vm3962_vm12, %v3927_v1  ;;  %v1220_v6 = vpop.permute.xlu0 %1219  ;;  %v2636_v55 = vrot.slane %v2622_v0, %v6916_v53  ;;  %v2637_v17 = vcombine.high %v2629_v25, %v2629_v25  ;;  %p4883_p4 = pnand %p4882_p3, %p4876_p0 }
 0x3e8   :  { %v4408_v16 = vmax.f32 %v4297_v2, 0.0  ;;  %v3084_v29 = vcombine.high %v2135_v52, %v2135_v52  ;;  %v3091_v7 = vrot.slane %v2135_v52, %v6916_v53  ;;  %4745 = vmatprep.mubr.msk.f32.mxu1 %vm4909_vm3, %v9296_v9  ;;  %v1994_v35 = vsel %vm1966_vm9, %v1937_v3, %v1220_v6 }
 0x3e9   :  { %v3518_v4 = vrot.slane %v3504_v24, %v6916_v53  ;;  %v3520_v11 = vcombine.low %v2637_v17, %v2636_v55  ;;  %v2638_v58 = vcombine.high %v2636_v55, %v2636_v55  ;;  %v3538_v2 = vcombine.low %v2662_v45, %v2670_v56 }
 0x3ea   :  { %4457 = vst [vmem:[#allocation2 + $0x108] sm:$0xff] %v4408_v16  ;;  %v3098_v61 = vrot.slane %v3084_v29, %v6916_v53  ;;  %v3099_v21 = vcombine.high %v3091_v7, %v3091_v7  ;;  %v3928_v50 = vcombine.low %v3082_v43, %v3091_v7  ;;  %v1394_v54 = vpop.permute.xlu1 %1393 }
 0x3eb   :  { %v1104_v37 = vpop.permute.xlu0 %1103  ;;  %v3519_v26 = vcombine.low %v3511_v30, %v3518_v4  ;;  %v2051_v5 = vsel %vm2023_vm10, %v1994_v35, %v1394_v54  ;;  %v3528_v42 = vrot.slane %v3520_v11, %v6916_v53  ;;  %v3552_v63 = vrot.slane %v3538_v2, %v6916_v53 }
 0x3ec   :  { %v3929_v18 = vcombine.low %v3099_v21, %v3098_v61  ;;  %v3936_v23 = vrot.slane %v3928_v50, %v6916_v53  ;;  %v1965_v1 = vsel %vm1909_vm8, %v1908_v33, %v1104_v37  ;;  %v3100_v43 = vcombine.high %v3098_v61, %v3098_v61 }
 0x3ed   :  { %4671 = vmatmul.mubr.msk.f32.gmra.mrb[44].mxu0 %vm3962_vm12, %v3519_v26 }
 0x3ee   :  { %v3943_v41 = vrot.slane %v3929_v18, %v6916_v53  ;;  %v1568_v47 = vpop.permute.xlu1 %1567  ;;  %4673 = vmatprep.mubr.msk.f32.mxu0 %vm4909_vm3, %v9296_v9 }
 0x3ef   :  { %v2108_v57 = vsel %vm2080_vm11, %v2051_v5, %v1568_v47  ;;  %v1276_v8 = vpop.permute.xlu0 %1275  ;;  %v4176_v13 = vpop.f32.mrb[18].mxu0 }
 0x3f0   :  { %v2639_v28 = vcombine.high %v2108_v57, %v2108_v57  ;;  %v2646_v44 = vrot.slane %v2108_v57, %v6916_v53  ;;  %v3944_v59 = vcombine.low %v3936_v23, %v3943_v41  ;;  %v4177_v25 = vadd.f32 %v8508_v36, %v4176_v13  ;;  %v4633_v10 = vpop.f32.mrb[19].mxu0 }
 0x3f1   :  { %v2022_v19 = vsel %vm1966_vm9, %v1965_v1, %v1276_v8 }
 0x3f2   :  { %v2653_v15 = vrot.slane %v2639_v28, %v6916_v53  ;;  %v2654_v51 = vcombine.high %v2646_v44, %v2646_v44  ;;  %v3521_v22 = vcombine.low %v2638_v58, %v2646_v44  ;;  %4746 = vmatmul.mubr.msk.f32.gmra.mrb[44].mxu1 %vm3962_vm12, %v3944_v59  ;;  %v1624_v48 = vpop.permute.xlu1 %1623  ;;  %v4384_v40 = vmax.f32 %v4177_v25, 0.0 }
 0x3f3   :  { %v1450_v14 = vpop.permute.xlu0 %1449  ;;  %4748 = vmatprep.mubr.msk.f32.mxu1 %vm4909_vm3, %v9296_v9 }
 0x3f4   :  { %v3535_v0 = vrot.slane %v3521_v22, %v6916_v53  ;;  %v3537_v24 = vcombine.low %v2654_v51, %v2653_v15  ;;  %v2079_v52 = vsel %vm2023_vm10, %v2022_v19, %v1450_v14  ;;  %4433 = vst [vmem:[#allocation2 + $0x48] sm:$0xff] %v4384_v40 }
 0x3f5   :  { %v2136_v6 = vsel %vm2080_vm11, %v2079_v52, %v1624_v48 }
 0x3f6   :  { %v3545_v16 = vrot.slane %v3537_v24, %v6916_v53  ;;  %v3101_v29 = vcombine.high %v2136_v6, %v2136_v6  ;;  %v3108_v7 = vrot.slane %v2136_v6, %v6916_v53  ;;  %v3536_v38 = vcombine.low %v3528_v42, %v3535_v0 }
 0x3f8   :  { %v3115_v30 = vrot.slane %v3101_v29, %v6916_v53  ;;  %v3116_v4 = vcombine.high %v3108_v7, %v3108_v7  ;;  %v3945_v31 = vcombine.low %v3100_v43, %v3108_v7  ;;  %4674 = vmatmul.mubr.msk.f32.gmra.mrb[46].mxu0 %vm3962_vm12, %v3536_v38  ;;  %v3553_v61 = vcombine.low %v3545_v16, %v3552_v63 }
 0x3f9   :  { %4676 = vmatprep.mubr.msk.f32.mxu0 %vm4909_vm3, %v9296_v9  ;;  %v4181_v21 = vpop.f32.mrb[20].mxu0 }
 0x3fa   :  { %v3946_v27 = vcombine.low %v3116_v4, %v3115_v30  ;;  %v4182_v50 = vadd.f32 %v8508_v36, %v4181_v21  ;;  %v4636_v54 = vpop.f32.mrb[21].mxu0  ;;  %v3953_v45 = vrot.slane %v3945_v31, %v6916_v53 }
 0x3fc   :  { %v3960_v55 = vrot.slane %v3946_v27, %v6916_v53  ;;  %4677 = vmatmul.mubr.msk.f32.gmra.mrb[48].mxu0 %vm3962_vm12, %v3553_v61  ;;  %v4385_v17 = vmax.f32 %v4182_v50, 0.0 }
 0x3fe   :  { %v4301_v37 = vpop.f32.mrb[18].mxu1  ;;  %v3961_v26 = vcombine.low %v3953_v45, %v3960_v55  ;;  %4434 = vst [vmem:[#allocation2 + $0x50] sm:$0xff] %v4385_v17 }
 0x3ff   :  { %v4302_v39 = vadd.f32 %v8508_v36, %v4301_v37  ;;  %v4708_v3 = vpop.f32.mrb[19].mxu1 }
 0x400   :  { %4749 = vmatmul.mubr.msk.f32.gmra.mrb[46].mxu1 %vm3962_vm12, %v3961_v26 }
 0x401   :  { %v4409_v9 = vmax.f32 %v4302_v39, 0.0 }
 0x403   :  { %4458 = vst [vmem:[#allocation2 + $0x110] sm:$0xff] %v4409_v9  ;;  %v4306_v18 = vpop.f32.mrb[20].mxu1 }
 0x404   :  { %v4307_v12 = vadd.f32 %v8508_v36, %v4306_v18  ;;  %v4711_v20 = vpop.f32.mrb[21].mxu1 }
 0x406   :  { %v4410_v32 = vmax.f32 %v4307_v12, 0.0 }
 0x407   :  { %v4186_v35 = vpop.f32.mrb[22].mxu0 }
 0x408   :  { %4459 = vst [vmem:[#allocation2 + $0x118] sm:$0xff] %v4410_v32  ;;  %v4187_v53 = vadd.f32 %v8508_v36, %v4186_v35  ;;  %v4639_v62 = vpop.f32.mrb[23].mxu0 }
 0x40a   :  { %v4386_v60 = vmax.f32 %v4187_v53, 0.0 }
 0x40c   :  { %4435 = vst [vmem:[#allocation2 + $0x58] sm:$0xff] %v4386_v60 }
 0x415   :  { %v4191_v23 = vpop.f32.mrb[24].mxu0 }
 0x416   :  { %v4192_v41 = vadd.f32 %v8508_v36, %v4191_v23  ;;  %v4642_v5 = vpop.f32.mrb[25].mxu0 }
 0x418   :  { %v4387_v47 = vmax.f32 %v4192_v41, 0.0 }
 0x41a   :  { %4436 = vst [vmem:[#allocation2 + $0x60] sm:$0xff] %v4387_v47 }
 0x41b   :  { %v4311_v46 = vpop.f32.mrb[22].mxu1 }
 0x41c   :  { %v4312_v34 = vadd.f32 %v8508_v36, %v4311_v46  ;;  %v4714_v56 = vpop.f32.mrb[23].mxu1 }
 0x41e   :  { %v4411_v11 = vmax.f32 %v4312_v34, 0.0 }
 0x420   :  { %4460 = vst [vmem:[#allocation2 + $0x120] sm:$0xff] %v4411_v11 }
 0x42a   :  { %v4196_v57 = vpop.f32.mrb[26].mxu0 }
 0x42b   :  { %v4197_v8 = vadd.f32 %v8508_v36, %v4196_v57  ;;  %v4645_v58 = vpop.f32.mrb[27].mxu0 }
 0x42d   :  { %v4388_v28 = vmax.f32 %v4197_v8, 0.0 }
 0x42f   :  { %4437 = vst [vmem:[#allocation2 + $0x68] sm:$0xff] %v4388_v28 }
 0x433   :  { %v4201_v44 = vpop.f32.mrb[28].mxu0 }
 0x434   :  { %v4202_v13 = vadd.f32 %v8508_v36, %v4201_v44  ;;  %v4648_v59 = vpop.f32.mrb[29].mxu0 }
 0x435   :  { %v4316_v49 = vpop.f32.mrb[24].mxu1 }
 0x436   :  { %v4389_v33 = vmax.f32 %v4202_v13, 0.0  ;;  %v4317_v25 = vadd.f32 %v8508_v36, %v4316_v49  ;;  %v4717_v10 = vpop.f32.mrb[25].mxu1 }
 0x438   :  { %4438 = vst [vmem:[#allocation2 + $0x70] sm:$0xff] %v4389_v33  ;;  %v4412_v1 = vmax.f32 %v4317_v25, 0.0 }
 0x43a   :  { %4461 = vst [vmem:[#allocation2 + $0x128] sm:$0xff] %v4412_v1  ;;  %v4321_v15 = vpop.f32.mrb[26].mxu1 }
 0x43b   :  { %v4322_v51 = vadd.f32 %v8508_v36, %v4321_v15  ;;  %v4720_v22 = vpop.f32.mrb[27].mxu1 }
 0x43d   :  { %v4413_v48 = vmax.f32 %v4322_v51, 0.0 }
 0x43f   :  { %4462 = vst [vmem:[#allocation2 + $0x130] sm:$0xff] %v4413_v48 }
 0x44a   :  { %v4326_v2 = vpop.f32.mrb[28].mxu1 }
 0x44b   :  { %v4327_v19 = vadd.f32 %v8508_v36, %v4326_v2  ;;  %v4723_v40 = vpop.f32.mrb[29].mxu1 }
 0x44d   :  { %v4414_v14 = vmax.f32 %v4327_v19, 0.0 }
 0x44f   :  { %4463 = vst [vmem:[#allocation2 + $0x138] sm:$0xff] %v4414_v14 }
 0x450   :  { %v4206_v42 = vpop.f32.mrb[30].mxu0 }
 0x451   :  { %v4207_v0 = vadd.f32 %v8508_v36, %v4206_v42  ;;  %v4651_v24 = vpop.f32.mrb[31].mxu0 }
 0x453   :  { %v4390_v52 = vmax.f32 %v4207_v0, 0.0 }
 0x455   :  { %4439 = vst [vmem:[#allocation2 + $0x78] sm:$0xff] %v4390_v52  ;;  %v4331_v6 = vpop.f32.mrb[30].mxu1 }
 0x456   :  { %v4332_v43 = vadd.f32 %v8508_v36, %v4331_v6  ;;  %v4726_v16 = vpop.f32.mrb[31].mxu1 }
 0x458   :  { %v4415_v29 = vmax.f32 %v4332_v43, 0.0 }
 0x45a   :  { %4464 = vst [vmem:[#allocation2 + $0x140] sm:$0xff] %v4415_v29 }
 0x460   :  { %v4211_v7 = vpop.f32.mrb[32].mxu0 }
 0x461   :  { %v4212_v38 = vadd.f32 %v8508_v36, %v4211_v7  ;;  %v4654_v63 = vpop.f32.mrb[33].mxu0 }
 0x463   :  { %v4391_v30 = vmax.f32 %v4212_v38, 0.0 }
 0x465   :  { %4440 = vst [vmem:[#allocation2 + $0x80] sm:$0xff] %v4391_v30 }
 0x469   :  { %v4216_v4 = vpop.f32.mrb[34].mxu0 }
 0x46a   :  { %v4217_v31 = vadd.f32 %v8508_v36, %v4216_v4  ;;  %v4657_v27 = vpop.f32.mrb[35].mxu0 }
 0x46c   :  { %v4392_v21 = vmax.f32 %v4217_v31, 0.0 }
 0x46e   :  { %v4336_v61 = vpop.f32.mrb[32].mxu1  ;;  %4441 = vst [vmem:[#allocation2 + $0x88] sm:$0xff] %v4392_v21 }
 0x46f   :  { %v4337_v50 = vadd.f32 %v8508_v36, %v4336_v61  ;;  %v4729_v54 = vpop.f32.mrb[33].mxu1 }
 0x471   :  { %v4416_v45 = vmax.f32 %v4337_v50, 0.0 }
 0x473   :  { %4465 = vst [vmem:[#allocation2 + $0x148] sm:$0xff] %v4416_v45  ;;  %v4341_v55 = vpop.f32.mrb[34].mxu1 }
 0x474   :  { %v4342_v17 = vadd.f32 %v8508_v36, %v4341_v55  ;;  %v4732_v37 = vpop.f32.mrb[35].mxu1 }
 0x476   :  { %v4417_v26 = vmax.f32 %v4342_v17, 0.0 }
 0x477   :  { %v4221_v39 = vpop.f32.mrb[36].mxu0 }
 0x478   :  { %4466 = vst [vmem:[#allocation2 + $0x150] sm:$0xff] %v4417_v26  ;;  %v4222_v3 = vadd.f32 %v8508_v36, %v4221_v39  ;;  %v4660_v9 = vpop.f32.mrb[37].mxu0 }
 0x47a   :  { %v4393_v18 = vmax.f32 %v4222_v3, 0.0 }
 0x47c   :  { %4442 = vst [vmem:[#allocation2 + $0x90] sm:$0xff] %v4393_v18 }
 0x485   :  { %v4226_v12 = vpop.f32.mrb[38].mxu0 }
 0x486   :  { %v4227_v20 = vadd.f32 %v8508_v36, %v4226_v12  ;;  %v4663_v32 = vpop.f32.mrb[39].mxu0 }
 0x488   :  { %v4394_v35 = vmax.f32 %v4227_v20, 0.0 }
 0x48a   :  { %4443 = vst [vmem:[#allocation2 + $0x98] sm:$0xff] %v4394_v35 }
 0x48b   :  { %v4346_v53 = vpop.f32.mrb[36].mxu1 }
 0x48c   :  { %v4347_v62 = vadd.f32 %v8508_v36, %v4346_v53  ;;  %v4735_v60 = vpop.f32.mrb[37].mxu1 }
 0x48e   :  { %v4418_v23 = vmax.f32 %v4347_v62, 0.0 }
 0x490   :  { %4467 = vst [vmem:[#allocation2 + $0x158] sm:$0xff] %v4418_v23 }
 0x49a   :  { %v4231_v41 = vpop.f32.mrb[40].mxu0 }
 0x49b   :  { %v4232_v5 = vadd.f32 %v8508_v36, %v4231_v41  ;;  %v4666_v47 = vpop.f32.mrb[41].mxu0 }
 0x49d   :  { %v4395_v46 = vmax.f32 %v4232_v5, 0.0 }
 0x49f   :  { %4444 = vst [vmem:[#allocation2 + $0xa0] sm:$0xff] %v4395_v46 }
 0x4a3   :  { %v4236_v34 = vpop.f32.mrb[42].mxu0 }
 0x4a4   :  { %v4237_v56 = vadd.f32 %v8508_v36, %v4236_v34  ;;  %v4669_v11 = vpop.f32.mrb[43].mxu0  ;;  %v4351_v57 = vpop.f32.mrb[38].mxu1 }
 0x4a5   :  { %v4352_v58 = vadd.f32 %v8508_v36, %v4351_v57  ;;  %v4738_v28 = vpop.f32.mrb[39].mxu1 }
 0x4a6   :  { %v4396_v8 = vmax.f32 %v4237_v56, 0.0 }
 0x4a7   :  { %v4419_v44 = vmax.f32 %v4352_v58, 0.0 }
 0x4a8   :  { %4445 = vst [vmem:[#allocation2 + $0xa8] sm:$0xff] %v4396_v8 }
 0x4a9   :  { %4468 = vst [vmem:[#allocation2 + $0x160] sm:$0xff] %v4419_v44 }
 0x4aa   :  { %v4356_v13 = vpop.f32.mrb[40].mxu1 }
 0x4ab   :  { %v4357_v59 = vadd.f32 %v8508_v36, %v4356_v13  ;;  %v4741_v49 = vpop.f32.mrb[41].mxu1 }
 0x4ad   :  { %v4420_v33 = vmax.f32 %v4357_v59, 0.0 }
 0x4af   :  { %4469 = vst [vmem:[#allocation2 + $0x168] sm:$0xff] %v4420_v33 }
 0x4ba   :  { %v4361_v25 = vpop.f32.mrb[42].mxu1 }
 0x4bb   :  { %v4362_v10 = vadd.f32 %v8508_v36, %v4361_v25  ;;  %v4744_v1 = vpop.f32.mrb[43].mxu1 }
 0x4bd   :  { %v4421_v15 = vmax.f32 %v4362_v10, 0.0 }
 0x4bf   :  { %4470 = vst [vmem:[#allocation2 + $0x170] sm:$0xff] %v4421_v15 }
 0x4c0   :  { %v4241_v51 = vpop.f32.mrb[44].mxu0 }
 0x4c1   :  { %v4242_v22 = vadd.f32 %v8508_v36, %v4241_v51  ;;  %v4672_v48 = vpop.f32.mrb[45].mxu0 }
 0x4c3   :  { %v4397_v2 = vmax.f32 %v4242_v22, 0.0 }
 0x4c5   :  { %4446 = vst [vmem:[#allocation2 + $0xb0] sm:$0xff] %v4397_v2  ;;  %v4366_v19 = vpop.f32.mrb[44].mxu1 }
 0x4c6   :  { %v4367_v40 = vadd.f32 %v8508_v36, %v4366_v19  ;;  %v4747_v14 = vpop.f32.mrb[45].mxu1 }
 0x4c8   :  { %v4422_v42 = vmax.f32 %v4367_v40, 0.0 }
 0x4ca   :  { %4471 = vst [vmem:[#allocation2 + $0x178] sm:$0xff] %v4422_v42 }
 0x4cb   :  { %v4246_v0 = vpop.f32.mrb[46].mxu0 }
 0x4cc   :  { %v4247_v24 = vadd.f32 %v8508_v36, %v4246_v0  ;;  %v4675_v52 = vpop.f32.mrb[47].mxu0 }
 0x4ce   :  { %v4398_v6 = vmax.f32 %v4247_v24, 0.0 }
 0x4cf   :  { %v4251_v43 = vpop.f32.mrb[48].mxu0 }
 0x4d0   :  { %4447 = vst [vmem:[#allocation2 + $0xb8] sm:$0xff] %v4398_v6  ;;  %v4252_v16 = vadd.f32 %v8508_v36, %v4251_v43  ;;  %v4678_v29 = vpop.f32.mrb[49].mxu0 }
 0x4d2   :  { %v4399_v7 = vmax.f32 %v4252_v16, 0.0 }
 0x4d3   :  { %v4371_v38 = vpop.f32.mrb[46].mxu1 }
 0x4d4   :  { %4448 = vst [vmem:[#allocation2 + $0xc0] sm:$0xff] %v4399_v7  ;;  %v4372_v63 = vadd.f32 %v8508_v36, %v4371_v38  ;;  %v4750_v30 = vpop.f32.mrb[47].mxu1 }
 0x4d6   :  { %v4423_v4 = vmax.f32 %v4372_v63, 0.0 }
 0x4d8   :  { %4472 = vst [vmem:[#allocation2 + $0x180] sm:$0xff] %v4423_v4 }
 0x4d9   :  { %4886 = shalt.err (!%p4883_p4)
}
 0x4da   :  { %s4887_s9 = scalar_lea.hbm %s8664_s3, 6272 }
 0x4db   :  { %p4888_p5 = scmp.ne.s32.totalorder %s8664_s3, %s4887_s9  ;;  %p4891_p6 = scmp.lt.u32.totalorder %s4887_s9, %s8664_s3 }
 0x4dd   :  { %p4893_p7 = pnand %p4891_p6, %p4888_p5 }
 0x4df   :  { %4896 = shalt.err (!%p4893_p7)
}
 0x4e0   :  { %s4912_s14 = smov 128  }
 0x4e1   :  { %4484 = dma.vmem_to_hbm [thread:$0]  %s4479_s5, 6272, %s8664_s3, [#allocation3], %s4912_s14, %s4912_s14, %s4900_s20  }
 0x4e2   :  { %4897 = dma.done.wait [#allocation3], 6272  }
 0x4e3   :  { %4898 = vsyncadd [#allocation3], 4294961024 }
 0x4e4   :  { %4488 = vsyncpa [#allocation3], 1 }

</bundles_post_ra>
